<compile_context>
chip_gen: v5e
topology: v5e:2x2
jax: 0.10.0
libtpu: 0.0.40
codegen_flags: <defaults>
</compile_context>

<pallas_src>
import math

import jax
import jax.numpy as jnp
from jax.experimental import pallas as pl
from jax.experimental.pallas import tpu as pltpu


def _fourier_kernel(x_ref, bt2_ref, phase_ref, o_ref):
    # x_ref:     (tile_n, D_in)  VMEM
    # bt2_ref:   (D_in, 2*F)     VMEM -- (2*pi*factor) * [B.T | B.T], resident
    # phase_ref: (1, 2*F)        VMEM -- [0]*F ++ [pi/2]*F, resident
    # o_ref:     (tile_n, 2*F)   VMEM
    x_proj = jnp.dot(
        x_ref[...],
        bt2_ref[...],
        preferred_element_type=jnp.float32,
        precision=jax.lax.Precision.HIGHEST,  # tiny K; MXU is not the bottleneck
    )
    # sin(t) for the first F lanes, sin(t + pi/2) == cos(t) for the second F.
    # Single lane-dense (tile_n, 2F) store, no concatenate, no masked half-stores.
    o_ref[...] = jnp.sin(x_proj + phase_ref[...]).astype(o_ref.dtype)


def input_mapping_ref(x, B, factor=1.0):
    """Pure-JAX reference, matching the PyTorch module."""
    x_proj = 2.0 * math.pi * jnp.matmul(
        x, (factor * B).T, precision=jax.lax.Precision.HIGHEST
    )
    return jnp.concatenate([jnp.sin(x_proj), jnp.cos(x_proj)], axis=-1)


def _round_down8(t):
    return max(8, (t // 8) * 8)


def _round_up8(t):
    return max(8, ((t + 7) // 8) * 8)


def input_mapping_pallas(
    x,
    B,
    factor=1.0,
    *,
    tile_n=4096,
    min_rows_for_pallas=64,
    out_dtype=None,
):
    """x: [..., D_in] float32, B: [F, D_in] float32 -> [..., 2*F]."""
    *lead, d_in = x.shape
    f, d_in_b = B.shape
    assert d_in == d_in_b, "feature dims must match"
    out_dtype = x.dtype if out_dtype is None else jnp.dtype(out_dtype)

    x2 = x.reshape(-1, d_in)
    n = x2.shape[0]

    # Tiny problems: fixed pallas_call launch overhead dwarfs the work.
    if n < min_rows_for_pallas:
        return (
            input_mapping_ref(x, B, factor=factor)
            .astype(out_dtype)
            .reshape(*lead, 2 * f)
        )

    # Fold 2*pi and `factor` into the small basis once, duplicate it so the
    # kernel produces the full (tile_n, 2F) lane-dense projection in one matmul.
    bt = (2.0 * math.pi * factor) * B.T                     # (D_in, F)
    bt2 = jnp.concatenate([bt, bt], axis=1)                 # (D_in, 2F)
    phase = jnp.concatenate(
        [jnp.zeros((1, f), jnp.float32),
         jnp.full((1, f), 0.5 * math.pi, jnp.float32)],
        axis=1,
    )                                                       # (1, 2F)

    # ---- tile-size selection -------------------------------------------------
    out_itemsize = out_dtype.itemsize

    def tile_bytes(t):
        # double-buffered x tile + double-buffered out tile + resident basis/phase
        return (2 * (t * d_in * 4)
                + 2 * (t * 2 * f * out_itemsize)
                + d_in * 2 * f * 4
                + 2 * f * 4)

    # Generation-aware VMEM budget (v7x: 64 MiB, v5e/v6e: 128 MiB).
    try:
        vmem_cap = int(getattr(pltpu.get_tpu_info(), "vmem_capacity_bytes",
                               64 << 20))
    except Exception:  # pragma: no cover - conservative fallback
        vmem_cap = 64 << 20
    vmem_budget = int(0.45 * vmem_cap)

    tile_n = _round_down8(int(tile_n))
    while tile_n > 8 and tile_bytes(tile_n) > vmem_budget:
        tile_n = _round_down8(tile_n // 2)

    # Keep >= ~8 grid steps so the pipeline double-buffers and the "parallel"
    # axis has work to split across both TensorCores on v7x.
    min_steps = 8
    tile_n = min(tile_n, _round_up8(pl.cdiv(n, min_steps)))
    tile_n = min(tile_n, _round_up8(n))  # never larger than the (padded) array
    grid = (pl.cdiv(n, tile_n),)

    cost = pl.CostEstimate(
        flops=2 * n * d_in * 2 * f,
        transcendentals=2 * n * f,
        bytes_accessed=(4 * n * d_in + 4 * d_in * 2 * f
                        + out_itemsize * n * 2 * f),
    )

    vmem_limit = int(min(max(2.5 * tile_bytes(tile_n), 16 << 20),
                         0.9 * vmem_cap))

    out = pl.pallas_call(
        _fourier_kernel,
        out_shape=jax.ShapeDtypeStruct((n, 2 * f), out_dtype),
        grid=grid,
        in_specs=[
            pl.BlockSpec((tile_n, d_in), lambda i: (i, 0)),
            pl.BlockSpec((d_in, 2 * f), lambda i: (0, 0)),  # basis stays resident
            pl.BlockSpec((1, 2 * f), lambda i: (0, 0)),     # phase stays resident
        ],
        out_specs=pl.BlockSpec((tile_n, 2 * f), lambda i: (i, 0)),
        compiler_params=pltpu.CompilerParams(
            dimension_semantics=("parallel",),  # megacore sharding on v7x
            vmem_limit_bytes=vmem_limit,
        ),
        cost_estimate=cost,
    )(x2, bt2, phase)

    return out.reshape(*lead, 2 * f)


if __name__ == "__main__":
    key = jax.random.PRNGKey(0)
    kx, kb = jax.random.split(key)

    # Small shapes consistent with the module's forward: x [N, D_in], B [F, D_in].
    N, D_IN, F = 1024, 32, 64
    factor = 1.0

    x = jax.random.normal(kx, (N, D_IN), dtype=jnp.float32)
    # Deterministic synthetic Fourier basis (in PyTorch this would be passed in).
    B = 0.1 * jax.random.normal(kb, (F, D_IN), dtype=jnp.float32)

    out = input_mapping_pallas(x, B, factor=factor)
    out = jax.block_until_ready(out)

    ref = input_mapping_ref(x, B, factor=factor)
    assert out.shape == (N, 2 * F)
    assert jnp.allclose(out, ref, atol=1e-3, rtol=1e-3), "mismatch vs reference"

    print("KERNEL_OK")
</pallas_src>

<mosaic_0001>
module attributes {stable_mosaic.version = 11 : i64} {
  func.func @_fourier_kernel(%arg0: i32, %arg1: memref<128x32xf32, #tpu.memory_space<vmem>>, %arg2: memref<32x128xf32, #tpu.memory_space<vmem>>, %arg3: memref<1x128xf32, #tpu.memory_space<vmem>>, %arg4: memref<128x128xf32, #tpu.memory_space<vmem>>) attributes {dimension_semantics = [#tpu.dimension_semantics<parallel>], iteration_bounds = array<i64: 8>, scalar_prefetch = 0 : i64, scratch_operands = 0 : i64, tpu.core_type = #tpu.core_type<tc>, window_params = [{transform_indices = @transform_0, window_bounds = array<i64: 128, 32>}, {pipeline_mode = #tpu.pipeline_mode<synchronous>, transform_indices = @transform_1, window_bounds = array<i64: 32, 128>}, {pipeline_mode = #tpu.pipeline_mode<synchronous>, transform_indices = @transform_2, window_bounds = array<i64: 1, 128>}, {transform_indices = @transform_3, window_bounds = array<i64: 128, 128>}]} {
    %c0 = arith.constant 0 : index
    %c0_0 = arith.constant 0 : index
    %0 = vector.load %arg1[%c0, %c0_0] : memref<128x32xf32, #tpu.memory_space<vmem>>, vector<128x32xf32>
    %c0_1 = arith.constant 0 : index
    %c0_2 = arith.constant 0 : index
    %1 = vector.load %arg2[%c0_1, %c0_2] : memref<32x128xf32, #tpu.memory_space<vmem>>, vector<32x128xf32>
    %cst = arith.constant dense<0.000000e+00> : vector<128x128xf32>
    %2 = tpu.matmul %0, %1, %cst {dimension_numbers = #tpu.dot_dimension_numbers<[1], [0], [0], [1], [0, 0, 1, 1], [], []>, precision = #tpu.contract_precision<fp32>} : vector<128x32xf32>, vector<32x128xf32>, vector<128x128xf32> -> vector<128x128xf32>
    %c0_3 = arith.constant 0 : index
    %c0_4 = arith.constant 0 : index
    %3 = vector.load %arg3[%c0_3, %c0_4] : memref<1x128xf32, #tpu.memory_space<vmem>>, vector<1x128xf32>
    %4 = vector.broadcast %3 : vector<1x128xf32> to vector<128x128xf32>
    %5 = arith.addf %2, %4 : vector<128x128xf32>
    %6 = math.sin %5 : vector<128x128xf32>
    %c0_5 = arith.constant 0 : index
    %c0_6 = arith.constant 0 : index
    %7 = vector.load %arg4[%c0_5, %c0_6] : memref<128x128xf32, #tpu.memory_space<vmem>>, vector<128x128xf32>
    tpu.vector_store %arg4[%c0_5, %c0_6], %6 {strides = array<i32>} : memref<128x128xf32, #tpu.memory_space<vmem>>, vector<128x128xf32>,
    return
  }
  func.func @transform_0(%arg0: i32) -> (i32, i32) {
    %c0_i32 = arith.constant 0 : i32
    %c0_i32_0 = arith.constant 0 : i32
    return %arg0, %c0_i32 : i32, i32
  }
  func.func @transform_1(%arg0: i32) -> (i32, i32) {
    %c0_i32 = arith.constant 0 : i32
    %c0_i32_0 = arith.constant 0 : i32
    %c0_i32_1 = arith.constant 0 : i32
    return %c0_i32, %c0_i32_0 : i32, i32
  }
  func.func @transform_2(%arg0: i32) -> (i32, i32) {
    %c0_i32 = arith.constant 0 : i32
    %c0_i32_0 = arith.constant 0 : i32
    %c0_i32_1 = arith.constant 0 : i32
    return %c0_i32, %c0_i32_0 : i32, i32
  }
  func.func @transform_3(%arg0: i32) -> (i32, i32) {
    %c0_i32 = arith.constant 0 : i32
    %c0_i32_0 = arith.constant 0 : i32
    return %arg0, %c0_i32 : i32, i32
  }
}

</mosaic_0001>

<bundles_post_ra>
// kernel: tpu_custom_call.1
= control target key start
LH: loop header
LB: loop body
LE: loop exit
PB: predicated region body
PF: predicated region fallthrough
CT: control target
= control target key end

     0   :  { %8 = vsyncpa [#allocation3], 0  ;;  %s5816_s0 = inlined_call_operand.vmem [shape: f32[1024,32], index: 0, kind: input, shape index: {}]   ;;  %s5817_s1 = inlined_call_operand.vmem [shape: f32[32,128], index: 1, kind: input, shape index: {}]   ;;  %s5818_s2 = inlined_call_operand.vmem [shape: f32[1,128], index: 2, kind: input, shape index: {}]   ;;  %s5819_s3 = inlined_call_operand.hbm [shape: f32[1024,128], index: 3, kind: output, shape index: {}]  }
   0x1   :  { %10 = vsyncpa [#allocation3 + $0x1], 0  ;;  %s3680_s12 = smov 0   ;;  %s3682_s13 = smov 0  }
   0x2   :  { %s3684_s14 = smov 0   ;;  %s3686_s15 = smov 0  }
   0x3 LB: > { %s3701_s16 = sadd.s32 4294967295, %s3649_s15   ;;  %s3469_s17 = sadd.s32 4294967294, %s3649_s15   ;;  %s3649_s15 = sphi %s3686_s15, %s5845_s15   ;;  %s3645_s14 = sphi %s3684_s14, %s5844_s14   ;;  %s3641_s13 = sphi %s3682_s13, %s5843_s13   ;;  %s3637_s12 = sphi %s3680_s12, %s5842_s12  }
   0x4   : > { %s3705_s18 = sadd.s32 1, %s3649_s15   ;;  %s91_s19 = sadd.s32 1, %s3645_s14 }
   0x5   : > { %s88_s20 = ssub.s32 %s3649_s15, %s3705_s18  ;;  %p101_p0 = scmp.ne.s32.totalorder %s3645_s14, %s3641_s13 }
   0x6   : > { %p89_p1 = scmp.eq.s32.totalorder %s88_s20, 0  ;;  %p102_p2 = scmp.eq.s32.totalorder %s3701_s16, 7 }
   0x7   : > { %p107_p3 = scmp.ne.s32.totalorder %s3641_s13, %s3637_s12  ;;  %p108_p4 = scmp.eq.s32.totalorder %s3469_s17, 7 }
   0x8   : > { %s3716_s21 = scalar_select %p89_p1, %s3645_s14, %s91_s19  }
   0x9   : > { %p3718_p5 = por %p102_p2, %p101_p0  ;;  %p3722_p6 = por %p108_p4, %p107_p3 }
   0xa   : > { %p3472_p7 = scmp.ge.s32.totalorder %s3649_s15, 1  ;;  %p141_p8 = scmp.lt.s32.totalorder %s3649_s15, 9 }
   0xc   : > { %p142_p9 = pnand %p3472_p7, %p141_p8 }
   0xd   : > { %s3474_s30 = sshll.u32 (!%p142_p9), %s3701_s16, 4  ;;  %s162_s17 = sand.u32 (!%p142_p9), 1, %s3641_s13  }
   0xe   : > { %145 = sbr.rel (%p142_p9) target bundleno = 898 (0x382), region = 32  ;;  %p166_p10 = scmp.lt.s32.totalorder (!%p142_p9), %s3474_s30, 127 }
   0xf   : > { %s3473_s19 = sshll.u32 (!%p142_p9), %s162_s17, 7  ;;  %s3529_s24 = sshll.u32 (!%p142_p9), %s3701_s16, 7 }
  0x10   : > { %s4352_s20 = scalar_lea.vmem (!%p142_p9), [#allocation2], %s3473_s19  ;;  %s3403_s27 = scalar_lea.hbm (!%p142_p9), %s5819_s3, %s3529_s24 }
  0x11   : > { %s3404_s28 = sshll.u32 (!%p142_p9), %s4352_s20, 4  ;;  %s3406_s29 = sshll.u32 (!%p142_p9), %s3403_s27, 4  ;;  %s3405_s28 = int_to_ptr.vmem [resolvable:$true] %s3404_s28  ;;  %s3407_s29 = int_to_ptr.hbm [resolvable:$true] %s3406_s29 }
  0x12   : > { %s3392_s16 = scalar_lea.sflag (!%p142_p9), [#allocation3], %s162_s17  ;;  %s3607_s7 = scalar_lea.hbm (!%p142_p9), %s5819_s3, 1024 }
  0x13   : > { %v191_v0 = vld [vmem:[%s5817_s1 + $0x18] sm:$0xff]  ;;  %v190_v1 = vld [vmem:[%s5817_s1 + $0x10] sm:$0xff]  ;;  %v189_v2 = vld [vmem:[%s5817_s1 + $0x8] sm:$0xff]  ;;  %s5847_s30 = smov (!%p166_p10, %s3474_s30), 127  ;;  %vm196_vm0 = vcmask 261120  }
  0x14   : > { %v3738_v3 = vand.u32 4294901760, %v191_v0  ;;  %v3740_v4 = vand.u32 4294901760, %v190_v1  ;;  %v3742_v5 = vand.u32 4294901760, %v189_v2  ;;  %v188_v6 = vld [vmem:[%s5817_s1] sm:$0xff]  ;;  %s3475_s6 = sshll.u32 %s5847_s30, 3  ;;  %s3601_s30 = sshra.s32 %s3407_s29, 4  ;;  %s3602_s30 = int_to_ptr.hbm [resolvable:$true] %s3601_s30 }
  0x15   : > { %v3747_v7 = vand.u32 4294901760, %v188_v6  ;;  %s3762_s9 = scalar_lea.vmem %s5816_s0, %s3475_s6  ;;  %s3603_s4 = scalar_lea.hbm %s3602_s30, 128 }
  0x16   : > { %3530 = vmatpush.msra.mxu2 %v3738_v3  ;;  %v407_v8 = vsub.f32 %v191_v0, %v3738_v3  ;;  %v413_v9 = vsub.f32 %v190_v1, %v3740_v4  ;;  %v419_v10 = vsub.f32 %v189_v2, %v3742_v5  ;;  %258 = vmatpush.msra.mxu0 %v3738_v3  ;;  %v180_v19 = vld [vmem:[%s3762_s9 + $0x40] sm:$0xff]  ;;  %v181_v20 = vld [vmem:[%s3762_s9 + $0x48] sm:$0xff]  ;;  %v182_v30 = vld [vmem:[%s3762_s9 + $0x50] sm:$0xff]  ;;  %p3604_p11 = scmp.ne.s32.totalorder %s3602_s30, %s3603_s4  ;;  %p3608_p0 = scmp.lt.s32.totalorder %s3602_s30, %s5819_s3 }
  0x17   : > { %v3755_v11 = vsub.f32 %v188_v6, %v3747_v7  ;;  %v172_v21 = vld [vmem:[%s3762_s9] sm:$0xff]  ;;  %v222_v22 = vsel %vm196_vm0, %v180_v19, 0  ;;  %v225_v23 = vsel %vm196_vm0, %v181_v20, 0  ;;  %v173_v25 = vld [vmem:[%s3762_s9 + $0x8] sm:$0xff]  ;;  %v174_v33 = vld [vmem:[%s3762_s9 + $0x10] sm:$0xff]  ;;  %v228_v39 = vsel %vm196_vm0, %v182_v30, 0  ;;  %p3609_p1 = scmp.lt.s32.totalorder %s3607_s7, %s3603_s4 }
  0x18   : > { %3531 = vmatpush.msra.mxu2 %v3740_v4  ;;  %v408_v12 = vand.u32 4294901760, %v407_v8  ;;  %v414_v13 = vand.u32 4294901760, %v413_v9  ;;  %v420_v14 = vand.u32 4294901760, %v419_v10  ;;  %260 = vmatpush.msra.mxu0 %v3740_v4  ;;  %v198_v24 = vsel %vm196_vm0, %v172_v21, 0  ;;  %v183_v53 = vld [vmem:[%s3762_s9 + $0x58] sm:$0xff]  ;;  %v184_v6 = vld [vmem:[%s3762_s9 + $0x60] sm:$0xff]  ;;  %p3605_p12 = pnand %p3604_p11, %p3718_p5 }
  0x19   : > { %v426_v15 = vand.u32 4294901760, %v3755_v11  ;;  %v3775_v28 = vand.u32 4294901760, %v222_v22  ;;  %v3780_v31 = vand.u32 4294901760, %v225_v23  ;;  %v3782_v32 = vand.u32 4294901760, %v198_v24  ;;  %v175_v55 = vld [vmem:[%s3762_s9 + $0x18] sm:$0xff]  ;;  %v177_v19 = vld [vmem:[%s3762_s9 + $0x28] sm:$0xff]  ;;  %p3610_p2 = por %p3609_p1, %p3608_p0 }
  0x1a   : > { %v409_v16 = vsub.f32 %v407_v8, %v408_v12  ;;  %3532 = vmatpush.msra.mxu2 %v3742_v5  ;;  %v415_v17 = vsub.f32 %v413_v9, %v414_v13  ;;  %v421_v18 = vsub.f32 %v419_v10, %v420_v14  ;;  %262 = vmatpush.msra.mxu0 %v3742_v5  ;;  %v201_v36 = vsel %vm196_vm0, %v173_v25, 0  ;;  %p3606_p13 = pneg %p3605_p12 }
  0x1b   : > { %v427_v29 = vsub.f32 %v3755_v11, %v426_v15  ;;  %v3786_v35 = vsub.f32 %v222_v22, %v3775_v28  ;;  %v3790_v37 = vsub.f32 %v225_v23, %v3780_v31  ;;  %v3793_v38 = vsub.f32 %v198_v24, %v3782_v32 }
  0x1c   : > { %v410_v26 = vand.u32 4294901760, %v409_v16  ;;  %v416_v27 = vand.u32 4294901760, %v415_v17  ;;  %3533 = vmatpush.msra.mxu2 %v3747_v7  ;;  %264 = vmatpush.msra.mxu0 %v3747_v7  ;;  %v422_v34 = vand.u32 4294901760, %v421_v18  ;;  %v3796_v40 = vand.u32 4294901760, %v201_v36  ;;  %v185_v18 = vld [vmem:[%s3762_s9 + $0x68] sm:$0xff]  ;;  %p3611_p3 = pnand %p3610_p2, %p3606_p13 }
  0x1d   : > { %v331_v41 = vand.u32 4294901760, %v3786_v35  ;;  %v428_v42 = vand.u32 4294901760, %v427_v29  ;;  %v204_v43 = vsel %vm196_vm0, %v174_v33, 0  ;;  %v267_v44 = vand.u32 4294901760, %v3793_v38 }
  0x1e   : > { %509 = vmatpush.msrb.mxu2 %v407_v8  ;;  %732 = vmatpush.msrb.mxu0 %v408_v12  ;;  %v3802_v45 = vsub.f32 %v201_v36, %v3796_v40  ;;  %v339_v47 = vand.u32 4294901760, %v3790_v37  ;;  %v3808_v48 = vand.u32 4294901760, %v228_v39  ;;  %v3814_v51 = vand.u32 4294901760, %v204_v43  ;;  %v186_v36 = vld [vmem:[%s3762_s9 + $0x70] sm:$0xff] }
  0x1f   : > { %3534 = vmatpush.msra.mxu3 %v410_v26  ;;  %411 = vmatpush.msra.mxu1 %v410_v26  ;;  %v332_v46 = vsub.f32 %v3786_v35, %v331_v41  ;;  %v268_v49 = vsub.f32 %v3793_v38, %v267_v44  ;;  %v231_v59 = vsel %vm196_vm0, %v183_v53, 0  ;;  %v207_v61 = vsel %vm196_vm0, %v175_v55, 0 }
  0x20   : > { %512 = vmatpush.msrb.mxu2 %v413_v9  ;;  %736 = vmatpush.msrb.mxu0 %v414_v13  ;;  %v275_v50 = vand.u32 4294901760, %v3802_v45  ;;  %v340_v56 = vsub.f32 %v3790_v37, %v339_v47  ;;  %v3826_v57 = vsub.f32 %v228_v39, %v3808_v48  ;;  %v3834_v60 = vsub.f32 %v204_v43, %v3814_v51  ;;  %v178_v39 = vld [vmem:[%s3762_s9 + $0x30] sm:$0xff] }
  0x21   : > { %3535 = vmatpush.msra.mxu3 %v416_v27  ;;  %417 = vmatpush.msra.mxu1 %v416_v27  ;;  %v333_v52 = vand.u32 4294901760, %v332_v46  ;;  %v269_v54 = vand.u32 4294901760, %v268_v49  ;;  %v3840_v0 = vand.u32 4294901760, %v231_v59  ;;  %v237_v23 = vsel %vm196_vm0, %v185_v18, 0 }
  0x22   : > { %515 = vmatpush.msrb.mxu2 %v419_v10  ;;  %740 = vmatpush.msrb.mxu0 %v420_v14  ;;  %v276_v58 = vsub.f32 %v3802_v45, %v275_v50  ;;  %v341_v62 = vand.u32 4294901760, %v340_v56  ;;  %v347_v63 = vand.u32 4294901760, %v3826_v57  ;;  %v283_v2 = vand.u32 4294901760, %v3834_v60 }
  0x23   : > { %3536 = vmatpush.msra.mxu3 %v422_v34  ;;  %423 = vmatpush.msra.mxu1 %v422_v34  ;;  %v3856_v9 = vsub.f32 %v231_v59, %v3840_v0  ;;  %v234_v10 = vsel %vm196_vm0, %v184_v6, 0  ;;  %v213_v25 = vsel %vm196_vm0, %v177_v19, 0  ;;  %v3892_v29 = vand.u32 4294901760, %v237_v23 }
  0x24   : > { %518 = vmatpush.msrb.mxu2 %v3755_v11  ;;  %744 = vmatpush.msrb.mxu0 %v426_v15  ;;  %v277_v1 = vand.u32 4294901760, %v276_v58  ;;  %v348_v8 = vsub.f32 %v3826_v57, %v347_v63  ;;  %v3868_v15 = vand.u32 4294901760, %v234_v10  ;;  %v3895_v34 = vand.u32 4294901760, %v213_v25 }
  0x25   : > { %3537 = vmatpush.msra.mxu3 %v428_v42  ;;  %429 = vmatpush.msra.mxu1 %v428_v42  ;;  %v355_v14 = vand.u32 4294901760, %v3856_v9  ;;  %v3905_v43 = vsub.f32 %v237_v23, %v3892_v29  ;;  %v240_v49 = vsel %vm196_vm0, %v186_v36, 0  ;;  %v216_v53 = vsel %vm196_vm0, %v178_v39, 0 }
  0x26   : > { %463 = vmatmul.f32.vlgmr.msra.gmra.mxu3 %v3775_v28  ;;  %431 = vmatmul.f32.vlgmr.msra.gmra.mxu1 %v3782_v32  ;;  %v349_v13 = vand.u32 4294901760, %v348_v8  ;;  %v3881_v21 = vsub.f32 %v234_v10, %v3868_v15  ;;  %v3916_v56 = vand.u32 4294901760, %v240_v49 }
  0x27   : > { %334 = vmatmul.f32.vlgmr.msra.gmra.mxu2 %v333_v52  ;;  %613 = vmatpush.msrb.mxu3 %v3738_v3  ;;  %v356_v20 = vsub.f32 %v3856_v9, %v355_v14  ;;  %v3912_v52 = vsub.f32 %v213_v25, %v3895_v34  ;;  %v371_v55 = vand.u32 4294901760, %v3905_v43 }
  0x28   : > { %270 = vmatmul.f32.vlgmr.msra.gmra.mxu0 %v269_v54  ;;  %823 = vmatpush.msrb.mxu1 %v3738_v3  ;;  %v3844_v3 = vand.u32 4294901760, %v207_v61  ;;  %v363_v27 = vand.u32 4294901760, %v3881_v21 }
  0x29   : > { %615 = vmatpush.msrb.mxu3 %v3740_v4  ;;  %v357_v26 = vand.u32 4294901760, %v356_v20  ;;  %v307_v59 = vand.u32 4294901760, %v3912_v52  ;;  %v372_v6 = vsub.f32 %v3905_v43, %v371_v55 }
  0x2a   : > { %825 = vmatpush.msrb.mxu1 %v3740_v4  ;;  %v176_v4 = vld [vmem:[%s3762_s9 + $0x20] sm:$0xff]  ;;  %v3864_v11 = vsub.f32 %v207_v61, %v3844_v3  ;;  %v364_v42 = vsub.f32 %v3881_v21, %v363_v27  ;;  %v3919_v61 = vand.u32 4294901760, %v216_v53 }
  0x2b   : > { %617 = vmatpush.msrb.mxu3 %v3742_v5  ;;  %v210_v12 = vsel %vm196_vm0, %v176_v4, 0  ;;  %v3929_v4 = vsub.f32 %v240_v49, %v3916_v56  ;;  %v308_v8 = vsub.f32 %v3912_v52, %v307_v59 }
  0x2c   : > { %827 = vmatpush.msrb.mxu1 %v3742_v5  ;;  %v284_v5 = vsub.f32 %v3834_v60, %v283_v2  ;;  %v3871_v17 = vand.u32 4294901760, %v210_v12  ;;  %v365_v54 = vand.u32 4294901760, %v364_v42  ;;  %v314_v10 = vsub.f32 %v216_v53, %v3919_v61 }
  0x2d   : > { %619 = vmatpush.msrb.mxu3 %v3747_v7  ;;  %v309_v19 = vand.u32 4294901760, %v308_v8 }
  0x2e   : > { %467 = vmatmul.f32.gmra.mxu3 %v3780_v31  ;;  %435 = vmatmul.f32.gmra.mxu1 %v3796_v40  ;;  %v285_v16 = vand.u32 4294901760, %v284_v5  ;;  %v3888_v24 = vsub.f32 %v210_v12, %v3871_v17  ;;  %v315_v20 = vand.u32 4294901760, %v314_v10 }
  0x2f   : > { %342 = vmatmul.f32.gmra.mxu2 %v341_v62  ;;  %829 = vmatpush.msrb.mxu1 %v3747_v7  ;;  %v291_v7 = vand.u32 4294901760, %v3864_v11  ;;  %v187_v62 = vld [vmem:[%s3762_s9 + $0x78] sm:$0xff] }
  0x30   : > { %278 = vmatmul.f32.gmra.mxu0 %v277_v1  ;;  %v299_v33 = vand.u32 4294901760, %v3888_v24  ;;  %v179_v1 = vld [vmem:[%s3762_s9 + $0x38] sm:$0xff]  ;;  %v243_v5 = vsel %vm196_vm0, %v187_v62, 0 }
  0x31   : > { %v292_v22 = vsub.f32 %v3864_v11, %v291_v7  ;;  %v219_v12 = vsel %vm196_vm0, %v179_v1, 0  ;;  %v3938_v18 = vand.u32 4294901760, %v243_v5 }
  0x32   : > { %v300_v46 = vsub.f32 %v3888_v24, %v299_v33 }
  0x33   : > { %v293_v30 = vand.u32 4294901760, %v292_v22  ;;  %v321_v22 = vand.u32 4294901760, %v219_v12  ;;  %v3946_v25 = vsub.f32 %v243_v5, %v3938_v18 }
  0x34   : > { %v301_v58 = vand.u32 4294901760, %v300_v46 }
  0x35   : > { %v387_v39 = vand.u32 4294901760, %v3946_v25 }
  0x36   : > { %471 = vmatmul.f32.gmra.mxu3 %v3808_v48  ;;  %439 = vmatmul.f32.gmra.mxu1 %v3814_v51 }
  0x37   : > { %350 = vmatmul.f32.gmra.mxu2 %v349_v13  ;;  %v373_v13 = vand.u32 4294901760, %v372_v6  ;;  %v388_v49 = vsub.f32 %v3946_v25, %v387_v39 }
  0x38   : > { %286 = vmatmul.f32.gmra.mxu0 %v285_v16  ;;  %v379_v16 = vand.u32 4294901760, %v3929_v4 }
  0x3a   : > { %v380_v23 = vsub.f32 %v3929_v4, %v379_v16 }
  0x3c   : > { %v381_v36 = vand.u32 4294901760, %v380_v23 }
  0x3e   : > { %475 = vmatmul.f32.gmra.mxu3 %v3840_v0  ;;  %443 = vmatmul.f32.gmra.mxu1 %v3844_v3 }
  0x3f   : > { %358 = vmatmul.f32.gmra.mxu2 %v357_v26  ;;  %v316_v26 = vsub.f32 %v314_v10, %v315_v20 }
  0x40   : > { %294 = vmatmul.f32.gmra.mxu0 %v293_v30  ;;  %v322_v30 = vsub.f32 %v219_v12, %v321_v22 }
  0x41   : > { %v317_v42 = vand.u32 4294901760, %v316_v26 }
  0x42   : > { %v323_v46 = vand.u32 4294901760, %v322_v30 }
  0x44   : > { %v324_v53 = vsub.f32 %v322_v30, %v323_v46 }
  0x46   : > { %479 = vmatmul.f32.gmra.mxu3 %v3868_v15  ;;  %447 = vmatmul.f32.gmra.mxu1 %v3871_v17 }
  0x47   : > { %366 = vmatmul.f32.gmra.mxu2 %v365_v54  ;;  %v389_v54 = vand.u32 4294901760, %v388_v49 }
  0x48   : > { %302 = vmatmul.f32.gmra.mxu0 %v301_v58  ;;  %v325_v58 = vand.u32 4294901760, %v324_v53 }
  0x4e   : > { %483 = vmatmul.f32.gmra.mxu3 %v3892_v29  ;;  %451 = vmatmul.f32.gmra.mxu1 %v3895_v34 }
  0x4f   : > { %374 = vmatmul.f32.gmra.mxu2 %v373_v13 }
  0x50   : > { %310 = vmatmul.f32.gmra.mxu0 %v309_v19 }
  0x56   : > { %487 = vmatmul.f32.gmra.mxu3 %v3916_v56  ;;  %455 = vmatmul.f32.gmra.mxu1 %v3919_v61 }
  0x57   : > { %382 = vmatmul.f32.gmra.mxu2 %v381_v36 }
  0x58   : > { %318 = vmatmul.f32.gmra.mxu0 %v317_v42 }
  0x5e   : > { %491 = vmatmul.f32.gmra.mxu3 %v3938_v18  ;;  %459 = vmatmul.f32.gmra.mxu1 %v321_v22 }
  0x5f   : > { %390 = vmatmul.f32.gmra.mxu2 %v389_v54 }
  0x60   : > { %326 = vmatmul.f32.gmra.mxu0 %v325_v58 }
  0x66   : > { %623 = vmatmul.f32.vlgmr.msrb.gmra.mxu3 %v267_v44  ;;  %831 = vmatmul.f32.vlgmr.msrb.gmra.mxu1 %v3782_v32 }
  0x67   : > { %521 = vmatmul.f32.vlgmr.msrb.gmra.mxu2 %v3793_v38 }
  0x68   : > { %746 = vmatmul.f32.vlgmr.msrb.gmra.mxu0 %v3782_v32 }
  0x6e   : > { %629 = vmatmul.f32.gmra.mxu3 %v275_v50  ;;  %835 = vmatmul.f32.gmra.mxu1 %v3796_v40 }
  0x6f   : > { %526 = vmatmul.f32.gmra.mxu2 %v3802_v45 }
  0x70   : > { %750 = vmatmul.f32.gmra.mxu0 %v3796_v40  ;;  %v3998_v40 = vld [vmem:[%s5818_s2] ss:$0 sm:$0xff] }
  0x76   : > { %635 = vmatmul.f32.gmra.mxu3 %v283_v2  ;;  %839 = vmatmul.f32.gmra.mxu1 %v3814_v51 }
  0x77   : > { %531 = vmatmul.f32.gmra.mxu2 %v3834_v60 }
  0x78   : > { %754 = vmatmul.f32.gmra.mxu0 %v3814_v51 }
  0x7e   : > { %641 = vmatmul.f32.gmra.mxu3 %v291_v7  ;;  %843 = vmatmul.f32.gmra.mxu1 %v3844_v3 }
  0x7f   : > { %536 = vmatmul.f32.gmra.mxu2 %v3864_v11 }
  0x80   : > { %758 = vmatmul.f32.gmra.mxu0 %v3844_v3 }
  0x86   : > { %647 = vmatmul.f32.gmra.mxu3 %v299_v33  ;;  %847 = vmatmul.f32.gmra.mxu1 %v3871_v17 }
  0x87   : > { %541 = vmatmul.f32.gmra.mxu2 %v3888_v24 }
  0x88   : > { %762 = vmatmul.f32.gmra.mxu0 %v3871_v17 }
  0x8e   : > { %653 = vmatmul.f32.gmra.mxu3 %v307_v59  ;;  %851 = vmatmul.f32.gmra.mxu1 %v3895_v34 }
  0x8f   : > { %546 = vmatmul.f32.gmra.mxu2 %v3912_v52 }
  0x90   : > { %766 = vmatmul.f32.gmra.mxu0 %v3895_v34 }
  0x96   : > { %659 = vmatmul.f32.gmra.mxu3 %v315_v20  ;;  %855 = vmatmul.f32.gmra.mxu1 %v3919_v61 }
  0x97   : > { %551 = vmatmul.f32.gmra.mxu2 %v314_v10 }
  0x98   : > { %770 = vmatmul.f32.gmra.mxu0 %v3919_v61 }
  0x9e   : > { %665 = vmatmul.f32.gmra.mxu3 %v323_v46  ;;  %859 = vmatmul.f32.gmra.mxu1 %v321_v22 }
  0x9f   : > { %556 = vmatmul.f32.gmra.mxu2 %v322_v30 }
  0xa0   : > { %774 = vmatmul.f32.gmra.mxu0 %v321_v22 }
  0xa3   : > { %v3987_v32 = vpop.f32.mrf.mxu1 }
  0xa5   : > { %v3989_v38 = vpop.f32.mrf.mxu0 }
  0xa6   : > { %671 = vmatmul.f32.gmra.mxu3 %v331_v41  ;;  %863 = vmatmul.f32.gmra.mxu1 %v3775_v28 }
  0xa7   : > { %561 = vmatmul.f32.gmra.mxu2 %v3786_v35 }
  0xa8   : > { %778 = vmatmul.f32.gmra.mxu0 %v3775_v28 }
  0xa9   : > { %v464_v44 = vpop.f32.mrf.mxu3 }
  0xaa   : > { %v335_v45 = vpop.f32.mrf.mxu2 }
  0xab   : > { %v336_v50 = vadd.f32 %v3998_v40, %v335_v45  ;;  %v436_v51 = vpop.f32.mrf.mxu1  ;;  %v272_v45 = vadd.f32 %v3998_v40, %v3989_v38 }
  0xad   : > { %v4002_v60 = vadd.f32 %v464_v44, %v336_v50  ;;  %v279_v2 = vpop.f32.mrf.mxu0 }
  0xae   : > { %677 = vmatmul.f32.gmra.mxu3 %v339_v47  ;;  %v280_v35 = vadd.f32 %v3998_v40, %v279_v2  ;;  %867 = vmatmul.f32.gmra.mxu1 %v3780_v31 }
  0xaf   : > { %566 = vmatmul.f32.gmra.mxu2 %v3790_v37 }
  0xb0   : > { %v4009_v41 = vadd.f32 %v436_v51, %v280_v35  ;;  %782 = vmatmul.f32.gmra.mxu0 %v3780_v31 }
  0xb1   : > { %v468_v28 = vpop.f32.mrf.mxu3 }
  0xb2   : > { %v343_v3 = vpop.f32.mrf.mxu2 }
  0xb3   : > { %v344_v11 = vadd.f32 %v3998_v40, %v343_v3  ;;  %v440_v7 = vpop.f32.mrf.mxu1 }
  0xb5   : > { %v4013_v17 = vadd.f32 %v468_v28, %v344_v11  ;;  %v287_v24 = vpop.f32.mrf.mxu0 }
  0xb6   : > { %683 = vmatmul.f32.gmra.mxu3 %v347_v63  ;;  %v288_v47 = vadd.f32 %v3998_v40, %v287_v24  ;;  %871 = vmatmul.f32.gmra.mxu1 %v3808_v48 }
  0xb7   : > { %571 = vmatmul.f32.gmra.mxu2 %v3826_v57 }
  0xb8   : > { %v4020_v37 = vadd.f32 %v440_v7, %v288_v47  ;;  %786 = vmatmul.f32.gmra.mxu0 %v3808_v48 }
  0xb9   : > { %v472_v31 = vpop.f32.mrf.mxu3 }
  0xba   : > { %v351_v33 = vpop.f32.mrf.mxu2 }
  0xbb   : > { %v352_v34 = vadd.f32 %v3998_v40, %v351_v33  ;;  %v444_v52 = vpop.f32.mrf.mxu1 }
  0xbd   : > { %v4024_v59 = vadd.f32 %v472_v31, %v352_v34  ;;  %v295_v61 = vpop.f32.mrf.mxu0 }
  0xbe   : > { %689 = vmatmul.f32.gmra.mxu3 %v355_v14  ;;  %v296_v63 = vadd.f32 %v3998_v40, %v295_v61  ;;  %875 = vmatmul.f32.gmra.mxu1 %v3840_v0 }
  0xbf   : > { %576 = vmatmul.f32.gmra.mxu2 %v3856_v9 }
  0xc0   : > { %v4031_v57 = vadd.f32 %v444_v52, %v296_v63  ;;  %790 = vmatmul.f32.gmra.mxu0 %v3840_v0 }
  0xc1   : > { %v476_v48 = vpop.f32.mrf.mxu3 }
  0xc2   : > { %v359_v62 = vpop.f32.mrf.mxu2 }
  0xc3   : > { %v360_v1 = vadd.f32 %v3998_v40, %v359_v62  ;;  %v448_v6 = vpop.f32.mrf.mxu1 }
  0xc5   : > { %v4035_v8 = vadd.f32 %v476_v48, %v360_v1  ;;  %v303_v5 = vpop.f32.mrf.mxu0 }
  0xc6   : > { %695 = vmatmul.f32.gmra.mxu3 %v363_v27  ;;  %v304_v14 = vadd.f32 %v3998_v40, %v303_v5  ;;  %879 = vmatmul.f32.gmra.mxu1 %v3868_v15 }
  0xc7   : > { %581 = vmatmul.f32.gmra.mxu2 %v3881_v21 }
  0xc8   : > { %v4042_v9 = vadd.f32 %v448_v6, %v304_v14  ;;  %794 = vmatmul.f32.gmra.mxu0 %v3868_v15 }
  0xc9   : > { %v480_v0 = vpop.f32.mrf.mxu3 }
  0xca   : > { %v367_v10 = vpop.f32.mrf.mxu2 }
  0xcb   : > { %v368_v12 = vadd.f32 %v3998_v40, %v367_v10  ;;  %v452_v13 = vpop.f32.mrf.mxu1 }
  0xcd   : > { %v4046_v19 = vadd.f32 %v480_v0, %v368_v12  ;;  %v311_v20 = vpop.f32.mrf.mxu0 }
  0xce   : > { %701 = vmatmul.f32.gmra.mxu3 %v371_v55  ;;  %v312_v27 = vadd.f32 %v3998_v40, %v311_v20  ;;  %883 = vmatmul.f32.gmra.mxu1 %v3892_v29 }
  0xcf   : > { %586 = vmatmul.f32.gmra.mxu2 %v3905_v43 }
  0xd0   : > { %v4053_v21 = vadd.f32 %v452_v13, %v312_v27  ;;  %798 = vmatmul.f32.gmra.mxu0 %v3892_v29 }
  0xd1   : > { %v484_v15 = vpop.f32.mrf.mxu3 }
  0xd2   : > { %v375_v22 = vpop.f32.mrf.mxu2 }
  0xd3   : > { %v376_v23 = vadd.f32 %v3998_v40, %v375_v22  ;;  %v456_v26 = vpop.f32.mrf.mxu1 }
  0xd5   : > { %v4057_v30 = vadd.f32 %v484_v15, %v376_v23  ;;  %v319_v36 = vpop.f32.mrf.mxu0  ;;  %v3651_v23 = vmov 683565275  }
  0xd6   : > { %707 = vmatmul.f32.gmra.mxu3 %v379_v16  ;;  %v320_v55 = vadd.f32 %v3998_v40, %v319_v36  ;;  %887 = vmatmul.f32.gmra.mxu1 %v3916_v56  ;;  %v3652_v36 = vmov 2475754826  }
  0xd7   : > { %591 = vmatmul.f32.gmra.mxu2 %v3929_v4 }
  0xd8   : > { %v4064_v43 = vadd.f32 %v456_v26, %v320_v55  ;;  %802 = vmatmul.f32.gmra.mxu0 %v3916_v56 }
  0xd9   : > { %v488_v29 = vpop.f32.mrf.mxu3 }
  0xda   : > { %v383_v42 = vpop.f32.mrf.mxu2 }
  0xdb   : > { %v384_v46 = vadd.f32 %v3998_v40, %v383_v42  ;;  %v460_v54 = vpop.f32.mrf.mxu1 }
  0xdd   : > { %v4068_v49 = vadd.f32 %v488_v29, %v384_v46  ;;  %v327_v53 = vpop.f32.mrf.mxu0  ;;  %v3653_v46 = vmov 2131351028  }
  0xde   : > { %713 = vmatmul.f32.gmra.mxu3 %v387_v39  ;;  %v328_v16 = vadd.f32 %v3998_v40, %v327_v53  ;;  %891 = vmatmul.f32.gmra.mxu1 %v3938_v18  ;;  %v433_v39 = vadd.f32 %v3987_v32, %v272_v45 }
  0xdf   : > { %596 = vmatmul.f32.gmra.mxu2 %v3946_v25 }
  0xe0   : > { %v4075_v4 = vadd.f32 %v460_v54, %v328_v16  ;;  %806 = vmatmul.f32.gmra.mxu0 %v3938_v18  ;;  %v3654_v16 = vmov 2102212464  }
  0xe1   : > { %v492_v56 = vpop.f32.mrf.mxu3 }
  0xe2   : > { %v391_v58 = vpop.f32.mrf.mxu2 }
  0xe3   : > { %v392_v44 = vadd.f32 %v3998_v40, %v391_v58  ;;  %v832_v3 = vpop.f32.mrf.mxu1  ;;  %v3655_v58 = vmov 920167782  }
  0xe5   : > { %v4081_v50 = vadd.f32 %v492_v56, %v392_v44  ;;  %v747_v28 = vpop.f32.mrf.mxu0 }
  0xe9   : > { %v624_v51 = vpop.f32.mrf.mxu3 }
  0xea   : > { %v522_v2 = vpop.f32.mrf.mxu2 }
  0xeb   : > { %v523_v35 = vadd.f32 %v522_v2, %v433_v39  ;;  %v836_v63 = vpop.f32.mrf.mxu1  ;;  %v3656_v39 = vmov 1326507024  }
  0xed   : > { %v625_v25 = vadd.f32 %v624_v51, %v523_v35  ;;  %v751_v33 = vpop.f32.mrf.mxu0 }
  0xef   : > { %v748_v11 = vadd.f32 %v747_v28, %v625_v25 }
  0xf1   : > { %v4084_v7 = vadd.f32 %v832_v3, %v748_v11  ;;  %v630_v31 = vpop.f32.mrf.mxu3 }
  0xf2   : > { %v527_v18 = vpop.f32.mrf.mxu2 }
  0xf3   : > { %v895_v24 = vand.u32 2147483647, %v4084_v7  ;;  %v898_v47 = vand.u32 2139095040, %v4084_v7  ;;  %v528_v38 = vadd.f32 %v527_v18, %v4009_v41 }
  0xf5   : > { %v899_v40 = vshrl.u32 %v898_v47, 23  ;;  %v902_v32 = vand.u32 8388607, %v895_v24  ;;  %v631_v34 = vadd.f32 %v630_v31, %v528_v38 }
  0xf7   : > { %v3476_v52 = vadd.s32 4294967169, %v899_v40  ;;  %v903_v61 = vor.u32 8388608, %v902_v32  ;;  %v752_v48 = vadd.f32 %v751_v33, %v631_v34 }
  0xf9   : > { %v905_v62 = vadd.s32 1, %v3476_v52  ;;  %v4091_v1 = vshll.u32 %v903_v61, 8  ;;  %v4093_v6 = vadd.f32 %v836_v63, %v752_v48  ;;  %v636_v63 = vpop.f32.mrf.mxu3 }
  0xfa   : > { %v532_v0 = vpop.f32.mrf.mxu2 }
  0xfb   : > { %vm906_vm1 = vcmp.gt.s32.totalorder %v905_v62, 0  ;;  %v1050_v14 = vand.u32 2147483647, %v4093_v6  ;;  %v1053_v41 = vand.u32 2139095040, %v4093_v6  ;;  %v4098_v12 = vand.u32 65535, %v4091_v1 }
  0xfc   : > { %v907_v5 = vsel %vm906_vm1, %v905_v62, 0  ;;  %v4101_v20 = vshrl.u32 %v4091_v1, 16  ;;  %v533_v15 = vadd.f32 %v532_v0, %v4020_v37 }
  0xfd   : > { %v909_v10 = vand.u32 31, %v907_v5  ;;  %v1054_v27 = vshrl.u32 %v1053_v41, 23  ;;  %v908_v22 = vshrl.u32 %v907_v5, 5  ;;  %v4108_v29 = vand.u32 8388607, %v1050_v14 }
  0xff   : > { %v910_v13 = vsub.s32 32, %v909_v10  ;;  %v912_v26 = vshll.u32 %v3651_v23, %v909_v10  ;;  %v915_v55 = vshll.u32 %v3652_v36, %v909_v10  ;;  %v918_v54 = vshll.u32 %v3653_v46, %v909_v10 }
 0x100   : > { %v921_v56 = vshll.u32 %v3654_v16, %v909_v10  ;;  %v924_v45 = vshll.u32 %v3655_v58, %v909_v10  ;;  %v3479_v25 = vadd.s32 4294967169, %v1054_v27  ;;  %vm927_vm2 = vcmp.lt.s32.totalorder %v908_v22, 1 }
 0x101   : > { %v913_v42 = vshrl.u32 %v3652_v36, %v910_v13  ;;  %v916_v53 = vshrl.u32 %v3653_v46, %v910_v13  ;;  %v919_v37 = vshrl.u32 %v3654_v16, %v910_v13  ;;  %v922_v44 = vshrl.u32 %v3655_v58, %v910_v13 }
 0x102   : > { %v925_v51 = vshrl.u32 %v3656_v39, %v910_v13  ;;  %vm930_vm3 = vcmp.lt.s32.totalorder %v908_v22, 4  ;;  %v911_v18 = vshrl.u32 %v3651_v23, %v910_v13  ;;  %vm929_vm4 = vcmp.lt.s32.totalorder %v908_v22, 3 }
 0x103   : > { %v914_v2 = vor.u32 %v913_v42, %v912_v26  ;;  %v917_v35 = vor.u32 %v916_v53, %v915_v55  ;;  %v920_v28 = vor.u32 %v919_v37, %v918_v54  ;;  %v923_v3 = vor.u32 %v922_v44, %v921_v56 }
 0x104   : > { %v926_v11 = vor.u32 %v925_v51, %v924_v45  ;;  %v1060_v33 = vadd.s32 1, %v3479_v25  ;;  %vm928_vm5 = vcmp.lt.s32.totalorder %v908_v22, 2  ;;  %v1058_v27 = vor.u32 8388608, %v4108_v29 }
 0x105   : > { %v932_v47 = vsel %vm930_vm3, %v920_v28, 2102212464  ;;  %v935_v31 = vsel %vm927_vm2, %v914_v2, %v917_v35  ;;  %v939_v38 = vsel %vm927_vm2, %v917_v35, %v920_v28  ;;  %v936_v40 = vsel %vm930_vm3, %v923_v3, 920167782 }
 0x106   : > { %v940_v32 = vsel %vm930_vm3, %v926_v11, 1326507024  ;;  %v931_v34 = vsel %vm927_vm2, %v911_v18, %v914_v2  ;;  %v937_v52 = vsel %vm929_vm4, %v920_v28, %v936_v40  ;;  %v933_v48 = vsel %vm929_vm4, %v917_v35, %v932_v47 }
 0x107   : > { %v941_v61 = vsel %vm929_vm4, %v923_v3, %v940_v32  ;;  %v938_v62 = vsel %vm928_vm5, %v935_v31, %v937_v52  ;;  %vm1061_vm6 = vcmp.gt.s32.totalorder %v1060_v33, 0  ;;  %v637_v26 = vadd.f32 %v636_v63, %v533_v15 }
 0x108   : > { %v942_v5 = vsel %vm928_vm5, %v939_v38, %v941_v61  ;;  %v968_v10 = vand.u32 65535, %v938_v62  ;;  %v969_v13 = vshrl.u32 %v938_v62, 16  ;;  %v4120_v55 = vsel %vm928_vm5, %v931_v34, %v933_v48 }
 0x109   : > { %v946_v41 = vand.u32 65535, %v942_v5  ;;  %v947_v0 = vshrl.u32 %v942_v5, 16  ;;  %v1062_v53 = vsel %vm1061_vm6, %v1060_v33, 0  ;;  %v3657_v47 = vmov 0  }
 0x10a   : > { %v971_v56 = vmul.u32 %v969_v13, %v4098_v12  ;;  %v972_v44 = vmul.u32 %v968_v10, %v4101_v20  ;;  %v970_v29 = vmul.u32 %v968_v10, %v4098_v12  ;;  %v973_v15 = vmul.u32 %v969_v13, %v4101_v20 }
 0x10b   : > { %v949_v42 = vmul.u32 %v947_v0, %v4098_v12  ;;  %v950_v22 = vmul.u32 %v946_v41, %v4101_v20  ;;  %v948_v54 = vmul.u32 %v946_v41, %v4098_v12  ;;  %v951_v37 = vmul.u32 %v947_v0, %v4101_v20 }
 0x10c   : > { %v974_v28 = vshll.u32 %v971_v56, 16  ;;  %v975_v25 = vshrl.u32 %v971_v56, 16  ;;  %v976_v11 = vshll.u32 %v972_v44, 16  ;;  %v1064_v18 = vand.u32 31, %v1062_v53 }
 0x10d   : > { %v952_v45 = vshll.u32 %v949_v42, 16  ;;  %v953_v51 = vshrl.u32 %v949_v42, 16  ;;  %v954_v2 = vshll.u32 %v950_v22, 16  ;;  %v955_v35 = vshrl.u32 %v950_v22, 16 }
 0x10e   : > { %v977_v38 = vshrl.u32 %v972_v44, 16  ;;  %vm978_vm8 = vc.u32 %v970_v29, %v974_v28  ;;  %v980_v40 = vadd.s32 %v974_v28, %v970_v29  ;;  %v4132_v33 = vsub.s32 32, %v1064_v18 }
 0x10f   : > { %vm956_vm7 = vc.u32 %v948_v54, %v952_v45  ;;  %v958_v3 = vadd.s32 %v952_v45, %v948_v54  ;;  %v979_v12 = vsel %vm978_vm8, 1, %v3657_v47  ;;  %v4135_v52 = vshrl.u32 %v1062_v53, 5  ;;  %v755_v54 = vpop.f32.mrf.mxu0 }
 0x110   : > { %v957_v31 = vsel %vm956_vm7, 1, %v3657_v47  ;;  %v981_v34 = vadd.s32 %v979_v12, %v973_v15  ;;  %vm982_vm10 = vc.u32 %v980_v40, %v976_v11  ;;  %v4138_v48 = vadd.s32 %v980_v40, %v976_v11 }
 0x111   : > { %v959_v32 = vadd.s32 %v957_v31, %v951_v37  ;;  %vm960_vm9 = vc.u32 %v958_v3, %v954_v2  ;;  %v983_v63 = vsel %vm982_vm10, 1, %v3657_v47  ;;  %v1067_v62 = vshll.u32 %v3651_v23, %v1064_v18 }
 0x112   : > { %v961_v20 = vsel %vm960_vm9, 1, %v3657_v47  ;;  %v985_v5 = vadd.s32 %v983_v63, %v981_v34  ;;  %v1068_v41 = vshrl.u32 %v3652_v36, %v4132_v33  ;;  %v1070_v0 = vshll.u32 %v3652_v36, %v1064_v18 }
 0x113   : > { %v963_v61 = vadd.s32 %v961_v20, %v959_v32  ;;  %v1071_v10 = vshrl.u32 %v3653_v46, %v4132_v33  ;;  %v1073_v42 = vshll.u32 %v3653_v46, %v1064_v18  ;;  %v1074_v22 = vshrl.u32 %v3654_v16, %v4132_v33 }
 0x114   : > { %v1076_v53 = vshll.u32 %v3654_v16, %v1064_v18  ;;  %v986_v37 = vadd.s32 %v985_v5, %v975_v25  ;;  %v4150_v56 = vor.u32 %v1068_v41, %v1067_v62  ;;  %v1077_v45 = vshrl.u32 %v3655_v58, %v4132_v33 }
 0x115   : > { %v964_v13 = vadd.s32 %v963_v61, %v953_v51  ;;  %v4152_v44 = vor.u32 %v1071_v10, %v1070_v0  ;;  %v1075_v15 = vor.u32 %v1074_v22, %v1073_v42  ;;  %v1079_v51 = vshll.u32 %v3655_v58, %v1064_v18 }
 0x116   : > { %v1080_v2 = vshrl.u32 %v3656_v39, %v4132_v33  ;;  %v987_v28 = vadd.s32 %v986_v37, %v977_v38  ;;  %v1078_v3 = vor.u32 %v1077_v45, %v1076_v53  ;;  %v756_v11 = vadd.f32 %v755_v54, %v637_v26 }
 0x117   : > { %v4156_v29 = vadd.s32 %v964_v13, %v955_v35  ;;  %vm1082_vm12 = vcmp.lt.s32.totalorder %v4135_v52, 1  ;;  %v4164_v31 = vshll.u32 %v1058_v27, 8  ;;  %v988_v35 = vmul.u32 %v4091_v1, %v4120_v55  ;;  %v840_v13 = vpop.f32.mrf.mxu1 }
 0x118   : > { %v1081_v25 = vor.u32 %v1080_v2, %v1079_v51  ;;  %v991_v40 = vadd.s32 1, %v987_v28  ;;  %vm1085_vm13 = vcmp.lt.s32.totalorder %v4135_v52, 4  ;;  %v1090_v18 = vsel %vm1082_vm12, %v4150_v56, %v4152_v44 }
 0x119   : > { %vm990_vm11 = vc.u32 %v4156_v29, %v4138_v48  ;;  %vm1084_vm14 = vcmp.lt.s32.totalorder %v4135_v52, 3  ;;  %v1091_v26 = vsel %vm1085_vm13, %v1078_v3, 920167782  ;;  %v1094_v27 = vsel %vm1082_vm12, %v4152_v44, %v1075_v15 }
 0x11a   : > { %v1095_v1 = vsel %vm1085_vm13, %v1081_v25, 1326507024  ;;  %v992_v55 = vsel %vm990_vm11, %v991_v40, %v987_v28  ;;  %vm1083_vm15 = vcmp.lt.s32.totalorder %v4135_v52, 2  ;;  %v1092_v38 = vsel %vm1084_vm14, %v1075_v15, %v1091_v26 }
 0x11b   : > { %v1096_v32 = vsel %vm1084_vm14, %v1078_v3, %v1095_v1  ;;  %v993_v12 = vadd.s32 %v992_v55, %v988_v35  ;;  %v1093_v20 = vsel %vm1083_vm15, %v1090_v18, %v1092_v38  ;;  %v1099_v61 = vand.u32 65535, %v4164_v31 }
 0x11c   : > { %v1097_v34 = vsel %vm1083_vm15, %v1094_v27, %v1096_v32  ;;  %v1100_v63 = vshrl.u32 %v4164_v31, 16  ;;  %v1124_v41 = vshrl.u32 %v1093_v20, 16  ;;  %v1123_v10 = vand.u32 65535, %v1093_v20 }
 0x11d   : > { %v1101_v62 = vand.u32 65535, %v1097_v34  ;;  %v1102_v5 = vshrl.u32 %v1097_v34, 16  ;;  %v994_v0 = vadd.s32 536870912, %v993_v12  ;;  %v4192_v51 = vadd.f32 %v840_v13, %v756_v11 }
 0x11e   : > { %v1126_v54 = vmul.u32 %v1124_v41, %v1099_v61  ;;  %v1127_v3 = vmul.u32 %v1123_v10, %v1100_v63  ;;  %v1125_v18 = vmul.u32 %v1123_v10, %v1099_v61  ;;  %v1087_v27 = vsel %vm1085_vm13, %v1075_v15, 2102212464 }
 0x11f   : > { %v1104_v42 = vmul.u32 %v1102_v5, %v1099_v61  ;;  %v1105_v22 = vmul.u32 %v1101_v62, %v1100_v63  ;;  %v995_v53 = vshrl.u32 %v994_v0, 30  ;;  %v1103_v37 = vmul.u32 %v1101_v62, %v1099_v61 }
 0x120   : > { %v1106_v28 = vmul.u32 %v1102_v5, %v1100_v63  ;;  %v1129_v25 = vshll.u32 %v1126_v54, 16  ;;  %v1128_v32 = vmul.u32 %v1124_v41, %v1100_v63  ;;  %v1131_v34 = vshll.u32 %v1127_v3, 16 }
 0x121   : > { %v1107_v45 = vshll.u32 %v1104_v42, 16  ;;  %v996_v2 = vshll.u32 %v995_v53, 30  ;;  %v1109_v35 = vshll.u32 %v1105_v22, 16  ;;  %v1108_v1 = vshrl.u32 %v1104_v42, 16 }
 0x122   : > { %vm1133_vm2 = vc.u32 %v1125_v18, %v1129_v25  ;;  %v1135_v61 = vadd.s32 %v1129_v25, %v1125_v18  ;;  %v1019_v15 = vsub.s32 4, %v995_v53  ;;  %v1066_v10 = vshrl.u32 %v3651_v23, %v4132_v33 }
 0x123   : > { %vm1111_vm0 = vc.u32 %v1103_v37, %v1107_v45  ;;  %v1113_v40 = vadd.s32 %v1107_v45, %v1103_v37  ;;  %v997_v26 = vsub.s32 %v993_v12, %v996_v2  ;;  %v1134_v5 = vsel %vm1133_vm2, 1, %v3657_v47 }
 0x124   : > { %v1112_v55 = vsel %vm1111_vm0, 1, %v3657_v47  ;;  %v1208_v12 = vand.u32 2139095040, %v4192_v51  ;;  %v1136_v13 = vadd.s32 %v1134_v5, %v1128_v32  ;;  %vm897_vm4 = vcmp.lt.s32.totalorder %v4084_v7, 0 }
 0x125   : > { %v1114_v38 = vadd.s32 %v1112_v55, %v1106_v28  ;;  %vm1115_vm1 = vc.u32 %v1113_v40, %v1109_v35  ;;  %vm998_vm3 = vcmp.lt.s32.totalorder %v997_v26, 0  ;;  %v999_v11 = vsub.s32 0, %v997_v26  ;;  %v844_v40 = vpop.f32.mrf.mxu1 }
 0x126   : > { %v1116_v20 = vsel %vm1115_vm1, 1, %v3657_v47  ;;  %vm1137_vm5 = vc.u32 %v1135_v61, %v1131_v34  ;;  %v1086_v42 = vsel %vm1082_vm12, %v1066_v10, %v4150_v56  ;;  %v1088_v37 = vsel %vm1084_vm14, %v4152_v44, %v1087_v27 }
 0x127   : > { %v1118_v62 = vadd.s32 %v1116_v20, %v1114_v38  ;;  %v1000_v0 = vsel %vm998_vm3, %v999_v11, %v997_v26  ;;  %v1110_v45 = vshrl.u32 %v1105_v22, 16  ;;  %v1138_v2 = vsel %vm1137_vm5, 1, %v3657_v47 }
 0x128   : > { %v1001_v63 = vclz %v1000_v0  ;;  %v1130_v25 = vshrl.u32 %v1126_v54, 16  ;;  %v1140_v33 = vadd.s32 %v1138_v2, %v1136_v13  ;;  %v1209_v35 = vshrl.u32 %v1208_v12, 23  ;;  %v642_v2 = vpop.f32.mrf.mxu3 }
 0x129   : > { %v1119_v41 = vadd.s32 %v1118_v62, %v1108_v1  ;;  %vm4212_vm6 = vcmp.le.f32.partialorder %v895_v24, 0.7853982  ;;  %v1020_v56 = vsel %vm897_vm4, %v1019_v15, %v995_v53  ;;  %v989_v44 = vadd.s32 %v4138_v48, %v4156_v29 }
 0x12a   : > { %v3477_v28 = vadd.s32 4294967294, %v1001_v63  ;;  %v1132_v22 = vshrl.u32 %v1127_v3, 16  ;;  %v1141_v27 = vadd.s32 %v1140_v33, %v1130_v25  ;;  %v1089_v1 = vsel %vm1083_vm15, %v1086_v42, %v1088_v37 }
 0x12b   : > { %v4218_v18 = vadd.s32 %v1119_v41, %v1110_v45  ;;  %v4224_v55 = vadd.s32 %v1135_v61, %v1131_v34  ;;  %v3482_v24 = vadd.s32 4294967169, %v1209_v35  ;;  %v1022_v53 = vsel %vm4212_vm6, 0, %v1020_v56  ;;  %v537_v61 = vpop.f32.mrf.mxu2 }
 0x12c   : > { %vm3478_vm7 = vcmp.lt.s32.totalorder %v3477_v28, 0  ;;  %v1142_v11 = vadd.s32 %v1141_v27, %v1132_v22  ;;  %v1205_v48 = vand.u32 2147483647, %v4192_v51  ;;  %v1039_v5 = vadd.s32 3, %v1022_v53  ;;  %v759_v53 = vpop.f32.mrf.mxu0 }
 0x12d   : > { %v1004_v54 = vsel %vm3478_vm7, 0, %v3477_v28  ;;  %vm1145_vm8 = vc.u32 %v4218_v18, %v4224_v55  ;;  %v1215_v29 = vadd.s32 1, %v3482_v24  ;;  %v1143_v34 = vmul.u32 %v4164_v31, %v1089_v1 }
 0x12e   : > { %v1005_v38 = vsub.s32 32, %v1004_v54  ;;  %v1009_v32 = vsub.s32 4294967266, %v1004_v54  ;;  %v1006_v3 = vshll.u32 %v997_v26, %v1004_v54  ;;  %v1146_v52 = vadd.s32 1, %v1142_v11 }
 0x12f   : > { %vm1216_vm9 = vcmp.gt.s32.totalorder %v1215_v29, 0  ;;  %v1212_v63 = vand.u32 8388607, %v1205_v48  ;;  %v538_v26 = vadd.f32 %v537_v61, %v4031_v57  ;;  %v4237_v25 = vand.u32 3, %v1039_v5 }
 0x130   : > { %v1007_v20 = vshrl.u32 %v989_v44, %v1005_v38  ;;  %v1010_v62 = vadd.s32 127, %v1009_v32  ;;  %v1147_v15 = vsel %vm1145_vm8, %v1146_v52, %v1142_v11  ;;  %v1217_v10 = vsel %vm1216_vm9, %v1215_v29, 0 }
 0x131   : > { %v1148_v13 = vadd.s32 %v1147_v15, %v1143_v34  ;;  %v1219_v41 = vand.u32 31, %v1217_v10  ;;  %v1213_v35 = vor.u32 8388608, %v1212_v63  ;;  %v643_v54 = vadd.f32 %v642_v2, %v538_v26 }
 0x132   : > { %v1008_v12 = vor.u32 %v1007_v20, %v1006_v3  ;;  %v1011_v0 = vshll.u32 %v1010_v62, 23  ;;  %v4253_v29 = vshrl.u32 %v1217_v10, 5  ;;  %vm1052_vm11 = vcmp.lt.s32.totalorder %v4093_v6, 0 }
 0x133   : > { %v1149_v37 = vadd.s32 536870912, %v1148_v13  ;;  %v4235_v45 = vsub.s32 32, %v1219_v41  ;;  %v1222_v57 = vshll.u32 %v3651_v23, %v1219_v41  ;;  %v1225_v24 = vshll.u32 %v3652_v36, %v1219_v41 }
 0x134   : > { %v1012_v42 = vor.u32 4788187, %v1011_v0  ;;  %v1015_v31 = vcvt.s32.f32 %v1008_v12  ;;  %v1231_v32 = vshll.u32 %v3654_v16, %v1219_v41  ;;  %v1228_v3 = vshll.u32 %v3653_v46, %v1219_v41 }
 0x135   : > { %v4239_v33 = vshrl.u32 %v1149_v37, 30  ;;  %v1223_v56 = vshrl.u32 %v3652_v36, %v4235_v45  ;;  %v1226_v44 = vshrl.u32 %v3653_v46, %v4235_v45  ;;  %v1232_v27 = vshrl.u32 %v3655_v58, %v4235_v45 }
 0x136   : > { %v1013_v28 = vand.u32 2147483647, %v1012_v42  ;;  %v1229_v38 = vshrl.u32 %v3654_v16, %v4235_v45  ;;  %v1235_v20 = vshrl.u32 %v3656_v39, %v4235_v45  ;;  %v1234_v12 = vshll.u32 %v3655_v58, %v1219_v41 }
 0x137   : > { %v1151_v1 = vshll.u32 %v4239_v33, 30  ;;  %v4260_v52 = vor.u32 %v1223_v56, %v1222_v57  ;;  %v4262_v5 = vor.u32 %v1226_v44, %v1225_v24  ;;  %v1233_v34 = vor.u32 %v1232_v27, %v1231_v32 }
 0x138   : > { %v1016_v22 = vmul.f32 %v1015_v31, %v1013_v28  ;;  %v4267_v0 = vshll.u32 %v1213_v35, 8  ;;  %v760_v15 = vadd.f32 %v759_v53, %v643_v54  ;;  %v4276_v63 = vor.u32 %v1229_v38, %v1228_v3 }
 0x139   : > { %v4258_v62 = vsub.s32 %v1148_v13, %v1151_v1  ;;  %v1144_v41 = vadd.s32 %v4224_v55, %v4218_v18  ;;  %vm1237_vm12 = vcmp.lt.s32.totalorder %v4253_v29, 1  ;;  %vm1240_vm13 = vcmp.lt.s32.totalorder %v4253_v29, 4 }
 0x13a   : > { %v1017_v11 = vxor.u32 2147483648, %v1016_v22  ;;  %v1236_v37 = vor.u32 %v1235_v20, %v1234_v12  ;;  %v1245_v2 = vsel %vm1237_vm12, %v4260_v52, %v4262_v5  ;;  %v1246_v28 = vsel %vm1240_vm13, %v1233_v34, 920167782 }
 0x13b   : > { %vm1153_vm10 = vcmp.lt.s32.totalorder %v4258_v62, 0  ;;  %v1154_v13 = vsub.s32 0, %v4258_v62  ;;  %vm1239_vm14 = vcmp.lt.s32.totalorder %v4253_v29, 3  ;;  %vm1238_vm15 = vcmp.lt.s32.totalorder %v4253_v29, 2 }
 0x13c   : > { %v1018_v61 = vsel %vm897_vm4, %v1017_v11, %v1016_v22  ;;  %v1247_v18 = vsel %vm1239_vm14, %v4276_v63, %v1246_v28  ;;  %v1254_v55 = vand.u32 65535, %v4267_v0  ;;  %v4298_v44 = vadd.f32 %v844_v40, %v760_v15 }
 0x13d   : > { %v4272_v10 = vsel %vm4212_vm6, %v4084_v7, %v1018_v61  ;;  %v1155_v26 = vsel %vm1153_vm10, %v1154_v13, %v4258_v62  ;;  %v1248_v54 = vsel %vm1238_vm15, %v1245_v2, %v1247_v18  ;;  %v1174_v1 = vsub.s32 4, %v4239_v33 }
 0x13e   : > { %v1023_v42 = vmul.f32 %v4272_v10, %v4272_v10  ;;  %v1156_v56 = vclz %v1155_v26  ;;  %v1249_v24 = vsel %vm1237_vm12, %v4262_v5, %v4276_v63  ;;  %v1250_v38 = vsel %vm1240_vm13, %v1236_v37, 1326507024 }
 0x13f   : > { %v1279_v32 = vshrl.u32 %v1248_v54, 16  ;;  %v1251_v3 = vsel %vm1239_vm14, %v1233_v34, %v1250_v38  ;;  %v1255_v12 = vshrl.u32 %v4267_v0, 16  ;;  %v1363_v15 = vand.u32 2139095040, %v4298_v44 }
 0x140   : > { %v1024_v31 = vmul.f32 -0.001358992, %v1023_v42  ;;  %v1031_v35 = vmul.f32 -0.00019511016, %v1023_v42  ;;  %v3480_v27 = vadd.s32 4294967294, %v1156_v56  ;;  %v1252_v61 = vsel %vm1238_vm15, %v1249_v24, %v1251_v3 }
 0x141   : > { %v1278_v2 = vand.u32 65535, %v1248_v54  ;;  %vm1042_vm1 = vcmp.eq.s32.totalorder %v4237_v25, 0  ;;  %vm1045_vm2 = vcmp.eq.s32.totalorder %v4237_v25, 2  ;;  %v4320_v34 = vsel %vm1052_vm11, %v1174_v1, %v4239_v33 }
 0x142   : > { %v1025_v22 = vadd.f32 0.041655596, %v1024_v31  ;;  %v1032_v57 = vadd.f32 0.008332121, %v1031_v35  ;;  %vm3481_vm0 = vcmp.lt.s32.totalorder %v3480_v27, 0  ;;  %v1256_v28 = vand.u32 65535, %v1252_v61 }
 0x143   : > { %v1159_v20 = vsel %vm3481_vm0, 0, %v3480_v27  ;;  %v1257_v31 = vshrl.u32 %v1252_v61, 16  ;;  %vm1041_vm3 = vcmp.lt.s32.totalorder %v4237_v25, 2  ;;  %vm1038_vm4 = vweird.f32 %v4084_v7 }
 0x144   : > { %v1026_v53 = vmul.f32 %v1025_v22, %v1023_v42  ;;  %v1033_v11 = vmul.f32 %v1032_v57, %v1023_v42  ;;  %v1160_v26 = vsub.s32 32, %v1159_v20  ;;  %v1164_v37 = vsub.s32 4294967266, %v1159_v20 }
 0x145   : > { %v4323_v22 = vmul.u32 %v1279_v32, %v1254_v55  ;;  %v1161_v57 = vshll.u32 %v4258_v62, %v1159_v20  ;;  %v1259_v54 = vmul.u32 %v1257_v31, %v1254_v55  ;;  %v1260_v24 = vmul.u32 %v1256_v28, %v1255_v12 }
 0x146   : > { %v1027_v13 = vadd.f32 -0.4999988, %v1026_v53  ;;  %v1034_v40 = vadd.f32 -0.16666654, %v1033_v11  ;;  %v1162_v18 = vshrl.u32 %v1144_v41, %v1160_v26  ;;  %v1165_v27 = vadd.s32 127, %v1164_v37 }
 0x147   : > { %v1280_v38 = vmul.u32 %v1278_v2, %v1254_v55  ;;  %v4328_v53 = vmul.u32 %v1278_v2, %v1255_v12  ;;  %vm4332_vm5 = vcmp.le.f32.partialorder %v1050_v14, 0.7853982  ;;  %v1258_v3 = vmul.u32 %v1256_v28, %v1254_v55 }
 0x148   : > { %v1028_v35 = vmul.f32 %v1027_v13, %v1023_v42  ;;  %v1035_v56 = vmul.f32 %v1034_v40, %v1023_v42  ;;  %v1163_v41 = vor.u32 %v1162_v18, %v1161_v57  ;;  %v1166_v11 = vshll.u32 %v1165_v27, 23 }
 0x149   : > { %v1262_v62 = vshll.u32 %v1259_v54, 16  ;;  %v1261_v13 = vmul.u32 %v1257_v31, %v1255_v12  ;;  %v1264_v40 = vshll.u32 %v1260_v24, 16  ;;  %v1284_v37 = vshll.u32 %v4323_v22, 16 }
 0x14a   : > { %v1029_v33 = vadd.f32 1.0, %v1028_v35  ;;  %v1036_v1 = vadd.f32 1.0, %v1035_v56  ;;  %v1167_v26 = vor.u32 4788187, %v1166_v11  ;;  %v1263_v35 = vshrl.u32 %v1259_v54, 16 }
 0x14b   : > { %vm1266_vm6 = vc.u32 %v1258_v3, %v1262_v62  ;;  %v1268_v2 = vadd.s32 %v1262_v62, %v1258_v3  ;;  %v1283_v18 = vmul.u32 %v1279_v32, %v1255_v12  ;;  %v1170_v55 = vcvt.s32.f32 %v1163_v41 }
 0x14c   : > { %v1037_v20 = vmul.f32 %v1036_v1, %v4272_v10  ;;  %v1046_v61 = vxor.u32 2147483648, %v1029_v33  ;;  %v1267_v56 = vsel %vm1266_vm6, 1, %v3657_v47  ;;  %v1168_v57 = vand.u32 2147483647, %v1167_v26 }
 0x14d   : > { %v1269_v28 = vadd.s32 %v1267_v56, %v1261_v13  ;;  %vm1270_vm7 = vc.u32 %v1268_v2, %v1264_v40  ;;  %vm1288_vm8 = vc.u32 %v1280_v38, %v1284_v37  ;;  %v1286_v41 = vshll.u32 %v4328_v53, 16 }
 0x14e   : > { %v1043_v14 = vxor.u32 2147483648, %v1037_v20  ;;  %v1047_v31 = vsel %vm1045_vm2, %v1046_v61, %v1037_v20  ;;  %v1271_v27 = vsel %vm1270_vm7, 1, %v3657_v47  ;;  %v1171_v54 = vmul.f32 %v1170_v55, %v1168_v57 }
 0x14f   : > { %v1273_v11 = vadd.s32 %v1271_v27, %v1269_v28  ;;  %v1289_v32 = vsel %vm1288_vm8, 1, %v3657_v47  ;;  %v1290_v3 = vadd.s32 %v1284_v37, %v1280_v38  ;;  %v1360_v25 = vand.u32 2147483647, %v4298_v44 }
 0x150   : > { %v1044_v10 = vsel %vm1042_vm1, %v1029_v33, %v1043_v14  ;;  %v1291_v33 = vadd.s32 %v1289_v32, %v1283_v18  ;;  %v1172_v62 = vxor.u32 2147483648, %v1171_v54  ;;  %v1364_v61 = vshrl.u32 %v1363_v15, 23 }
 0x151   : > { %v1048_v1 = vsel %vm1041_vm3, %v1044_v10, %v1047_v31  ;;  %v1274_v20 = vadd.s32 %v1273_v11, %v1263_v35  ;;  %v1177_v7 = vsel %vm4332_vm5, 0, %v4320_v34  ;;  %v1221_v13 = vshrl.u32 %v3651_v23, %v4235_v45 }
 0x152   : > { %v1049_v12 = vsel %vm1038_vm4, nan, %v1048_v1  ;;  %v1242_v38 = vsel %vm1240_vm13, %v4276_v63, 2102212464  ;;  %vm1292_vm9 = vc.u32 %v1290_v3, %v1286_v41  ;;  %v1173_v40 = vsel %vm1052_vm11, %v1172_v62, %v1171_v54 }
 0x153   : > { %3375 = vst [vmem:[%s4352_s20] sm:$0xff] %v1049_v12  ;;  %v1265_v26 = vshrl.u32 %v1260_v24, 16  ;;  %v1293_v2 = vsel %vm1292_vm9, 1, %v3657_v47  ;;  %v3485_v37 = vadd.s32 4294967169, %v1364_v61  ;;  %v1176_v15 = vsel %vm4332_vm5, %v4093_v6, %v1173_v40 }
 0x154   : > { %v1241_v45 = vsel %vm1237_vm12, %v1221_v13, %v4260_v52  ;;  %v1285_v34 = vshrl.u32 %v4323_v22, 16  ;;  %v1295_v14 = vadd.s32 %v1293_v2, %v1291_v33  ;;  %v1178_v63 = vmul.f32 %v1176_v15, %v1176_v15 }
 0x155   : > { %v1243_v35 = vsel %vm1239_vm14, %v4262_v5, %v1242_v38  ;;  %v4379_v24 = vadd.s32 %v1274_v20, %v1265_v26  ;;  %v1370_v56 = vadd.s32 1, %v3485_v37  ;;  %v1194_v18 = vadd.s32 3, %v1177_v7 }
 0x156   : > { %v1287_v57 = vshrl.u32 %v4328_v53, 16  ;;  %v1296_v42 = vadd.s32 %v1295_v14, %v1285_v34  ;;  %v1179_v55 = vmul.f32 -0.001358992, %v1178_v63  ;;  %v1186_v28 = vmul.f32 -0.00019511016, %v1178_v63 }
 0x157   : > { %v4382_v10 = vadd.s32 %v1290_v3, %v1286_v41  ;;  %vm1371_vm10 = vcmp.gt.s32.totalorder %v1370_v56, 0  ;;  %v1244_v52 = vsel %vm1238_vm15, %v1241_v45, %v1243_v35  ;;  %v1367_v31 = vand.u32 8388607, %v1360_v25 }
 0x158   : > { %v1297_v22 = vadd.s32 %v1296_v42, %v1287_v57  ;;  %v1372_v5 = vsel %vm1371_vm10, %v1370_v56, 0  ;;  %v1180_v27 = vadd.f32 0.041655596, %v1179_v55  ;;  %v1187_v1 = vadd.f32 0.008332121, %v1186_v28  ;;  %v542_v42 = vpop.f32.mrf.mxu2 }
 0x159   : > { %vm1300_vm11 = vc.u32 %v4379_v24, %v4382_v10  ;;  %v1374_v53 = vand.u32 31, %v1372_v5  ;;  %v1195_v54 = vand.u32 3, %v1194_v18  ;;  %v1298_v41 = vmul.u32 %v4267_v0, %v1244_v52 }
 0x15a   : > { %v1301_v11 = vadd.s32 1, %v1297_v22  ;;  %v1181_v32 = vmul.f32 %v1180_v27, %v1178_v63  ;;  %v1188_v12 = vmul.f32 %v1187_v1, %v1178_v63  ;;  %v1368_v61 = vor.u32 8388608, %v1367_v31 }
 0x15b   : > { %v4391_v3 = vsub.s32 32, %v1374_v53  ;;  %vm1197_vm12 = vcmp.eq.s32.totalorder %v1195_v54, 0  ;;  %v4393_v7 = vshrl.u32 %v1372_v5, 5  ;;  %vm1196_vm13 = vcmp.lt.s32.totalorder %v1195_v54, 2 }
 0x15c   : > { %v1302_v29 = vsel %vm1300_vm11, %v1301_v11, %v1297_v22  ;;  %v1182_v33 = vadd.f32 -0.4999988, %v1181_v32  ;;  %v1189_v62 = vadd.f32 -0.16666654, %v1188_v12  ;;  %v1377_v37 = vshll.u32 %v3651_v23, %v1374_v53 }
 0x15d   : > { %v1303_v20 = vadd.s32 %v1302_v29, %v1298_v41  ;;  %v1378_v13 = vshrl.u32 %v3652_v36, %v4391_v3  ;;  %v1381_v38 = vshrl.u32 %v3653_v46, %v4391_v3  ;;  %v1387_v40 = vshrl.u32 %v3655_v58, %v4391_v3 }
 0x15e   : > { %v1183_v0 = vmul.f32 %v1182_v33, %v1178_v63  ;;  %v1190_v26 = vmul.f32 %v1189_v62, %v1178_v63  ;;  %vm1193_vm14 = vweird.f32 %v4093_v6  ;;  %v1380_v45 = vshll.u32 %v3652_v36, %v1374_v53 }
 0x15f   : > { %v1304_v2 = vadd.s32 536870912, %v1303_v20  ;;  %v1383_v34 = vshll.u32 %v3653_v46, %v1374_v53  ;;  %v1384_v14 = vshrl.u32 %v3654_v16, %v4391_v3  ;;  %v1386_v35 = vshll.u32 %v3654_v16, %v1374_v53 }
 0x160   : > { %v1184_v56 = vadd.f32 1.0, %v1183_v0  ;;  %v1191_v18 = vadd.f32 1.0, %v1190_v26  ;;  %v1390_v63 = vshrl.u32 %v3656_v39, %v4391_v3  ;;  %v1379_v55 = vor.u32 %v1378_v13, %v1377_v37 }
 0x161   : > { %v4408_v57 = vshrl.u32 %v1304_v2, 30  ;;  %v4412_v28 = vor.u32 %v1381_v38, %v1380_v45  ;;  %v1388_v52 = vor.u32 %v1387_v40, %v1386_v35  ;;  %v1389_v22 = vshll.u32 %v3655_v58, %v1374_v53 }
 0x162   : > { %v1192_v31 = vmul.f32 %v1191_v18, %v1176_v15  ;;  %vm1200_vm15 = vcmp.eq.s32.totalorder %v1195_v54, 2  ;;  %v1201_v5 = vxor.u32 2147483648, %v1184_v56  ;;  %v4416_v1 = vor.u32 %v1384_v14, %v1383_v34  ;;  %v763_v14 = vpop.f32.mrf.mxu0 }
 0x163   : > { %v1306_v27 = vshll.u32 %v4408_v57, 30  ;;  %v1391_v11 = vor.u32 %v1390_v63, %v1389_v22  ;;  %v4418_v32 = vshll.u32 %v1368_v61, 8  ;;  %v543_v12 = vadd.f32 %v542_v42, %v4042_v9  ;;  %v648_v9 = vpop.f32.mrf.mxu3 }
 0x164   : > { %v1198_v41 = vxor.u32 2147483648, %v1192_v31  ;;  %vm1392_vm0 = vcmp.lt.s32.totalorder %v4393_v7, 1  ;;  %vm1395_vm1 = vcmp.lt.s32.totalorder %v4393_v7, 4  ;;  %vm1393_vm2 = vcmp.lt.s32.totalorder %v4393_v7, 2 }
 0x165   : > { %v4421_v29 = vsub.s32 %v1303_v20, %v1306_v27  ;;  %vm1394_vm3 = vcmp.lt.s32.totalorder %v4393_v7, 3  ;;  %v1400_v15 = vsel %vm1392_vm0, %v1379_v55, %v4412_v28  ;;  %v1401_v53 = vsel %vm1395_vm1, %v1388_v52, 920167782 }
 0x166   : > { %v1199_v33 = vsel %vm1197_vm12, %v1184_v56, %v1198_v41  ;;  %v1202_v62 = vsel %vm1200_vm15, %v1201_v5, %v1192_v31  ;;  %v1402_v13 = vsel %vm1394_vm3, %v4416_v1, %v1401_v53  ;;  %v1404_v38 = vsel %vm1392_vm0, %v4412_v28, %v4416_v1 }
 0x167   : > { %vm1308_vm4 = vcmp.lt.s32.totalorder %v4421_v29, 0  ;;  %v1309_v20 = vsub.s32 0, %v4421_v29  ;;  %v1203_v61 = vsel %vm1196_vm13, %v1199_v33, %v1202_v62  ;;  %v1405_v40 = vsel %vm1395_vm1, %v1391_v11, 1326507024 }
 0x168   : > { %v1204_v0 = vsel %vm1193_vm14, nan, %v1203_v61  ;;  %v1403_v54 = vsel %vm1393_vm2, %v1400_v15, %v1402_v13  ;;  %v649_v2 = vadd.f32 %v648_v9, %v543_v12  ;;  %v1406_v45 = vsel %vm1394_vm3, %v1388_v52, %v1405_v40 }
 0x169   : > { %v1310_v26 = vsel %vm1308_vm4, %v1309_v20, %v4421_v29  ;;  %3376 = vst [vmem:[%s4352_s20 + $0x8] sm:$0xff] %v1204_v0  ;;  %v1434_v34 = vshrl.u32 %v1403_v54, 16  ;;  %v1407_v35 = vsel %vm1393_vm2, %v1404_v38, %v1406_v45  ;;  %v1409_v56 = vand.u32 65535, %v4418_v32 }
 0x16a   : > { %v1311_v37 = vclz %v1310_v26  ;;  %v1410_v6 = vshrl.u32 %v4418_v32, 16  ;;  %v1433_v18 = vand.u32 65535, %v1403_v54  ;;  %v1376_v42 = vshrl.u32 %v3651_v23, %v4391_v3 }
 0x16b   : > { %v1411_v22 = vand.u32 65535, %v1407_v35  ;;  %v1412_v31 = vshrl.u32 %v1407_v35, 16  ;;  %v1299_v5 = vadd.s32 %v4382_v10, %v4379_v24  ;;  %v1329_v52 = vsub.s32 4, %v4408_v57 }
 0x16c   : > { %v3483_v63 = vadd.s32 4294967294, %v1311_v37  ;;  %v1436_v27 = vmul.u32 %v1434_v34, %v1409_v56  ;;  %v764_v11 = vadd.f32 %v763_v14, %v649_v2  ;;  %v1396_v12 = vsel %vm1392_vm0, %v1376_v42, %v1379_v55 }
 0x16d   : > { %v1414_v41 = vmul.u32 %v1412_v31, %v1409_v56  ;;  %v1415_v15 = vmul.u32 %v1411_v22, %v1410_v6  ;;  %v1435_v9 = vmul.u32 %v1433_v18, %v1409_v56  ;;  %v1437_v33 = vmul.u32 %v1433_v18, %v1410_v6 }
 0x16e   : > { %vm3484_vm5 = vcmp.lt.s32.totalorder %v3483_v63, 0  ;;  %v1439_v62 = vshll.u32 %v1436_v27, 16  ;;  %vm1207_vm6 = vcmp.lt.s32.totalorder %v4192_v51, 0  ;;  %v1413_v61 = vmul.u32 %v1411_v22, %v1409_v56  ;;  %v848_v56 = vpop.f32.mrf.mxu1 }
 0x16f   : > { %v1314_v53 = vsel %vm3484_vm5, 0, %v3483_v63  ;;  %v1417_v24 = vshll.u32 %v1414_v41, 16  ;;  %v1416_v13 = vmul.u32 %v1412_v31, %v1410_v6  ;;  %v1419_v38 = vshll.u32 %v1415_v15, 16 }
 0x170   : > { %v1315_v3 = vsub.s32 32, %v1314_v53  ;;  %v1319_v20 = vsub.s32 4294967266, %v1314_v53  ;;  %v1316_v10 = vshll.u32 %v4421_v29, %v1314_v53  ;;  %v1438_v40 = vmul.u32 %v1434_v34, %v1410_v6 }
 0x171   : > { %vm1421_vm7 = vc.u32 %v1413_v61, %v1417_v24  ;;  %v1423_v55 = vadd.s32 %v1417_v24, %v1413_v61  ;;  %v1441_v2 = vshll.u32 %v1437_v33, 16  ;;  %vm1443_vm8 = vc.u32 %v1435_v9, %v1439_v62 }
 0x172   : > { %v1317_v0 = vshrl.u32 %v1299_v5, %v1315_v3  ;;  %v1320_v26 = vadd.s32 127, %v1319_v20  ;;  %v1422_v54 = vsel %vm1421_vm7, 1, %v3657_v47  ;;  %v1445_v37 = vadd.s32 %v1439_v62, %v1435_v9 }
 0x173   : > { %v1424_v35 = vadd.s32 %v1422_v54, %v1416_v13  ;;  %vm1425_vm9 = vc.u32 %v1423_v55, %v1419_v38  ;;  %v1397_v29 = vsel %vm1395_vm1, %v4416_v1, 2102212464  ;;  %v1444_v6 = vsel %vm1443_vm8, 1, %v3657_v47  ;;  %v547_v1 = vpop.f32.mrf.mxu2 }
 0x174   : > { %v1318_v45 = vor.u32 %v1317_v0, %v1316_v10  ;;  %v1321_v14 = vshll.u32 %v1320_v26, 23  ;;  %v1426_v34 = vsel %vm1425_vm9, 1, %v3657_v47  ;;  %vm1447_vm10 = vc.u32 %v1445_v37, %v1441_v2 }
 0x175   : > { %v1418_v63 = vshrl.u32 %v1414_v41, 16  ;;  %v1428_v42 = vadd.s32 %v1426_v34, %v1424_v35  ;;  %v1446_v22 = vadd.s32 %v1444_v6, %v1438_v40  ;;  %v1420_v31 = vshrl.u32 %v1415_v15, 16  ;;  %v767_v6 = vpop.f32.mrf.mxu0 }
 0x176   : > { %v1322_v18 = vor.u32 4788187, %v1321_v14  ;;  %v1440_v5 = vshrl.u32 %v1436_v27, 16  ;;  %v1448_v53 = vsel %vm1447_vm10, 1, %v3657_v47  ;;  %v4474_v9 = vadd.f32 %v848_v56, %v764_v11 }
 0x177   : > { %v1325_v3 = vcvt.s32.f32 %v1318_v45  ;;  %v1429_v20 = vadd.s32 %v1428_v42, %v1418_v63  ;;  %v1450_v61 = vadd.s32 %v1448_v53, %v1446_v22  ;;  %v1330_v24 = vsel %vm1207_vm6, %v1329_v52, %v4408_v57 }
 0x178   : > { %v1323_v62 = vand.u32 2147483647, %v1322_v18  ;;  %v1398_v41 = vsel %vm1394_vm3, %v4412_v28, %v1397_v29  ;;  %v1515_v15 = vand.u32 2147483647, %v4474_v9  ;;  %v1518_v27 = vand.u32 2139095040, %v4474_v9 }
 0x179   : > { %v1430_v11 = vadd.s32 %v1429_v20, %v1420_v31  ;;  %v1442_v13 = vshrl.u32 %v1437_v33, 16  ;;  %v1451_v38 = vadd.s32 %v1450_v61, %v1440_v5  ;;  %vm4486_vm11 = vcmp.le.f32.partialorder %v1205_v48, 0.7853982  ;;  %v654_v33 = vpop.f32.mrf.mxu3 }
 0x17a   : > { %v1326_v10 = vmul.f32 %v1325_v3, %v1323_v62  ;;  %v1449_v0 = vadd.s32 %v1445_v37, %v1441_v2  ;;  %v1519_v57 = vshrl.u32 %v1518_v27, 23  ;;  %v548_v52 = vadd.f32 %v547_v1, %v4053_v21 }
 0x17b   : > { %v1399_v28 = vsel %vm1393_vm2, %v1396_v12, %v1398_v41  ;;  %v1452_v55 = vadd.s32 %v1451_v38, %v1442_v13  ;;  %v1522_v54 = vand.u32 8388607, %v1515_v15  ;;  %v1332_v45 = vsel %vm4486_vm11, 0, %v1330_v24 }
 0x17c   : > { %v1327_v26 = vxor.u32 2147483648, %v1326_v10  ;;  %vm1455_vm12 = vc.u32 %v1430_v11, %v1449_v0  ;;  %v3488_v48 = vadd.s32 4294967169, %v1519_v57  ;;  %v1453_v7 = vmul.u32 %v4418_v32, %v1399_v28  ;;  %v852_v32 = vpop.f32.mrf.mxu1 }
 0x17d   : > { %v1456_v37 = vadd.s32 1, %v1452_v55  ;;  %v655_v14 = vadd.f32 %v654_v33, %v548_v52  ;;  %v1349_v56 = vadd.s32 3, %v1332_v45  ;;  %v1523_v34 = vor.u32 8388608, %v1522_v54 }
 0x17e   : > { %v1328_v2 = vsel %vm1207_vm6, %v1327_v26, %v1326_v10  ;;  %v1525_v12 = vadd.s32 1, %v3488_v48  ;;  %v4509_v10 = vadd.s32 %v1449_v0, %v1430_v11  ;;  %vm1348_vm1 = vweird.f32 %v4192_v51 }
 0x17f   : > { %v1331_v21 = vsel %vm4486_vm11, %v4192_v51, %v1328_v2  ;;  %v1457_v29 = vsel %vm1455_vm12, %v1456_v37, %v1452_v55  ;;  %v768_v53 = vadd.f32 %v767_v6, %v655_v14  ;;  %v1350_v20 = vand.u32 3, %v1349_v56 }
 0x180   : > { %v1333_v35 = vmul.f32 %v1331_v21, %v1331_v21  ;;  %v1458_v18 = vadd.s32 %v1457_v29, %v1453_v7  ;;  %vm1526_vm13 = vcmp.gt.s32.totalorder %v1525_v12, 0  ;;  %v4503_v61 = vshll.u32 %v1523_v34, 8 }
 0x181   : > { %v1527_v22 = vsel %vm1526_vm13, %v1525_v12, 0  ;;  %v4512_v38 = vadd.f32 %v852_v32, %v768_v53  ;;  %vm1355_vm14 = vcmp.eq.s32.totalorder %v1350_v20, 2  ;;  %vm1352_vm15 = vcmp.eq.s32.totalorder %v1350_v20, 0 }
 0x182   : > { %v1334_v63 = vmul.f32 -0.001358992, %v1333_v35  ;;  %v1341_v42 = vmul.f32 -0.00019511016, %v1333_v35  ;;  %v1459_v31 = vadd.s32 536870912, %v1458_v18  ;;  %v1529_v5 = vand.u32 31, %v1527_v22 }
 0x183   : > { %v4515_v52 = vand.u32 65535, %v4503_v61  ;;  %v4518_v26 = vshrl.u32 %v4503_v61, 16  ;;  %v4522_v55 = vshrl.u32 %v1527_v22, 5  ;;  %vm1351_vm0 = vcmp.lt.s32.totalorder %v1350_v20, 2 }
 0x184   : > { %v1335_v62 = vadd.f32 0.041655596, %v1334_v63  ;;  %v1342_v3 = vadd.f32 0.008332121, %v1341_v42  ;;  %v4505_v1 = vshrl.u32 %v1459_v31, 30  ;;  %v4507_v24 = vsub.s32 32, %v1529_v5 }
 0x185   : > { %v1532_v45 = vshll.u32 %v3651_v23, %v1529_v5  ;;  %v1535_v37 = vshll.u32 %v3652_v36, %v1529_v5  ;;  %vm1362_vm3 = vcmp.lt.s32.totalorder %v4298_v44, 0  ;;  %v1541_v56 = vshll.u32 %v3654_v16, %v1529_v5 }
 0x186   : > { %v1336_v41 = vmul.f32 %v1335_v62, %v1333_v35  ;;  %v1343_v27 = vmul.f32 %v1342_v3, %v1333_v35  ;;  %v1461_v13 = vshll.u32 %v4505_v1, 30  ;;  %v1533_v11 = vshrl.u32 %v3652_v36, %v4507_v24 }
 0x187   : > { %v1536_v0 = vshrl.u32 %v3653_v46, %v4507_v24  ;;  %v1542_v48 = vshrl.u32 %v3655_v58, %v4507_v24  ;;  %v1539_v7 = vshrl.u32 %v3654_v16, %v4507_v24  ;;  %v1544_v62 = vshll.u32 %v3655_v58, %v1529_v5 }
 0x188   : > { %v1337_v40 = vadd.f32 -0.4999988, %v1336_v41  ;;  %v1344_v57 = vadd.f32 -0.16666654, %v1343_v27  ;;  %v4520_v28 = vsub.s32 %v1458_v18, %v1461_v13  ;;  %v1534_v34 = vor.u32 %v1533_v11, %v1532_v45 }
 0x189   : > { %v1537_v6 = vor.u32 %v1536_v0, %v1535_v37  ;;  %v1545_v18 = vshrl.u32 %v3656_v39, %v4507_v24  ;;  %v1543_v31 = vor.u32 %v1542_v48, %v1541_v56  ;;  %v1670_v3 = vand.u32 2147483647, %v4512_v38 }
 0x18a   : > { %v1338_v54 = vmul.f32 %v1337_v40, %v1333_v35  ;;  %v1345_v33 = vmul.f32 %v1344_v57, %v1333_v35  ;;  %vm1463_vm2 = vcmp.lt.s32.totalorder %v4520_v28, 0  ;;  %v1464_v2 = vsub.s32 0, %v4520_v28 }
 0x18b   : > { %v1538_v35 = vshll.u32 %v3653_v46, %v1529_v5  ;;  %v1673_v32 = vand.u32 2139095040, %v4512_v38  ;;  %vm4548_vm4 = vcmp.le.f32.partialorder %v1360_v25, 0.7853982  ;;  %vm1547_vm5 = vcmp.lt.s32.totalorder %v4522_v55, 1 }
 0x18c   : > { %v1339_v12 = vadd.f32 1.0, %v1338_v54  ;;  %v1346_v14 = vadd.f32 1.0, %v1345_v33  ;;  %v1465_v29 = vsel %vm1463_vm2, %v1464_v2, %v4520_v28  ;;  %v1546_v5 = vor.u32 %v1545_v18, %v1544_v62 }
 0x18d   : > { %v1466_v22 = vclz %v1465_v29  ;;  %v1540_v53 = vor.u32 %v1539_v7, %v1538_v35  ;;  %vm1549_vm6 = vcmp.lt.s32.totalorder %v4522_v55, 3  ;;  %vm1550_vm7 = vcmp.lt.s32.totalorder %v4522_v55, 4 }
 0x18e   : > { %v1347_v63 = vmul.f32 %v1346_v14, %v1331_v21  ;;  %v1356_v42 = vxor.u32 2147483648, %v1339_v12  ;;  %v1484_v21 = vsub.s32 4, %v4505_v1  ;;  %v1555_v25 = vsel %vm1547_vm5, %v1534_v34, %v1537_v6 }
 0x18f   : > { %v3486_v13 = vadd.s32 4294967294, %v1466_v22  ;;  %v1556_v11 = vsel %vm1550_vm7, %v1543_v31, 920167782  ;;  %vm1548_vm9 = vcmp.lt.s32.totalorder %v4522_v55, 2  ;;  %v1559_v37 = vsel %vm1547_vm5, %v1537_v6, %v1540_v53 }
 0x190   : > { %v1353_v41 = vxor.u32 2147483648, %v1347_v63  ;;  %v1357_v40 = vsel %vm1355_vm14, %v1356_v42, %v1347_v63  ;;  %v1557_v33 = vsel %vm1549_vm6, %v1540_v53, %v1556_v11  ;;  %v1485_v20 = vsel %vm1362_vm3, %v1484_v21, %v4505_v1 }
 0x191   : > { %vm3487_vm8 = vcmp.lt.s32.totalorder %v3486_v13, 0  ;;  %v1560_v14 = vsel %vm1550_vm7, %v1546_v5, 1326507024  ;;  %v1552_v18 = vsel %vm1550_vm7, %v1540_v53, 2102212464  ;;  %v1674_v5 = vshrl.u32 %v1673_v32, 23 }
 0x192   : > { %v1354_v57 = vsel %vm1352_vm15, %v1339_v12, %v1353_v41  ;;  %v1469_v54 = vsel %vm3487_vm8, 0, %v3486_v13  ;;  %v1558_v12 = vsel %vm1548_vm9, %v1555_v25, %v1557_v33  ;;  %v1561_v56 = vsel %vm1549_vm6, %v1543_v31, %v1560_v14 }
 0x193   : > { %v1358_v0 = vsel %vm1351_vm0, %v1354_v57, %v1357_v40  ;;  %v1470_v48 = vsub.s32 32, %v1469_v54  ;;  %v1474_v2 = vsub.s32 4294967266, %v1469_v54  ;;  %v1471_v7 = vshll.u32 %v4520_v28, %v1469_v54 }
 0x194   : > { %v1359_v45 = vsel %vm1348_vm1, nan, %v1358_v0  ;;  %v1588_v29 = vand.u32 65535, %v1558_v12  ;;  %v1531_v28 = vshrl.u32 %v3651_v23, %v4507_v24  ;;  %v1562_v1 = vsel %vm1548_vm9, %v1559_v37, %v1561_v56 }
 0x195   : > { %3377 = vst [vmem:[%s4352_s20 + $0x10] sm:$0xff] %v1359_v45  ;;  %v1472_v51 = vshrl.u32 %v4509_v10, %v1470_v48  ;;  %v1475_v35 = vadd.s32 127, %v1474_v2  ;;  %v1589_v63 = vshrl.u32 %v1558_v12, 16  ;;  %v1566_v62 = vand.u32 65535, %v1562_v1 }
 0x196   : > { %v1567_v41 = vshrl.u32 %v1562_v1, 16  ;;  %v1487_v10 = vsel %vm4548_vm4, 0, %v1485_v20  ;;  %v1551_v31 = vsel %vm1547_vm5, %v1531_v28, %v1534_v34  ;;  %v1592_v24 = vmul.u32 %v1588_v29, %v4518_v26 }
 0x197   : > { %v1473_v42 = vor.u32 %v1472_v51, %v1471_v7  ;;  %v1476_v22 = vshll.u32 %v1475_v35, 23  ;;  %v1591_v13 = vmul.u32 %v1589_v63, %v4515_v52  ;;  %v1553_v53 = vsel %vm1549_vm6, %v1537_v6, %v1552_v18 }
 0x198   : > { %v1569_v40 = vmul.u32 %v1567_v41, %v4515_v52  ;;  %v1570_v57 = vmul.u32 %v1566_v62, %v4518_v26  ;;  %v1590_v25 = vmul.u32 %v1588_v29, %v4515_v52  ;;  %v1593_v11 = vmul.u32 %v1589_v63, %v4518_v26 }
 0x199   : > { %v1477_v21 = vor.u32 4788187, %v1476_v22  ;;  %v1594_v0 = vshll.u32 %v1591_v13, 16  ;;  %v1480_v34 = vcvt.s32.f32 %v1473_v42  ;;  %v1568_v33 = vmul.u32 %v1566_v62, %v4515_v52 }
 0x19a   : > { %v1572_v45 = vshll.u32 %v1569_v40, 16  ;;  %v1571_v48 = vmul.u32 %v1567_v41, %v4518_v26  ;;  %v1574_v2 = vshll.u32 %v1570_v57, 16  ;;  %v1596_v37 = vshll.u32 %v1592_v24, 16 }
 0x19b   : > { %v1478_v54 = vand.u32 2147483647, %v1477_v21  ;;  %vm1598_vm10 = vc.u32 %v1590_v25, %v1594_v0  ;;  %v1600_v12 = vadd.s32 %v1594_v0, %v1590_v25  ;;  %v3491_v51 = vadd.s32 4294967169, %v1674_v5 }
 0x19c   : > { %vm1576_vm11 = vc.u32 %v1568_v33, %v1572_v45  ;;  %v1578_v32 = vadd.s32 %v1572_v45, %v1568_v33  ;;  %v1599_v7 = vsel %vm1598_vm10, 1, %v3657_v47  ;;  %v1504_v56 = vadd.s32 3, %v1487_v10 }
 0x19d   : > { %v1481_v6 = vmul.f32 %v1480_v34, %v1478_v54  ;;  %v1577_v20 = vsel %vm1576_vm11, 1, %v3657_v47  ;;  %v1601_v14 = vadd.s32 %v1599_v7, %v1593_v11  ;;  %v1554_v52 = vsel %vm1548_vm9, %v1551_v31, %v1553_v53 }
 0x19e   : > { %v1579_v29 = vadd.s32 %v1577_v20, %v1571_v48  ;;  %vm1580_vm12 = vc.u32 %v1578_v32, %v1574_v2  ;;  %vm1602_vm13 = vc.u32 %v1600_v12, %v1596_v37  ;;  %v1680_v28 = vadd.s32 1, %v3491_v51 }
 0x19f   : > { %v1482_v35 = vxor.u32 2147483648, %v1481_v6  ;;  %v1581_v26 = vsel %vm1580_vm12, 1, %v3657_v47  ;;  %v1573_v1 = vshrl.u32 %v1569_v40, 16  ;;  %v1603_v42 = vsel %vm1602_vm13, 1, %v3657_v47 }
 0x1a0   : > { %v1583_v63 = vadd.s32 %v1581_v26, %v1579_v29  ;;  %v1595_v62 = vshrl.u32 %v1591_v13, 16  ;;  %v1605_v41 = vadd.s32 %v1603_v42, %v1601_v14  ;;  %vm1681_vm14 = vcmp.gt.s32.totalorder %v1680_v28, 0 }
 0x1a1   : > { %v1483_v18 = vsel %vm1362_vm3, %v1482_v35, %v1481_v6  ;;  %v1575_v10 = vshrl.u32 %v1570_v57, 16  ;;  %v1682_v21 = vsel %vm1681_vm14, %v1680_v28, 0  ;;  %v1597_v53 = vshrl.u32 %v1592_v24, 16 }
 0x1a2   : > { %v1486_v22 = vsel %vm4548_vm4, %v4298_v44, %v1483_v18  ;;  %v1584_v31 = vadd.s32 %v1583_v63, %v1573_v1  ;;  %v1606_v5 = vadd.s32 %v1605_v41, %v1595_v62  ;;  %v1677_v25 = vand.u32 8388607, %v1670_v3 }
 0x1a3   : > { %v1488_v55 = vmul.f32 %v1486_v22, %v1486_v22  ;;  %v1684_v40 = vand.u32 31, %v1682_v21  ;;  %v4617_v34 = vadd.s32 %v1600_v12, %v1596_v37  ;;  %v4619_v27 = vand.u32 3, %v1504_v56 }
 0x1a4   : > { %v4615_v54 = vadd.s32 %v1584_v31, %v1575_v10  ;;  %v1607_v13 = vadd.s32 %v1606_v5, %v1597_v53  ;;  %v1608_v48 = vmul.u32 %v4503_v61, %v1554_v52  ;;  %v1678_v2 = vor.u32 8388608, %v1677_v25 }
 0x1a5   : > { %v1489_v11 = vmul.f32 -0.001358992, %v1488_v55  ;;  %v1496_v0 = vmul.f32 -0.00019511016, %v1488_v55  ;;  %v1685_v33 = vsub.s32 32, %v1684_v40  ;;  %v4624_v6 = vshrl.u32 %v1682_v21, 5 }
 0x1a6   : > { %vm1610_vm15 = vc.u32 %v4615_v54, %v4617_v34  ;;  %v1611_v24 = vadd.s32 1, %v1607_v13  ;;  %v1687_v20 = vshll.u32 %v3651_v23, %v1684_v40  ;;  %v1690_v51 = vshll.u32 %v3652_v36, %v1684_v40 }
 0x1a7   : > { %v1490_v45 = vadd.f32 0.041655596, %v1489_v11  ;;  %v1497_v57 = vadd.f32 0.008332121, %v1496_v0  ;;  %v1688_v32 = vshrl.u32 %v3652_v36, %v1685_v33  ;;  %v1691_v12 = vshrl.u32 %v3653_v46, %v1685_v33 }
 0x1a8   : > { %v1612_v14 = vsel %vm1610_vm15, %v1611_v24, %v1607_v13  ;;  %v1693_v61 = vshll.u32 %v3653_v46, %v1684_v40  ;;  %v1694_v35 = vshrl.u32 %v3654_v16, %v1685_v33  ;;  %v1696_v28 = vshll.u32 %v3654_v16, %v1684_v40 }
 0x1a9   : > { %v1491_v7 = vmul.f32 %v1490_v45, %v1488_v55  ;;  %v1498_v37 = vmul.f32 %v1497_v57, %v1488_v55  ;;  %v1613_v52 = vadd.s32 %v1612_v14, %v1608_v48  ;;  %v1689_v26 = vor.u32 %v1688_v32, %v1687_v20 }
 0x1aa   : > { %v1697_v18 = vshrl.u32 %v3655_v58, %v1685_v33  ;;  %v1699_v1 = vshll.u32 %v3655_v58, %v1684_v40  ;;  %v1700_v63 = vshrl.u32 %v3656_v39, %v1685_v33  ;;  %v1692_v10 = vor.u32 %v1691_v12, %v1690_v51 }
 0x1ab   : > { %v1492_v56 = vadd.f32 -0.4999988, %v1491_v7  ;;  %v1499_v29 = vadd.f32 -0.16666654, %v1498_v37  ;;  %v1614_v41 = vadd.s32 536870912, %v1613_v52  ;;  %vm1503_vm0 = vweird.f32 %v4298_v44  ;;  %v660_v44 = vpop.f32.mrf.mxu3 }
 0x1ac   : > { %vm1506_vm1 = vcmp.lt.s32.totalorder %v4619_v27, 2  ;;  %v1695_v31 = vor.u32 %v1694_v35, %v1693_v61  ;;  %v1698_v21 = vor.u32 %v1697_v18, %v1696_v28  ;;  %v1701_v53 = vor.u32 %v1700_v63, %v1699_v1 }
 0x1ad   : > { %v1493_v42 = vmul.f32 %v1492_v56, %v1488_v55  ;;  %v1500_v62 = vmul.f32 %v1499_v29, %v1488_v55  ;;  %v4638_v11 = vshrl.u32 %v1614_v41, 30  ;;  %vm1705_vm2 = vcmp.lt.s32.totalorder %v4624_v6, 4 }
 0x1ae   : > { %vm1702_vm3 = vcmp.lt.s32.totalorder %v4624_v6, 1  ;;  %vm1704_vm4 = vcmp.lt.s32.totalorder %v4624_v6, 3  ;;  %v1711_v55 = vsel %vm1705_vm2, %v1698_v21, 920167782  ;;  %v4645_v40 = vshll.u32 %v1678_v2, 8 }
 0x1af   : > { %v1494_v5 = vadd.f32 1.0, %v1493_v42  ;;  %v1501_v25 = vadd.f32 1.0, %v1500_v62  ;;  %v1616_v45 = vshll.u32 %v4638_v11, 30  ;;  %v1710_v57 = vsel %vm1702_vm3, %v1689_v26, %v1692_v10 }
 0x1b0   : > { %vm1507_vm5 = vcmp.eq.s32.totalorder %v4619_v27, 0  ;;  %vm1510_vm6 = vcmp.eq.s32.totalorder %v4619_v27, 2  ;;  %v1712_v48 = vsel %vm1704_vm4, %v1695_v31, %v1711_v55  ;;  %v1715_v24 = vsel %vm1705_vm2, %v1701_v53, 1326507024 }
 0x1b1   : > { %v1502_v0 = vmul.f32 %v1501_v25, %v1486_v22  ;;  %v1511_v13 = vxor.u32 2147483648, %v1494_v5  ;;  %v4656_v2 = vsub.s32 %v1613_v52, %v1616_v45  ;;  %vm1703_vm7 = vcmp.lt.s32.totalorder %v4624_v6, 2  ;;  %v552_v52 = vpop.f32.mrf.mxu2 }
 0x1b2   : > { %v1714_v22 = vsel %vm1702_vm3, %v1692_v10, %v1695_v31  ;;  %v1686_v7 = vshrl.u32 %v3651_v23, %v1685_v33  ;;  %v1713_v37 = vsel %vm1703_vm7, %v1710_v57, %v1712_v48  ;;  %v1716_v20 = vsel %vm1704_vm4, %v1698_v21, %v1715_v24 }
 0x1b3   : > { %v1508_v32 = vxor.u32 2147483648, %v1502_v0  ;;  %v1719_v12 = vand.u32 65535, %v4645_v40  ;;  %v1512_v51 = vsel %vm1510_vm6, %v1511_v13, %v1502_v0  ;;  %vm1618_vm8 = vcmp.lt.s32.totalorder %v4656_v2, 0 }
 0x1b4   : > { %v1619_v61 = vsub.s32 0, %v4656_v2  ;;  %v1707_v33 = vsel %vm1705_vm2, %v1695_v31, 2102212464  ;;  %v1717_v56 = vsel %vm1703_vm7, %v1714_v22, %v1716_v20  ;;  %v1744_v29 = vshrl.u32 %v1713_v37, 16 }
 0x1b5   : > { %v1509_v14 = vsel %vm1507_vm5, %v1494_v5, %v1508_v32  ;;  %v1721_v1 = vand.u32 65535, %v1717_v56  ;;  %v1743_v63 = vand.u32 65535, %v1713_v37  ;;  %v1720_v27 = vshrl.u32 %v4645_v40, 16 }
 0x1b6   : > { %v1513_v35 = vsel %vm1506_vm1, %v1509_v14, %v1512_v51  ;;  %v1620_v18 = vsel %vm1618_vm8, %v1619_v61, %v4656_v2  ;;  %v1722_v62 = vshrl.u32 %v1717_v56, 16  ;;  %v1746_v41 = vmul.u32 %v1744_v29, %v1719_v12  ;;  %v856_v51 = vpop.f32.mrf.mxu1 }
 0x1b7   : > { %v1514_v28 = vsel %vm1503_vm0, nan, %v1513_v35  ;;  %v1621_v42 = vclz %v1620_v18  ;;  %v1609_v31 = vadd.s32 %v4617_v34, %v4615_v54  ;;  %v1706_v21 = vsel %vm1702_vm3, %v1686_v7, %v1689_v26  ;;  %v771_v54 = vpop.f32.mrf.mxu0 }
 0x1b8   : > { %3378 = vst [vmem:[%s4352_s20 + $0x18] sm:$0xff] %v1514_v28  ;;  %v553_v53 = vadd.f32 %v552_v52, %v4064_v43  ;;  %v1639_v25 = vsub.s32 4, %v4638_v11  ;;  %v1724_v55 = vmul.u32 %v1722_v62, %v1719_v12  ;;  %v1725_v0 = vmul.u32 %v1721_v1, %v1720_v27 }
 0x1b9   : > { %v3489_v5 = vadd.s32 4294967294, %v1621_v42  ;;  %vm1517_vm9 = vcmp.lt.s32.totalorder %v4474_v9, 0  ;;  %v1708_v13 = vsel %vm1704_vm4, %v1692_v10, %v1707_v33  ;;  %v1745_v45 = vmul.u32 %v1743_v63, %v1719_v12  ;;  %v557_v18 = vpop.f32.mrf.mxu2 }
 0x1ba   : > { %v1747_v57 = vmul.u32 %v1743_v63, %v1720_v27  ;;  %v1749_v48 = vshll.u32 %v1746_v41, 16  ;;  %v1723_v34 = vmul.u32 %v1721_v1, %v1719_v12  ;;  %v1726_v26 = vmul.u32 %v1722_v62, %v1720_v27 }
 0x1bb   : > { %vm3490_vm10 = vcmp.lt.s32.totalorder %v3489_v5, 0  ;;  %v1727_v24 = vshll.u32 %v1724_v55, 16  ;;  %v1729_v32 = vshll.u32 %v1725_v0, 16  ;;  %v1748_v22 = vmul.u32 %v1744_v29, %v1720_v27 }
 0x1bc   : > { %v1624_v43 = vsel %vm3490_vm10, 0, %v3489_v5  ;;  %v1751_v7 = vshll.u32 %v1747_v57, 16  ;;  %vm1753_vm12 = vc.u32 %v1745_v45, %v1749_v48  ;;  %v1755_v35 = vadd.s32 %v1749_v48, %v1745_v45 }
 0x1bd   : > { %v1625_v37 = vsub.s32 32, %v1624_v43  ;;  %v1626_v20 = vshll.u32 %v4656_v2, %v1624_v43  ;;  %v1629_v14 = vsub.s32 4294967266, %v1624_v43  ;;  %vm1731_vm11 = vc.u32 %v1723_v34, %v1727_v24 }
 0x1be   : > { %v1732_v10 = vsel %vm1731_vm11, 1, %v3657_v47  ;;  %v1733_v61 = vadd.s32 %v1727_v24, %v1723_v34  ;;  %v1754_v52 = vsel %vm1753_vm12, 1, %v3657_v47  ;;  %v1750_v28 = vshrl.u32 %v1746_v41, 16 }
 0x1bf   : > { %v1627_v33 = vshrl.u32 %v1609_v31, %v1625_v37  ;;  %v1630_v56 = vadd.s32 127, %v1629_v14  ;;  %v1734_v12 = vadd.s32 %v1732_v10, %v1726_v26  ;;  %v1756_v29 = vadd.s32 %v1754_v52, %v1748_v22  ;;  %v666_v31 = vpop.f32.mrf.mxu3  ;;  %v775_v37 = vpop.f32.mrf.mxu0 }
 0x1c0   : > { %vm1735_vm13 = vc.u32 %v1733_v61, %v1729_v32  ;;  %vm1757_vm14 = vc.u32 %v1755_v35, %v1751_v7  ;;  %v1728_v27 = vshrl.u32 %v1724_v55, 16  ;;  %v661_v45 = vadd.f32 %v660_v44, %v553_v53 }
 0x1c1   : > { %v1628_v1 = vor.u32 %v1627_v33, %v1626_v20  ;;  %v1631_v2 = vshll.u32 %v1630_v56, 23  ;;  %v1736_v63 = vsel %vm1735_vm13, 1, %v3657_v47  ;;  %v1758_v42 = vsel %vm1757_vm14, 1, %v3657_v47 }
 0x1c2   : > { %v1738_v62 = vadd.s32 %v1736_v63, %v1734_v12  ;;  %v1760_v5 = vadd.s32 %v1758_v42, %v1756_v29  ;;  %v1640_v34 = vsel %vm1517_vm9, %v1639_v25, %v4638_v11  ;;  %v1730_v41 = vshrl.u32 %v1725_v0, 16  ;;  %v860_v0 = vpop.f32.mrf.mxu1 }
 0x1c3   : > { %v1632_v48 = vor.u32 4788187, %v1631_v2  ;;  %v558_v26 = vadd.f32 %v557_v18, %v4075_v4  ;;  %v1752_v43 = vshrl.u32 %v1747_v57, 16  ;;  %v772_v22 = vadd.f32 %v771_v54, %v661_v45 }
 0x1c4   : > { %v1739_v24 = vadd.s32 %v1738_v62, %v1728_v27  ;;  %v1761_v32 = vadd.s32 %v1760_v5, %v1750_v28  ;;  %v1635_v14 = vcvt.s32.f32 %v1628_v1  ;;  %v1709_v55 = vsel %vm1703_vm7, %v1706_v21, %v1708_v13 }
 0x1c5   : > { %v1633_v20 = vand.u32 2147483647, %v1632_v48  ;;  %v667_v53 = vadd.f32 %v666_v31, %v558_v26  ;;  %v1759_v10 = vadd.s32 %v1755_v35, %v1751_v7  ;;  %v4700_v33 = vadd.f32 %v856_v51, %v772_v22 }
 0x1c6   : > { %v1740_v44 = vadd.s32 %v1739_v24, %v1730_v41  ;;  %v1762_v61 = vadd.s32 %v1761_v32, %v1752_v43  ;;  %vm1516_vm15 = vcmp.le.f32.partialorder %v1515_v15, 0.7853982  ;;  %v1763_v6 = vmul.u32 %v4645_v40, %v1709_v55 }
 0x1c7   : > { %v1636_v11 = vmul.f32 %v1635_v14, %v1633_v20  ;;  %v776_v25 = vadd.f32 %v775_v37, %v667_v53  ;;  %v1825_v57 = vand.u32 2147483647, %v4700_v33  ;;  %v1642_v56 = vsel %vm1516_vm15, 0, %v1640_v34 }
 0x1c8   : > { %vm1765_vm0 = vc.u32 %v1740_v44, %v1759_v10  ;;  %v1766_v4 = vadd.s32 1, %v1762_v61  ;;  %v1828_v21 = vand.u32 2139095040, %v4700_v33  ;;  %v1659_v52 = vadd.s32 3, %v1642_v56 }
 0x1c9   : > { %v1637_v54 = vxor.u32 2147483648, %v1636_v11  ;;  %v4707_v7 = vadd.f32 %v860_v0, %v776_v25  ;;  %v1832_v28 = vand.u32 8388607, %v1825_v57  ;;  %vm1672_vm1 = vcmp.lt.s32.totalorder %v4512_v38, 0 }
 0x1ca   : > { %v1767_v13 = vsel %vm1765_vm0, %v1766_v4, %v1762_v61  ;;  %v1829_v12 = vshrl.u32 %v1828_v21, 23  ;;  %v4715_v62 = vand.u32 3, %v1659_v52  ;;  %vm4726_vm4 = vcmp.le.f32.partialorder %v1670_v3, 0.7853982 }
 0x1cb   : > { %v1638_v51 = vsel %vm1517_vm9, %v1637_v54, %v1636_v11  ;;  %v1768_v35 = vadd.s32 %v1767_v13, %v1763_v6  ;;  %v1983_v40 = vand.u32 2139095040, %v4707_v7  ;;  %v1833_v5 = vor.u32 8388608, %v1832_v28 }
 0x1cc   : > { %v1641_v15 = vsel %vm1516_vm15, %v4474_v9, %v1638_v51  ;;  %v3494_v1 = vadd.s32 4294967169, %v1829_v12  ;;  %v1980_v26 = vand.u32 2147483647, %v4707_v7  ;;  %vm1665_vm3 = vcmp.eq.s32.totalorder %v4715_v62, 2 }
 0x1cd   : > { %v1643_v29 = vmul.f32 %v1641_v15, %v1641_v15  ;;  %v1769_v18 = vadd.s32 536870912, %v1768_v35  ;;  %v1984_v45 = vshrl.u32 %v1983_v40, 23  ;;  %v4730_v55 = vshll.u32 %v1833_v5, 8 }
 0x1ce   : > { %v1835_v27 = vadd.s32 1, %v3494_v1  ;;  %vm1662_vm6 = vcmp.eq.s32.totalorder %v4715_v62, 0  ;;  %v1764_v25 = vadd.s32 %v1759_v10, %v1740_v44  ;;  %vm1661_vm7 = vcmp.lt.s32.totalorder %v4715_v62, 2 }
 0x1cf   : > { %v1644_v2 = vmul.f32 -0.001358992, %v1643_v29  ;;  %v1651_v63 = vmul.f32 -0.00019511016, %v1643_v29  ;;  %v1770_v42 = vshrl.u32 %v1769_v18, 30  ;;  %v3497_v24 = vadd.s32 4294967169, %v1984_v45 }
 0x1d0   : > { %vm1836_vm2 = vcmp.gt.s32.totalorder %v1835_v27, 0  ;;  %v4741_v21 = vand.u32 8388607, %v1980_v26  ;;  %vm1658_vm8 = vweird.f32 %v4474_v9  ;;  %v4745_v44 = vand.u32 65535, %v4730_v55 }
 0x1d1   : > { %v1645_v31 = vadd.f32 0.041655596, %v1644_v2  ;;  %v1652_v48 = vadd.f32 0.008332121, %v1651_v63  ;;  %v1771_v34 = vshll.u32 %v1770_v42, 30  ;;  %v1794_v41 = vsub.s32 4, %v1770_v42 }
 0x1d2   : > { %v1837_v14 = vsel %vm1836_vm2, %v1835_v27, 0  ;;  %v1990_v3 = vadd.s32 1, %v3497_v24  ;;  %v4748_v10 = vshrl.u32 %v4730_v55, 16 }
 0x1d3   : > { %v1646_v43 = vmul.f32 %v1645_v31, %v1643_v29  ;;  %v1653_v32 = vmul.f32 %v1652_v48, %v1643_v29  ;;  %v4719_v22 = vsub.s32 %v1768_v35, %v1771_v34  ;;  %v1795_v37 = vsel %vm1672_vm1, %v1794_v41, %v1770_v42 }
 0x1d4   : > { %v1797_v0 = vsel %vm4726_vm4, 0, %v1795_v37  ;;  %v1839_v4 = vand.u32 31, %v1837_v14  ;;  %v4750_v28 = vshrl.u32 %v1837_v14, 5  ;;  %vm1991_vm9 = vcmp.gt.s32.totalorder %v1990_v3, 0 }
 0x1d5   : > { %v1647_v53 = vadd.f32 -0.4999988, %v1646_v43  ;;  %v1654_v61 = vadd.f32 -0.16666654, %v1653_v32  ;;  %vm1773_vm5 = vcmp.lt.s32.totalorder %v4719_v22, 0  ;;  %v1774_v11 = vsub.s32 0, %v4719_v22 }
 0x1d6   : > { %v1840_v51 = vsub.s32 32, %v1839_v4  ;;  %v1814_v52 = vadd.s32 3, %v1797_v0  ;;  %v1842_v18 = vshll.u32 %v3651_v23, %v1839_v4  ;;  %v1845_v1 = vshll.u32 %v3652_v36, %v1839_v4 }
 0x1d7   : > { %v1648_v54 = vmul.f32 %v1647_v53, %v1643_v29  ;;  %v1655_v56 = vmul.f32 %v1654_v61, %v1643_v29  ;;  %v1775_v6 = vsel %vm1773_vm5, %v1774_v11, %v4719_v22  ;;  %v1848_v42 = vshll.u32 %v3653_v46, %v1839_v4 }
 0x1d8   : > { %v1776_v13 = vclz %v1775_v6  ;;  %v1843_v63 = vshrl.u32 %v3652_v36, %v1840_v51  ;;  %v1846_v27 = vshrl.u32 %v3653_v46, %v1840_v51  ;;  %v1849_v5 = vshrl.u32 %v3654_v16, %v1840_v51 }
 0x1d9   : > { %v1649_v35 = vadd.f32 1.0, %v1648_v54  ;;  %v1656_v12 = vadd.f32 1.0, %v1655_v56  ;;  %v1851_v45 = vshll.u32 %v3654_v16, %v1839_v4  ;;  %v1852_v53 = vshrl.u32 %v3655_v58, %v1840_v51 }
 0x1da   : > { %v3492_v29 = vadd.s32 4294967294, %v1776_v13  ;;  %v1844_v41 = vor.u32 %v1843_v63, %v1842_v18  ;;  %v1847_v32 = vor.u32 %v1846_v27, %v1845_v1  ;;  %v1850_v14 = vor.u32 %v1849_v5, %v1848_v42 }
 0x1db   : > { %v1657_v40 = vmul.f32 %v1656_v12, %v1641_v15  ;;  %v1666_v2 = vxor.u32 2147483648, %v1649_v35  ;;  %v1854_v61 = vshll.u32 %v3655_v58, %v1839_v4  ;;  %v1855_v56 = vshrl.u32 %v3656_v39, %v1840_v51 }
 0x1dc   : > { %vm3493_vm10 = vcmp.lt.s32.totalorder %v3492_v29, 0  ;;  %v1841_v6 = vshrl.u32 %v3651_v23, %v1840_v51  ;;  %v1853_v13 = vor.u32 %v1852_v53, %v1851_v45  ;;  %vm1857_vm11 = vcmp.lt.s32.totalorder %v4750_v28, 1 }
 0x1dd   : > { %v1663_v31 = vxor.u32 2147483648, %v1657_v40  ;;  %v1667_v48 = vsel %vm1665_vm3, %v1666_v2, %v1657_v40  ;;  %v1779_v34 = vsel %vm3493_vm10, 0, %v3492_v29  ;;  %v1856_v18 = vor.u32 %v1855_v56, %v1854_v61 }
 0x1de   : > { %v1780_v24 = vsub.s32 32, %v1779_v34  ;;  %v1781_v15 = vshll.u32 %v4719_v22, %v1779_v34  ;;  %v1784_v43 = vsub.s32 4294967266, %v1779_v34  ;;  %vm1858_vm12 = vcmp.lt.s32.totalorder %v4750_v28, 2 }
 0x1df   : > { %v1664_v37 = vsel %vm1662_vm6, %v1649_v35, %v1663_v31  ;;  %v1992_v35 = vsel %vm1991_vm9, %v1990_v3, 0  ;;  %vm1859_vm13 = vcmp.lt.s32.totalorder %v4750_v28, 3  ;;  %vm1860_vm14 = vcmp.lt.s32.totalorder %v4750_v28, 4 }
 0x1e0   : > { %v1668_v11 = vsel %vm1661_vm7, %v1664_v37, %v1667_v48  ;;  %v1782_v0 = vshrl.u32 %v1764_v25, %v1780_v24  ;;  %v1785_v54 = vadd.s32 127, %v1784_v43  ;;  %v1865_v62 = vsel %vm1857_vm11, %v1844_v41, %v1847_v32 }
 0x1e1   : > { %v1669_v22 = vsel %vm1658_vm8, nan, %v1668_v11  ;;  %v1862_v25 = vsel %vm1860_vm14, %v1850_v14, 2102212464  ;;  %v1866_v4 = vsel %vm1860_vm14, %v1853_v13, 920167782  ;;  %v1869_v51 = vsel %vm1857_vm11, %v1847_v32, %v1850_v14 }
 0x1e2   : > { %3379 = vst [vmem:[%s4352_s20 + $0x20] sm:$0xff] %v1669_v22  ;;  %v1783_v12 = vor.u32 %v1782_v0, %v1781_v15  ;;  %v1786_v29 = vshll.u32 %v1785_v54, 23  ;;  %v1861_v40 = vsel %vm1857_vm11, %v1841_v6, %v1844_v41  ;;  %v1867_v3 = vsel %vm1859_vm13, %v1850_v14, %v1866_v4 }
 0x1e3   : > { %v1870_v2 = vsel %vm1860_vm14, %v1856_v18, 1326507024  ;;  %v1863_v42 = vsel %vm1859_vm13, %v1847_v32, %v1862_v25  ;;  %v1868_v27 = vsel %vm1858_vm12, %v1865_v62, %v1867_v3  ;;  %v1988_v34 = vor.u32 8388608, %v4741_v21 }
 0x1e4   : > { %v1787_v9 = vor.u32 4788187, %v1786_v29  ;;  %v1790_v1 = vcvt.s32.f32 %v1783_v12  ;;  %v1871_v5 = vsel %vm1859_vm13, %v1853_v13, %v1870_v2  ;;  %v1898_v31 = vand.u32 65535, %v1868_v27 }
 0x1e5   : > { %v1872_v45 = vsel %vm1858_vm12, %v1869_v51, %v1871_v5  ;;  %v1899_v48 = vshrl.u32 %v1868_v27, 16  ;;  %v4783_v15 = vand.u32 3, %v1814_v52  ;;  %v4787_v37 = vsel %vm1858_vm12, %v1861_v40, %v1863_v42 }
 0x1e6   : > { %v1788_v63 = vand.u32 2147483647, %v1787_v9  ;;  %v1876_v43 = vand.u32 65535, %v1872_v45  ;;  %v1877_v41 = vshrl.u32 %v1872_v45, 16  ;;  %v1902_v14 = vmul.u32 %v1898_v31, %v4748_v10 }
 0x1e7   : > { %v1901_v32 = vmul.u32 %v1899_v48, %v4745_v44  ;;  %v4791_v53 = vshrl.u32 %v1992_v35, 5  ;;  %v1994_v54 = vand.u32 31, %v1992_v35  ;;  %v1900_v56 = vmul.u32 %v1898_v31, %v4745_v44 }
 0x1e8   : > { %v1791_v24 = vmul.f32 %v1790_v1, %v1788_v63  ;;  %v1879_v11 = vmul.u32 %v1877_v41, %v4745_v44  ;;  %v1880_v0 = vmul.u32 %v1876_v43, %v4748_v10  ;;  %v1878_v52 = vmul.u32 %v1876_v43, %v4745_v44 }
 0x1e9   : > { %v1903_v28 = vmul.u32 %v1899_v48, %v4748_v10  ;;  %v1904_v22 = vshll.u32 %v1901_v32, 16  ;;  %v1881_v13 = vmul.u32 %v1877_v41, %v4748_v10  ;;  %v1905_v29 = vshrl.u32 %v1901_v32, 16 }
 0x1ea   : > { %v1792_v61 = vxor.u32 2147483648, %v1791_v24  ;;  %v1882_v12 = vshll.u32 %v1879_v11, 16  ;;  %v1884_v62 = vshll.u32 %v1880_v0, 16  ;;  %v1906_v35 = vshll.u32 %v1902_v14, 16 }
 0x1eb   : > { %vm1908_vm15 = vc.u32 %v1900_v56, %v1904_v22  ;;  %v1910_v51 = vadd.s32 %v1904_v22, %v1900_v56  ;;  %v4806_v40 = vsub.s32 32, %v1994_v54  ;;  %v1883_v20 = vshrl.u32 %v1879_v11, 16 }
 0x1ec   : > { %v1793_v6 = vsel %vm1672_vm1, %v1792_v61, %v1791_v24  ;;  %vm1886_vm0 = vc.u32 %v1878_v52, %v1882_v12  ;;  %v1888_v44 = vadd.s32 %v1882_v12, %v1878_v52  ;;  %v1909_v25 = vsel %vm1908_vm15, 1, %v3657_v47 }
 0x1ed   : > { %v1796_v18 = vsel %vm4726_vm4, %v4512_v38, %v1793_v6  ;;  %v1887_v4 = vsel %vm1886_vm0, 1, %v3657_v47  ;;  %v1911_v1 = vadd.s32 %v1909_v25, %v1903_v28  ;;  %v1885_v63 = vshrl.u32 %v1880_v0, 16 }
 0x1ee   : > { %v1798_v9 = vmul.f32 %v1796_v18, %v1796_v18  ;;  %v1889_v2 = vadd.s32 %v1887_v4, %v1881_v13  ;;  %vm1890_vm1 = vc.u32 %v1888_v44, %v1884_v62  ;;  %vm1912_vm2 = vc.u32 %v1910_v51, %v1906_v35 }
 0x1ef   : > { %v1891_v42 = vsel %vm1890_vm1, 1, %v3657_v47  ;;  %v1913_v31 = vsel %vm1912_vm2, 1, %v3657_v47  ;;  %v1907_v48 = vshrl.u32 %v1902_v14, 16  ;;  %v1997_v43 = vshll.u32 %v3651_v23, %v1994_v54 }
 0x1f0   : > { %v1799_v10 = vmul.f32 -0.001358992, %v1798_v9  ;;  %v1806_v3 = vmul.f32 -0.00019511016, %v1798_v9  ;;  %v1893_v45 = vadd.s32 %v1891_v42, %v1889_v2  ;;  %v1915_v24 = vadd.s32 %v1913_v31, %v1911_v1 }
 0x1f1   : > { %v1998_v41 = vshrl.u32 %v3652_v36, %v4806_v40  ;;  %v2001_v11 = vshrl.u32 %v3653_v46, %v4806_v40  ;;  %v4815_v0 = vadd.s32 %v1910_v51, %v1906_v35  ;;  %v2000_v22 = vshll.u32 %v3652_v36, %v1994_v54 }
 0x1f2   : > { %v1800_v27 = vadd.f32 0.041655596, %v1799_v10  ;;  %v1807_v5 = vadd.f32 0.008332121, %v1806_v3  ;;  %v1894_v52 = vadd.s32 %v1893_v45, %v1883_v20  ;;  %v1916_v56 = vadd.s32 %v1915_v24, %v1905_v29 }
 0x1f3   : > { %v4817_v28 = vor.u32 %v1998_v41, %v1997_v43  ;;  %v2004_v12 = vshrl.u32 %v3654_v16, %v4806_v40  ;;  %v2003_v44 = vshll.u32 %v3653_v46, %v1994_v54  ;;  %v2006_v25 = vshll.u32 %v3654_v16, %v1994_v54 }
 0x1f4   : > { %v1801_v32 = vmul.f32 %v1800_v27, %v1798_v9  ;;  %v1808_v61 = vmul.f32 %v1807_v5, %v1798_v9  ;;  %v4820_v13 = vadd.s32 %v1894_v52, %v1885_v63  ;;  %v1917_v62 = vadd.s32 %v1916_v56, %v1907_v48 }
 0x1f5   : > { %v2007_v35 = vshrl.u32 %v3655_v58, %v4806_v40  ;;  %vm1816_vm3 = vcmp.lt.s32.totalorder %v4783_v15, 2  ;;  %v4831_v51 = vor.u32 %v2001_v11, %v2000_v22  ;;  %v2009_v3 = vshll.u32 %v3655_v58, %v1994_v54 }
 0x1f6   : > { %v1802_v14 = vadd.f32 -0.4999988, %v1801_v32  ;;  %v1809_v6 = vadd.f32 -0.16666654, %v1808_v61  ;;  %vm1920_vm4 = vc.u32 %v4820_v13, %v4815_v0  ;;  %v1921_v1 = vadd.s32 1, %v1917_v62 }
 0x1f7   : > { %v2008_v10 = vor.u32 %v2007_v35, %v2006_v25  ;;  %v2010_v2 = vshrl.u32 %v3656_v39, %v4806_v40  ;;  %v1918_v42 = vmul.u32 %v4730_v55, %v4787_v37  ;;  %vm1817_vm5 = vcmp.eq.s32.totalorder %v4783_v15, 0 }
 0x1f8   : > { %v1803_v29 = vmul.f32 %v1802_v14, %v1798_v9  ;;  %v1810_v4 = vmul.f32 %v1809_v6, %v1798_v9  ;;  %v4838_v9 = vor.u32 %v2004_v12, %v2003_v44  ;;  %v1922_v27 = vsel %vm1920_vm4, %v1921_v1, %v1917_v62  ;;  %v672_v1 = vpop.f32.mrf.mxu3 }
 0x1f9   : > { %v2011_v5 = vor.u32 %v2010_v2, %v2009_v3  ;;  %vm2012_vm6 = vcmp.lt.s32.totalorder %v4791_v53, 1  ;;  %v1923_v48 = vadd.s32 %v1922_v27, %v1918_v42  ;;  %vm2015_vm7 = vcmp.lt.s32.totalorder %v4791_v53, 4  ;;  %v779_v27 = vpop.f32.mrf.mxu0 }
 0x1fa   : > { %v1804_v20 = vadd.f32 1.0, %v1803_v29  ;;  %v1811_v63 = vadd.f32 1.0, %v1810_v4  ;;  %vm1820_vm8 = vcmp.eq.s32.totalorder %v4783_v15, 2  ;;  %vm2013_vm9 = vcmp.lt.s32.totalorder %v4791_v53, 2  ;;  %v562_v29 = vpop.f32.mrf.mxu2 }
 0x1fb   : > { %v2020_v55 = vsel %vm2012_vm6, %v4817_v28, %v4831_v51  ;;  %v2021_v37 = vsel %vm2015_vm7, %v2008_v10, 920167782  ;;  %v1924_v24 = vadd.s32 536870912, %v1923_v48  ;;  %vm2014_vm10 = vcmp.lt.s32.totalorder %v4791_v53, 3 }
 0x1fc   : > { %v1812_v45 = vmul.f32 %v1811_v63, %v1796_v18  ;;  %v1821_v31 = vxor.u32 2147483648, %v1804_v20  ;;  %v2024_v18 = vsel %vm2012_vm6, %v4831_v51, %v4838_v9  ;;  %v2022_v41 = vsel %vm2014_vm10, %v4838_v9, %v2021_v37 }
 0x1fd   : > { %v2025_v32 = vsel %vm2015_vm7, %v2011_v5, 1326507024  ;;  %v4863_v61 = vshll.u32 %v1988_v34, 8  ;;  %v4867_v11 = vshrl.u32 %v1924_v24, 30  ;;  %v2023_v56 = vsel %vm2013_vm9, %v2020_v55, %v2022_v41  ;;  %v864_v41 = vpop.f32.mrf.mxu1 }
 0x1fe   : > { %v1818_v54 = vxor.u32 2147483648, %v1812_v45  ;;  %v1822_v43 = vsel %vm1820_vm8, %v1821_v31, %v1812_v45  ;;  %v2026_v22 = vsel %vm2014_vm10, %v2008_v10, %v2025_v32  ;;  %vm1813_vm11 = vweird.f32 %v4512_v38 }
 0x1ff   : > { %v2027_v21 = vsel %vm2013_vm9, %v2024_v18, %v2026_v22  ;;  %v1926_v6 = vshll.u32 %v4867_v11, 30  ;;  %v2030_v12 = vshrl.u32 %v4863_v61, 16  ;;  %v2029_v44 = vand.u32 65535, %v4863_v61 }
 0x200   : > { %v1819_v52 = vsel %vm1817_vm5, %v1804_v20, %v1818_v54  ;;  %v2031_v62 = vand.u32 65535, %v2027_v21  ;;  %v2032_v25 = vshrl.u32 %v2027_v21, 16  ;;  %v2054_v35 = vshrl.u32 %v2023_v56, 16 }
 0x201   : > { %v1823_v14 = vsel %vm1816_vm3, %v1819_v52, %v1822_v43  ;;  %v1927_v4 = vsub.s32 %v1923_v48, %v1926_v6  ;;  %v2053_v3 = vand.u32 65535, %v2023_v56  ;;  %v1996_v2 = vshrl.u32 %v3651_v23, %v4806_v40 }
 0x202   : > { %v1824_v34 = vsel %vm1813_vm11, nan, %v1823_v14  ;;  %v4882_v38 = vmul.u32 %v2031_v62, %v2030_v12  ;;  %v2034_v15 = vmul.u32 %v2032_v25, %v2029_v44  ;;  %v2033_v20 = vmul.u32 %v2031_v62, %v2029_v44 }
 0x203   : > { %3380 = vst [vmem:[%s4352_s20 + $0x28] sm:$0xff] %v1824_v34  ;;  %vm1928_vm12 = vcmp.lt.s32.totalorder %v1927_v4, 0  ;;  %v1929_v10 = vsub.s32 0, %v1927_v4  ;;  %v2056_v42 = vmul.u32 %v2054_v35, %v2029_v44  ;;  %v1919_v5 = vadd.s32 %v4815_v0, %v4820_v13  ;;  %v567_v34 = vpop.f32.mrf.mxu2 }
 0x204   : > { %v2037_v63 = vshll.u32 %v2034_v15, 16  ;;  %v2036_v31 = vmul.u32 %v2032_v25, %v2030_v12  ;;  %v2039_v48 = vshll.u32 %v4882_v38, 16  ;;  %v2016_v24 = vsel %vm2012_vm6, %v1996_v2, %v4817_v28 }
 0x205   : > { %v1930_v45 = vsel %vm1928_vm12, %v1929_v10, %v1927_v4  ;;  %v2059_v54 = vshll.u32 %v2056_v42, 16  ;;  %v2055_v18 = vmul.u32 %v2053_v3, %v2029_v44  ;;  %v2057_v43 = vmul.u32 %v2053_v3, %v2030_v12 }
 0x206   : > { %v1931_v55 = vclz %v1930_v45  ;;  %vm2041_vm13 = vc.u32 %v2033_v20, %v2037_v63  ;;  %v2043_v37 = vadd.s32 %v2037_v63, %v2033_v20  ;;  %v2017_v0 = vsel %vm2015_vm7, %v4838_v9, 2102212464 }
 0x207   : > { %v2042_v40 = vsel %vm2041_vm13, 1, %v3657_v47  ;;  %v2038_v52 = vshrl.u32 %v2034_v15, 16  ;;  %v2058_v22 = vmul.u32 %v2054_v35, %v2030_v12  ;;  %vm2063_vm15 = vc.u32 %v2055_v18, %v2059_v54  ;;  %v678_v12 = vpop.f32.mrf.mxu3 }
 0x208   : > { %v3495_v32 = vadd.s32 4294967294, %v1931_v55  ;;  %v2044_v13 = vadd.s32 %v2042_v40, %v2036_v31  ;;  %vm2045_vm14 = vc.u32 %v2043_v37, %v2039_v48  ;;  %v2064_v28 = vsel %vm2063_vm15, 1, %v3657_v47 }
 0x209   : > { %v2046_v56 = vsel %vm2045_vm14, 1, %v3657_v47  ;;  %v2065_v21 = vadd.s32 %v2059_v54, %v2055_v18  ;;  %v2061_v62 = vshll.u32 %v2057_v43, 16  ;;  %v2066_v44 = vadd.s32 %v2064_v28, %v2058_v22 }
 0x20a   : > { %vm3496_vm0 = vcmp.lt.s32.totalorder %v3495_v32, 0  ;;  %v2048_v14 = vadd.s32 %v2046_v56, %v2044_v13  ;;  %v563_v25 = vadd.f32 %v562_v29, %v4002_v60  ;;  %v2018_v15 = vsel %vm2014_vm10, %v4831_v51, %v2017_v0  ;;  %v783_v60 = vpop.f32.mrf.mxu0 }
 0x20b   : > { %v1934_v6 = vsel %vm3496_vm0, 0, %v3495_v32  ;;  %v2040_v35 = vshrl.u32 %v4882_v38, 16  ;;  %vm2067_vm1 = vc.u32 %v2065_v21, %v2061_v62  ;;  %v568_v20 = vadd.f32 %v567_v34, %v4013_v17 }
 0x20c   : > { %v1935_v10 = vsub.s32 32, %v1934_v6  ;;  %v1939_v9 = vsub.s32 4294967266, %v1934_v6  ;;  %v2049_v3 = vadd.s32 %v2048_v14, %v2038_v52  ;;  %v673_v2 = vadd.f32 %v672_v1, %v563_v25 }
 0x20d   : > { %v1936_v63 = vshll.u32 %v1927_v4, %v1934_v6  ;;  %v2068_v48 = vsel %vm2067_vm1, 1, %v3657_v47  ;;  %v2060_v29 = vshrl.u32 %v2056_v42, 16  ;;  %v679_v54 = vadd.f32 %v678_v12, %v568_v20  ;;  %v868_v4 = vpop.f32.mrf.mxu1 }
 0x20e   : > { %v1937_v45 = vshrl.u32 %v1919_v5, %v1935_v10  ;;  %v1940_v31 = vadd.s32 127, %v1939_v9  ;;  %v2070_v55 = vadd.s32 %v2068_v48, %v2066_v44  ;;  %v780_v37 = vadd.f32 %v779_v27, %v673_v2 }
 0x20f   : > { %v1949_v18 = vsub.s32 4, %v4867_v11  ;;  %v2050_v32 = vadd.s32 %v2049_v3, %v2040_v35  ;;  %v2062_v38 = vshrl.u32 %v2057_v43, 16  ;;  %v784_v17 = vadd.f32 %v783_v60, %v679_v54 }
 0x210   : > { %v1938_v40 = vor.u32 %v1937_v45, %v1936_v63  ;;  %v1941_v51 = vshll.u32 %v1940_v31, 23  ;;  %v2071_v0 = vadd.s32 %v2070_v55, %v2060_v29  ;;  %v4906_v1 = vadd.f32 %v864_v41, %v780_v37 }
 0x211   : > { %vm1827_vm2 = vcmp.lt.s32.totalorder %v4700_v33, 0  ;;  %v2069_v13 = vadd.s32 %v2065_v21, %v2061_v62  ;;  %v2019_v42 = vsel %vm2013_vm9, %v2016_v24, %v2018_v15  ;;  %v4913_v43 = vadd.f32 %v868_v4, %v784_v17 }
 0x212   : > { %v1942_v5 = vor.u32 4788187, %v1941_v51  ;;  %v2072_v27 = vadd.s32 %v2071_v0, %v2062_v38  ;;  %v2135_v52 = vand.u32 2147483647, %v4906_v1  ;;  %v2138_v56 = vand.u32 2139095040, %v4906_v1 }
 0x213   : > { %v1945_v14 = vcvt.s32.f32 %v1938_v40  ;;  %vm2075_vm3 = vc.u32 %v2050_v32, %v2069_v13  ;;  %v1950_v41 = vsel %vm1827_vm2, %v1949_v18, %v4867_v11  ;;  %v2073_v21 = vmul.u32 %v4863_v61, %v2019_v42 }
 0x214   : > { %v1943_v22 = vand.u32 2147483647, %v1942_v5  ;;  %v2076_v28 = vadd.s32 1, %v2072_v27  ;;  %v2139_v34 = vshrl.u32 %v2138_v56, 23  ;;  %v2142_v53 = vand.u32 8388607, %v2135_v52 }
 0x215   : > { %vm1826_vm4 = vcmp.le.f32.partialorder %v1825_v57, 0.7853982  ;;  %v2293_v9 = vand.u32 2139095040, %v4913_v43  ;;  %v2290_v3 = vand.u32 2147483647, %v4913_v43  ;;  %vm1982_vm7 = vcmp.lt.s32.totalorder %v4707_v7, 0 }
 0x216   : > { %v1946_v24 = vmul.f32 %v1945_v14, %v1943_v22  ;;  %v2077_v6 = vsel %vm2075_vm3, %v2076_v28, %v2072_v27  ;;  %v3500_v62 = vadd.s32 4294967169, %v2139_v34  ;;  %v1952_v25 = vsel %vm1826_vm4, 0, %v1950_v41 }
 0x217   : > { %v2078_v10 = vadd.s32 %v2077_v6, %v2073_v21  ;;  %v2143_v15 = vor.u32 8388608, %v2142_v53  ;;  %v1969_v2 = vadd.s32 3, %v1952_v25  ;;  %v2294_v45 = vshrl.u32 %v2293_v9, 23 }
 0x218   : > { %v1947_v44 = vxor.u32 2147483648, %v1946_v24  ;;  %v2145_v11 = vadd.s32 1, %v3500_v62  ;;  %vm4934_vm6 = vcmp.le.f32.partialorder %v1980_v26, 0.7853982  ;;  %v4942_v29 = vand.u32 8388607, %v2290_v3 }
 0x219   : > { %v2079_v35 = vadd.s32 536870912, %v2078_v10  ;;  %v4938_v60 = vshll.u32 %v2143_v15, 8  ;;  %v4945_v40 = vand.u32 3, %v1969_v2  ;;  %v2074_v51 = vadd.s32 %v2069_v13, %v2050_v32 }
 0x21a   : > { %v1948_v12 = vsel %vm1827_vm2, %v1947_v44, %v1946_v24  ;;  %vm2146_vm5 = vcmp.gt.s32.totalorder %v2145_v11, 0  ;;  %v4949_v4 = vadd.s32 4294967169, %v2294_v45  ;;  %v2298_v56 = vor.u32 8388608, %v4942_v29 }
 0x21b   : > { %v4928_v61 = vsel %vm1826_vm4, %v4700_v33, %v1948_v12  ;;  %v2080_v20 = vshrl.u32 %v2079_v35, 30  ;;  %v2147_v63 = vsel %vm2146_vm5, %v2145_v11, 0  ;;  %v4954_v42 = vand.u32 65535, %v4938_v60 }
 0x21c   : > { %v1953_v57 = vmul.f32 %v4928_v61, %v4928_v61  ;;  %v2149_v48 = vand.u32 31, %v2147_v63  ;;  %v4951_v5 = vshrl.u32 %v2147_v63, 5  ;;  %v4957_v27 = vshrl.u32 %v4938_v60, 16 }
 0x21d   : > { %v2081_v54 = vshll.u32 %v2080_v20, 30  ;;  %v2104_v18 = vsub.s32 4, %v2080_v20  ;;  %vm1975_vm9 = vcmp.eq.s32.totalorder %v4945_v40, 2  ;;  %vm1972_vm10 = vcmp.eq.s32.totalorder %v4945_v40, 0 }
 0x21e   : > { %v1954_v55 = vmul.f32 -0.001358992, %v1953_v57  ;;  %v1961_v37 = vmul.f32 -0.00019511016, %v1953_v57  ;;  %v2150_v26 = vsub.s32 32, %v2149_v48  ;;  %v2152_v41 = vshll.u32 %v3651_v23, %v2149_v48 }
 0x21f   : > { %v4947_v17 = vsub.s32 %v2078_v10, %v2081_v54  ;;  %v4964_v14 = vsel %vm1982_vm7, %v2104_v18, %v2080_v20  ;;  %v2155_v34 = vshll.u32 %v3652_v36, %v2149_v48  ;;  %v2158_v44 = vshll.u32 %v3653_v46, %v2149_v48 }
 0x220   : > { %v1955_v38 = vadd.f32 0.041655596, %v1954_v55  ;;  %v1962_v0 = vadd.f32 0.008332121, %v1961_v37  ;;  %v2153_v28 = vshrl.u32 %v3652_v36, %v2150_v26  ;;  %v2156_v6 = vshrl.u32 %v3653_v46, %v2150_v26 }
 0x221   : > { %vm2083_vm8 = vcmp.lt.s32.totalorder %v4947_v17, 0  ;;  %v2084_v13 = vsub.s32 0, %v4947_v17  ;;  %v2159_v25 = vshrl.u32 %v3654_v16, %v2150_v26  ;;  %v2162_v10 = vshrl.u32 %v3655_v58, %v2150_v26 }
 0x222   : > { %v1956_v22 = vmul.f32 %v1955_v38, %v1953_v57  ;;  %v1963_v32 = vmul.f32 %v1962_v0, %v1953_v57  ;;  %vm1971_vm11 = vcmp.lt.s32.totalorder %v4945_v40, 2  ;;  %v2107_v11 = vsel %vm4934_vm6, 0, %v4964_v14 }
 0x223   : > { %v2085_v21 = vsel %vm2083_vm8, %v2084_v13, %v4947_v17  ;;  %v2165_v12 = vshrl.u32 %v3656_v39, %v2150_v26  ;;  %vm1968_vm12 = vweird.f32 %v4700_v33  ;;  %v2151_v2 = vshrl.u32 %v3651_v23, %v2150_v26 }
 0x224   : > { %v1957_v53 = vadd.f32 -0.4999988, %v1956_v22  ;;  %v1964_v24 = vadd.f32 -0.16666654, %v1963_v32  ;;  %v2086_v62 = vclz %v2085_v21  ;;  %v2161_v20 = vshll.u32 %v3654_v16, %v2149_v48 }
 0x225   : > { %v2164_v63 = vshll.u32 %v3655_v58, %v2149_v48  ;;  %v2157_v37 = vor.u32 %v2156_v6, %v2155_v34  ;;  %v2160_v54 = vor.u32 %v2159_v25, %v2158_v44  ;;  %vm2167_vm14 = vcmp.lt.s32.totalorder %v4951_v5, 1 }
 0x226   : > { %v1958_v9 = vmul.f32 %v1957_v53, %v1953_v57  ;;  %v1965_v15 = vmul.f32 %v1964_v24, %v1953_v57  ;;  %v3498_v35 = vadd.s32 4294967294, %v2086_v62  ;;  %v2154_v57 = vor.u32 %v2153_v28, %v2152_v41 }
 0x227   : > { %v2163_v18 = vor.u32 %v2162_v10, %v2161_v20  ;;  %v2166_v38 = vor.u32 %v2165_v12, %v2164_v63  ;;  %vm2168_vm15 = vcmp.lt.s32.totalorder %v4951_v5, 2  ;;  %vm2169_vm0 = vcmp.lt.s32.totalorder %v4951_v5, 3 }
 0x228   : > { %v1959_v45 = vadd.f32 1.0, %v1958_v9  ;;  %v1966_v55 = vadd.f32 1.0, %v1965_v15  ;;  %vm3499_vm13 = vcmp.lt.s32.totalorder %v3498_v35, 0  ;;  %vm2170_vm1 = vcmp.lt.s32.totalorder %v4951_v5, 4 }
 0x229   : > { %v2089_v32 = vsel %vm3499_vm13, 0, %v3498_v35  ;;  %v2175_v41 = vsel %vm2167_vm14, %v2154_v57, %v2157_v37  ;;  %v2176_v53 = vsel %vm2170_vm1, %v2163_v18, 920167782  ;;  %v2172_v21 = vsel %vm2170_vm1, %v2160_v54, 2102212464 }
 0x22a   : > { %v1967_v0 = vmul.f32 %v1966_v55, %v4928_v61  ;;  %v1976_v22 = vxor.u32 2147483648, %v1959_v45  ;;  %v2090_v13 = vsub.s32 32, %v2089_v32  ;;  %v2094_v26 = vsub.s32 4294967266, %v2089_v32 }
 0x22b   : > { %v2091_v14 = vshll.u32 %v4947_v17, %v2089_v32  ;;  %v2177_v6 = vsel %vm2169_vm0, %v2160_v54, %v2176_v53  ;;  %v2179_v17 = vsel %vm2167_vm14, %v2157_v37, %v2160_v54  ;;  %v2180_v9 = vsel %vm2170_vm1, %v2166_v38, 1326507024 }
 0x22c   : > { %v1973_v48 = vxor.u32 2147483648, %v1967_v0  ;;  %v1977_v61 = vsel %vm1975_vm9, %v1976_v22, %v1967_v0  ;;  %v2092_v28 = vshrl.u32 %v2074_v51, %v2090_v13  ;;  %v2095_v34 = vadd.s32 127, %v2094_v26 }
 0x22d   : > { %v2178_v51 = vsel %vm2168_vm15, %v2175_v41, %v2177_v6  ;;  %v2171_v20 = vsel %vm2167_vm14, %v2151_v2, %v2154_v57  ;;  %v2173_v40 = vsel %vm2169_vm0, %v2157_v37, %v2172_v21  ;;  %v2181_v63 = vsel %vm2169_vm0, %v2163_v18, %v2180_v9 }
 0x22e   : > { %v1974_v24 = vsel %vm1972_vm10, %v1959_v45, %v1973_v48  ;;  %v2093_v44 = vor.u32 %v2092_v28, %v2091_v14  ;;  %v2096_v25 = vshll.u32 %v2095_v34, 23  ;;  %v2208_v15 = vand.u32 65535, %v2178_v51 }
 0x22f   : > { %v1978_v62 = vsel %vm1971_vm11, %v1974_v24, %v1977_v61  ;;  %v2209_v12 = vshrl.u32 %v2178_v51, 16  ;;  %v2182_v45 = vsel %vm2168_vm15, %v2179_v17, %v2181_v63  ;;  %v2300_v54 = vadd.s32 1, %v4949_v4 }
 0x230   : > { %v1979_v10 = vsel %vm1968_vm12, nan, %v1978_v62  ;;  %v2097_v35 = vor.u32 4788187, %v2096_v25  ;;  %v2212_v55 = vmul.u32 %v2208_v15, %v4957_v27  ;;  %v2100_v0 = vcvt.s32.f32 %v2093_v44 }
 0x231   : > { %3381 = vst [vmem:[%s4352_s20 + $0x30] sm:$0xff] %v1979_v10  ;;  %v2211_v33 = vmul.u32 %v2209_v12, %v4954_v42  ;;  %v2186_v22 = vand.u32 65535, %v2182_v45  ;;  %v2187_v32 = vshrl.u32 %v2182_v45, 16  ;;  %v5019_v2 = vadd.s32 3, %v2107_v11 }
 0x232   : > { %v2098_v38 = vand.u32 2147483647, %v2097_v35  ;;  %v5023_v57 = vsel %vm2168_vm15, %v2171_v20, %v2173_v40  ;;  %v2210_v37 = vmul.u32 %v2208_v15, %v4954_v42  ;;  %v2213_v4 = vmul.u32 %v2209_v12, %v4957_v27 }
 0x233   : > { %v2214_v18 = vshll.u32 %v2211_v33, 16  ;;  %v2189_v26 = vmul.u32 %v2187_v32, %v4954_v42  ;;  %v2190_v48 = vmul.u32 %v2186_v22, %v4957_v27  ;;  %v2215_v14 = vshrl.u32 %v2211_v33, 16 }
 0x234   : > { %v2101_v13 = vmul.f32 %v2100_v0, %v2098_v38  ;;  %v2216_v41 = vshll.u32 %v2212_v55, 16  ;;  %v2188_v28 = vmul.u32 %v2186_v22, %v4954_v42  ;;  %vm2301_vm3 = vcmp.gt.s32.totalorder %v2300_v54, 0 }
 0x235   : > { %vm2218_vm2 = vc.u32 %v2210_v37, %v2214_v18  ;;  %v2220_v61 = vadd.s32 %v2214_v18, %v2210_v37  ;;  %v2192_v5 = vshll.u32 %v2189_v26, 16  ;;  %v2191_v34 = vmul.u32 %v2187_v32, %v4957_v27 }
 0x236   : > { %v2102_v11 = vxor.u32 2147483648, %v2101_v13  ;;  %v2194_v53 = vshll.u32 %v2190_v48, 16  ;;  %v2219_v24 = vsel %vm2218_vm2, 1, %v3657_v47  ;;  %v2302_v25 = vsel %vm2301_vm3, %v2300_v54, 0 }
 0x237   : > { %vm2222_vm4 = vc.u32 %v2220_v61, %v2216_v41  ;;  %vm2196_vm5 = vc.u32 %v2188_v28, %v2192_v5  ;;  %v2198_v6 = vadd.s32 %v2192_v5, %v2188_v28  ;;  %v2221_v17 = vadd.s32 %v2219_v24, %v2213_v4 }
 0x238   : > { %v2103_v21 = vsel %vm1982_vm7, %v2102_v11, %v2101_v13  ;;  %v2197_v42 = vsel %vm2196_vm5, 1, %v3657_v47  ;;  %v2223_v44 = vsel %vm2222_vm4, 1, %v3657_v47  ;;  %v2193_v9 = vshrl.u32 %v2189_v26, 16 }
 0x239   : > { %v2106_v62 = vsel %vm4934_vm6, %v4707_v7, %v2103_v21  ;;  %v2199_v51 = vadd.s32 %v2197_v42, %v2191_v34  ;;  %vm2200_vm8 = vc.u32 %v2198_v6, %v2194_v53  ;;  %v2225_v10 = vadd.s32 %v2223_v44, %v2221_v17 }
 0x23a   : > { %v2108_v27 = vmul.f32 %v2106_v62, %v2106_v62  ;;  %v2201_v15 = vsel %vm2200_vm8, 1, %v3657_v47  ;;  %v2217_v12 = vshrl.u32 %v2212_v55, 16  ;;  %v2304_v35 = vand.u32 31, %v2302_v25 }
 0x23b   : > { %v2203_v63 = vadd.s32 %v2201_v15, %v2199_v51  ;;  %v2226_v45 = vadd.s32 %v2225_v10, %v2215_v14  ;;  %v2195_v31 = vshrl.u32 %v2190_v48, 16  ;;  %v5040_v33 = vadd.s32 %v2220_v61, %v2216_v41 }
 0x23c   : > { %v2109_v20 = vmul.f32 -0.001358992, %v2108_v27  ;;  %v2116_v40 = vmul.f32 -0.00019511016, %v2108_v27  ;;  %v2228_v38 = vmul.u32 %v4938_v60, %v5023_v57  ;;  %v5044_v54 = vsub.s32 32, %v2304_v35 }
 0x23d   : > { %v2204_v32 = vadd.s32 %v2203_v63, %v2193_v9  ;;  %v2227_v37 = vadd.s32 %v2226_v45, %v2217_v12  ;;  %v5046_v18 = vshrl.u32 %v2302_v25, 5  ;;  %v2307_v55 = vshll.u32 %v3651_v23, %v2304_v35 }
 0x23e   : > { %v2110_v0 = vadd.f32 0.041655596, %v2109_v20  ;;  %v2117_v22 = vadd.f32 0.008332121, %v2116_v40  ;;  %v2308_v13 = vshrl.u32 %v3652_v36, %v5044_v54  ;;  %v2311_v26 = vshrl.u32 %v3653_v46, %v5044_v54 }
 0x23f   : > { %v5053_v14 = vadd.s32 %v2204_v32, %v2195_v31  ;;  %v2231_v60 = vadd.s32 1, %v2227_v37  ;;  %v2310_v41 = vshll.u32 %v3652_v36, %v2304_v35  ;;  %v2313_v61 = vshll.u32 %v3653_v46, %v2304_v35 }
 0x240   : > { %v2111_v48 = vmul.f32 %v2110_v0, %v2108_v27  ;;  %v2118_v4 = vmul.f32 %v2117_v22, %v2108_v27  ;;  %v5055_v57 = vor.u32 %v2308_v13, %v2307_v55  ;;  %v2314_v11 = vshrl.u32 %v3654_v16, %v5044_v54 }
 0x241   : > { %vm2230_vm6 = vc.u32 %v5053_v14, %v5040_v33  ;;  %v2316_v34 = vshll.u32 %v3654_v16, %v2304_v35  ;;  %v2317_v24 = vshrl.u32 %v3655_v58, %v5044_v54  ;;  %v2319_v21 = vshll.u32 %v3655_v58, %v2304_v35 }
 0x242   : > { %v2112_v28 = vadd.f32 -0.4999988, %v2111_v48  ;;  %v2119_v5 = vadd.f32 -0.16666654, %v2118_v4  ;;  %v2232_v53 = vsel %vm2230_vm6, %v2231_v60, %v2227_v37  ;;  %v2320_v6 = vshrl.u32 %v3656_v39, %v5044_v54 }
 0x243   : > { %v2233_v44 = vadd.s32 %v2232_v53, %v2228_v38  ;;  %v5069_v25 = vor.u32 %v2311_v26, %v2310_v41  ;;  %vm2123_vm7 = vweird.f32 %v4707_v7  ;;  %v2125_v51 = vand.u32 3, %v5019_v2  ;;  %v572_v53 = vpop.f32.mrf.mxu2 }
 0x244   : > { %v2113_v17 = vmul.f32 %v2112_v28, %v2108_v27  ;;  %v2120_v42 = vmul.f32 %v2119_v5, %v2108_v27  ;;  %v5073_v10 = vor.u32 %v2314_v11, %v2313_v61  ;;  %v2318_v9 = vor.u32 %v2317_v24, %v2316_v34 }
 0x245   : > { %v2321_v15 = vor.u32 %v2320_v6, %v2319_v21  ;;  %v2234_v40 = vadd.s32 536870912, %v2233_v44  ;;  %vm2325_vm9 = vcmp.lt.s32.totalorder %v5046_v18, 4  ;;  %vm2322_vm10 = vcmp.lt.s32.totalorder %v5046_v18, 1 }
 0x246   : > { %v2114_v12 = vadd.f32 1.0, %v2113_v17  ;;  %v2121_v20 = vadd.f32 1.0, %v2120_v42  ;;  %vm2324_vm11 = vcmp.lt.s32.totalorder %v5046_v18, 3  ;;  %v2331_v27 = vsel %vm2325_vm9, %v2318_v9, 920167782 }
 0x247   : > { %v5082_v35 = vshll.u32 %v2298_v56, 8  ;;  %v5084_v45 = vshrl.u32 %v2234_v40, 30  ;;  %v2330_v31 = vsel %vm2322_vm10, %v5055_v57, %v5069_v25  ;;  %vm2126_vm12 = vcmp.lt.s32.totalorder %v2125_v51, 2  ;;  %v787_v40 = vpop.f32.mrf.mxu0 }
 0x248   : > { %v2122_v2 = vmul.f32 %v2121_v20, %v2106_v62  ;;  %v2131_v63 = vxor.u32 2147483648, %v2114_v12  ;;  %v2332_v38 = vsel %vm2324_vm11, %v5073_v10, %v2331_v27  ;;  %v2334_v29 = vsel %vm2322_vm10, %v5069_v25, %v5073_v10 }
 0x249   : > { %v2335_v56 = vsel %vm2325_vm9, %v2321_v15, 1326507024  ;;  %vm2130_vm13 = vcmp.eq.s32.totalorder %v2125_v51, 2  ;;  %v2236_v0 = vshll.u32 %v5084_v45, 30  ;;  %vm2323_vm14 = vcmp.lt.s32.totalorder %v5046_v18, 2 }
 0x24a   : > { %v2128_v62 = vxor.u32 2147483648, %v2122_v2  ;;  %vm2127_vm15 = vcmp.eq.s32.totalorder %v2125_v51, 0  ;;  %v2132_v22 = vsel %vm2130_vm13, %v2131_v63, %v2122_v2  ;;  %v2333_v32 = vsel %vm2323_vm14, %v2330_v31, %v2332_v38  ;;  %v684_v51 = vpop.f32.mrf.mxu3 }
 0x24b   : > { %v2336_v37 = vsel %vm2324_vm11, %v2318_v9, %v2335_v56  ;;  %v2237_v13 = vsub.s32 %v2233_v44, %v2236_v0  ;;  %v2339_v48 = vand.u32 65535, %v5082_v35  ;;  %v2340_v60 = vshrl.u32 %v5082_v35, 16 }
 0x24c   : > { %v2129_v55 = vsel %vm2127_vm15, %v2114_v12, %v2128_v62  ;;  %v2337_v26 = vsel %vm2323_vm14, %v2334_v29, %v2336_v37  ;;  %v2363_v21 = vand.u32 65535, %v2333_v32  ;;  %v2364_v6 = vshrl.u32 %v2333_v32, 16 }
 0x24d   : > { %v2133_v4 = vsel %vm2126_vm12, %v2129_v55, %v2132_v22  ;;  %v2341_v41 = vand.u32 65535, %v2337_v26  ;;  %v2342_v61 = vshrl.u32 %v2337_v26, 16  ;;  %vm2238_vm0 = vcmp.lt.s32.totalorder %v2237_v13, 0  ;;  %v872_v26 = vpop.f32.mrf.mxu1 }
 0x24e   : > { %v2134_v11 = vsel %vm2123_vm7, nan, %v2133_v4  ;;  %v2239_v28 = vsub.s32 0, %v2237_v13  ;;  %v2306_v9 = vshrl.u32 %v3651_v23, %v5044_v54  ;;  %v2229_v27 = vadd.s32 %v5040_v33, %v5053_v14 }
 0x24f   : > { %3382 = vst [vmem:[%s4352_s20 + $0x38] sm:$0xff] %v2134_v11  ;;  %v2344_v5 = vmul.u32 %v2342_v61, %v2339_v48  ;;  %v2345_v34 = vmul.u32 %v2341_v41, %v2340_v60  ;;  %v2343_v42 = vmul.u32 %v2341_v41, %v2339_v48  ;;  %v2346_v15 = vmul.u32 %v2342_v61, %v2340_v60 }
 0x250   : > { %v2240_v24 = vsel %vm2238_vm0, %v2239_v28, %v2237_v13  ;;  %v2366_v63 = vmul.u32 %v2364_v6, %v2339_v48  ;;  %v2367_v31 = vmul.u32 %v2363_v21, %v2340_v60  ;;  %v2365_v62 = vmul.u32 %v2363_v21, %v2339_v48 }
 0x251   : > { %v2241_v17 = vclz %v2240_v24  ;;  %v2347_v44 = vshll.u32 %v2344_v5, 16  ;;  %v2349_v7 = vshll.u32 %v2345_v34, 16  ;;  %v2348_v38 = vshrl.u32 %v2344_v5, 16  ;;  %v577_v5 = vpop.f32.mrf.mxu2 }
 0x252   : > { %v2369_v0 = vshll.u32 %v2366_v63, 16  ;;  %v2368_v55 = vmul.u32 %v2364_v6, %v2340_v60  ;;  %v2371_v33 = vshll.u32 %v2367_v31, 16  ;;  %v2326_v48 = vsel %vm2322_vm10, %v2306_v9, %v5055_v57 }
 0x253   : > { %v3501_v12 = vadd.s32 4294967294, %v2241_v17  ;;  %vm2351_vm1 = vc.u32 %v2343_v42, %v2347_v44  ;;  %v2353_v20 = vadd.s32 %v2347_v44, %v2343_v42  ;;  %v2327_v24 = vsel %vm2325_vm9, %v5073_v10, 2102212464  ;;  %v690_v42 = vpop.f32.mrf.mxu3 }
 0x254   : > { %v2352_v2 = vsel %vm2351_vm1, 1, %v3657_v47  ;;  %vm2373_vm4 = vc.u32 %v2365_v62, %v2369_v0  ;;  %v2375_v14 = vadd.s32 %v2369_v0, %v2365_v62  ;;  %v2350_v6 = vshrl.u32 %v2345_v34, 16 }
 0x255   : > { %vm3502_vm2 = vcmp.lt.s32.totalorder %v3501_v12, 0  ;;  %v2354_v29 = vadd.s32 %v2352_v2, %v2346_v15  ;;  %vm2355_vm3 = vc.u32 %v2353_v20, %v2349_v7  ;;  %v2374_v28 = vsel %vm2373_vm4, 1, %v3657_v47 }
 0x256   : > { %v2244_v56 = vsel %vm3502_vm2, 0, %v3501_v12  ;;  %v2356_v54 = vsel %vm2355_vm3, 1, %v3657_v47  ;;  %v2376_v60 = vadd.s32 %v2374_v28, %v2368_v55  ;;  %vm2377_vm5 = vc.u32 %v2375_v14, %v2371_v33 }
 0x257   : > { %v2245_v22 = vsub.s32 32, %v2244_v56  ;;  %v2249_v32 = vsub.s32 4294967266, %v2244_v56  ;;  %v2358_v37 = vadd.s32 %v2356_v54, %v2354_v29  ;;  %v2246_v4 = vshll.u32 %v2237_v13, %v2244_v56 }
 0x258   : > { %v2378_v17 = vsel %vm2377_vm5, 1, %v3657_v47  ;;  %v2370_v44 = vshrl.u32 %v2366_v63, 16  ;;  %v573_v12 = vadd.f32 %v572_v53, %v4024_v59  ;;  %v578_v7 = vadd.f32 %v577_v5, %v4035_v8 }
 0x259   : > { %v2247_v41 = vshrl.u32 %v2229_v27, %v2245_v22  ;;  %v2250_v61 = vadd.s32 127, %v2249_v32  ;;  %v2359_v11 = vadd.s32 %v2358_v37, %v2348_v38  ;;  %v2380_v15 = vadd.s32 %v2378_v17, %v2376_v60  ;;  %v791_v27 = vpop.f32.mrf.mxu0 }
 0x25a   : > { %v2259_v57 = vsub.s32 4, %v5084_v45  ;;  %v2328_v10 = vsel %vm2324_vm11, %v5069_v25, %v2327_v24  ;;  %v2372_v34 = vshrl.u32 %v2367_v31, 16  ;;  %v685_v38 = vadd.f32 %v684_v51, %v573_v12  ;;  %v876_v31 = vpop.f32.mrf.mxu1 }
 0x25b   : > { %v2248_v13 = vor.u32 %v2247_v41, %v2246_v4  ;;  %v2251_v21 = vshll.u32 %v2250_v61, 23  ;;  %v5133_v9 = vadd.s32 %v2359_v11, %v2350_v6  ;;  %v2381_v2 = vadd.s32 %v2380_v15, %v2370_v44 }
 0x25c   : > { %v691_v29 = vadd.f32 %v690_v42, %v578_v7  ;;  %v5135_v54 = vadd.s32 %v2375_v14, %v2371_v33  ;;  %v2329_v59 = vsel %vm2323_vm14, %v2326_v48, %v2328_v10  ;;  %v788_v53 = vadd.f32 %v787_v40, %v685_v38 }
 0x25d   : > { %v2252_v20 = vor.u32 4788187, %v2251_v21  ;;  %v2255_v56 = vcvt.s32.f32 %v2248_v13  ;;  %v2382_v8 = vadd.s32 %v2381_v2, %v2372_v34  ;;  %vm2137_vm8 = vcmp.lt.s32.totalorder %v4906_v1, 0 }
 0x25e   : > { %v792_v62 = vadd.f32 %v791_v27, %v691_v29  ;;  %vm2385_vm6 = vc.u32 %v5133_v9, %v5135_v54  ;;  %v2260_v51 = vsel %vm2137_vm8, %v2259_v57, %v5084_v45  ;;  %v5143_v22 = vadd.f32 %v872_v26, %v788_v53 }
 0x25f   : > { %v2253_v63 = vand.u32 2147483647, %v2252_v20  ;;  %v2386_v0 = vadd.s32 1, %v2382_v8  ;;  %vm2136_vm7 = vcmp.le.f32.partialorder %v2135_v52, 0.7853982  ;;  %v2383_v32 = vmul.u32 %v5082_v35, %v2329_v59 }
 0x260   : > { %v2445_v37 = vand.u32 2147483647, %v5143_v22  ;;  %v2448_v55 = vand.u32 2139095040, %v5143_v22  ;;  %v5150_v4 = vadd.f32 %v876_v31, %v792_v62  ;;  %v2262_v14 = vsel %vm2136_vm7, 0, %v2260_v51 }
 0x261   : > { %v2256_v25 = vmul.f32 %v2255_v56, %v2253_v63  ;;  %v2387_v40 = vsel %vm2385_vm6, %v2386_v0, %v2382_v8  ;;  %v2279_v28 = vadd.s32 3, %v2262_v14  ;;  %vm2292_vm9 = vcmp.lt.s32.totalorder %v4913_v43, 0 }
 0x262   : > { %v2388_v41 = vadd.s32 %v2387_v40, %v2383_v32  ;;  %v2449_v26 = vshrl.u32 %v2448_v55, 23  ;;  %v2452_v61 = vand.u32 8388607, %v2445_v37  ;;  %v2603_v5 = vand.u32 2139095040, %v5150_v4 }
 0x263   : > { %v2257_v18 = vxor.u32 2147483648, %v2256_v25  ;;  %v2600_v6 = vand.u32 2147483647, %v5150_v4  ;;  %v2280_v7 = vand.u32 3, %v2279_v28  ;;  %vm5164_vm11 = vcmp.le.f32.partialorder %v2290_v3, 0.7853982 }
 0x264   : > { %v2389_v11 = vadd.s32 536870912, %v2388_v41  ;;  %v3506_v35 = vadd.s32 4294967169, %v2449_v26  ;;  %v2453_v13 = vor.u32 8388608, %v2452_v61  ;;  %v2604_v17 = vshrl.u32 %v2603_v5, 23 }
 0x265   : > { %v2258_v33 = vsel %vm2137_vm8, %v2257_v18, %v2256_v25  ;;  %v5172_v63 = vand.u32 8388607, %v2600_v6  ;;  %vm2282_vm13 = vcmp.eq.s32.totalorder %v2280_v7, 0  ;;  %vm2285_vm14 = vcmp.eq.s32.totalorder %v2280_v7, 2 }
 0x266   : > { %v2261_v45 = vsel %vm2136_vm7, %v4906_v1, %v2258_v33  ;;  %v2390_v60 = vshrl.u32 %v2389_v11, 30  ;;  %v2455_v21 = vadd.s32 1, %v3506_v35  ;;  %v3509_v20 = vadd.s32 4294967169, %v2604_v17 }
 0x267   : > { %v2263_v52 = vmul.f32 %v2261_v45, %v2261_v45  ;;  %v5168_v29 = vshll.u32 %v2453_v13, 8  ;;  %vm2281_vm15 = vcmp.lt.s32.totalorder %v2280_v7, 2  ;;  %v2384_v51 = vadd.s32 %v5135_v54, %v5133_v9 }
 0x268   : > { %v2391_v15 = vshll.u32 %v2390_v60, 30  ;;  %v2414_v12 = vsub.s32 4, %v2390_v60  ;;  %vm2456_vm10 = vcmp.gt.s32.totalorder %v2455_v21, 0  ;;  %v2610_v62 = vadd.s32 1, %v3509_v20 }
 0x269   : > { %v2264_v48 = vmul.f32 -0.001358992, %v2263_v52  ;;  %v2271_v24 = vmul.f32 -0.00019511016, %v2263_v52  ;;  %v2457_v38 = vsel %vm2456_vm10, %v2455_v21, 0  ;;  %vm2278_vm0 = vweird.f32 %v4906_v1 }
 0x26a   : > { %v5158_v27 = vsub.s32 %v2388_v41, %v2391_v15  ;;  %v2415_v34 = vsel %vm2292_vm9, %v2414_v12, %v2390_v60  ;;  %v2459_v53 = vand.u32 31, %v2457_v38  ;;  %v5183_v40 = vand.u32 65535, %v5168_v29 }
 0x26b   : > { %v2265_v42 = vadd.f32 0.041655596, %v2264_v48  ;;  %v2272_v44 = vadd.f32 0.008332121, %v2271_v24  ;;  %v2417_v3 = vsel %vm5164_vm11, 0, %v2415_v34  ;;  %v2608_v55 = vor.u32 8388608, %v5172_v63 }
 0x26c   : > { %vm2393_vm12 = vcmp.lt.s32.totalorder %v5158_v27, 0  ;;  %v2394_v8 = vsub.s32 0, %v5158_v27  ;;  %v2460_v32 = vsub.s32 32, %v2459_v53  ;;  %v2434_v41 = vadd.s32 3, %v2417_v3 }
 0x26d   : > { %v2266_v57 = vmul.f32 %v2265_v42, %v2263_v52  ;;  %v2273_v10 = vmul.f32 %v2272_v44, %v2263_v52  ;;  %v5186_v26 = vshrl.u32 %v2457_v38, 5  ;;  %v2465_v9 = vshll.u32 %v3652_v36, %v2459_v53 }
 0x26e   : > { %v2395_v0 = vsel %vm2393_vm12, %v2394_v8, %v5158_v27  ;;  %vm2611_vm1 = vcmp.gt.s32.totalorder %v2610_v62, 0  ;;  %v2463_v28 = vshrl.u32 %v3652_v36, %v2460_v32  ;;  %v2468_v35 = vshll.u32 %v3653_v46, %v2459_v53 }
 0x26f   : > { %v2267_v56 = vadd.f32 -0.4999988, %v2266_v57  ;;  %v2274_v59 = vadd.f32 -0.16666654, %v2273_v10  ;;  %v2396_v18 = vclz %v2395_v0  ;;  %v2466_v5 = vshrl.u32 %v3653_v46, %v2460_v32 }
 0x270   : > { %v2469_v48 = vshrl.u32 %v3654_v16, %v2460_v32  ;;  %v2471_v24 = vshll.u32 %v3654_v16, %v2459_v53  ;;  %v2472_v57 = vshrl.u32 %v3655_v58, %v2460_v32  ;;  %v2474_v10 = vshll.u32 %v3655_v58, %v2459_v53 }
 0x271   : > { %v2268_v25 = vmul.f32 %v2267_v56, %v2263_v52  ;;  %v2275_v31 = vmul.f32 %v2274_v59, %v2263_v52  ;;  %v3504_v61 = vadd.s32 4294967294, %v2396_v18  ;;  %v2462_v52 = vshll.u32 %v3651_v23, %v2459_v53 }
 0x272   : > { %v2467_v15 = vor.u32 %v2466_v5, %v2465_v9  ;;  %v2470_v20 = vor.u32 %v2469_v48, %v2468_v35  ;;  %v2475_v59 = vshrl.u32 %v3656_v39, %v2460_v32  ;;  %v2473_v3 = vor.u32 %v2472_v57, %v2471_v24 }
 0x273   : > { %v2269_v33 = vadd.f32 1.0, %v2268_v25  ;;  %v2276_v14 = vadd.f32 1.0, %v2275_v31  ;;  %vm3505_vm2 = vcmp.lt.s32.totalorder %v3504_v61, 0  ;;  %v2464_v17 = vor.u32 %v2463_v28, %v2462_v52 }
 0x274   : > { %v2399_v21 = vsel %vm3505_vm2, 0, %v3504_v61  ;;  %v2612_v25 = vsel %vm2611_vm1, %v2610_v62, 0  ;;  %v2476_v18 = vor.u32 %v2475_v59, %v2474_v10  ;;  %vm2477_vm3 = vcmp.lt.s32.totalorder %v5186_v26, 1 }
 0x275   : > { %v2277_v54 = vmul.f32 %v2276_v14, %v2261_v45  ;;  %v2286_v11 = vxor.u32 2147483648, %v2269_v33  ;;  %v2400_v42 = vsub.s32 32, %v2399_v21  ;;  %v2401_v45 = vshll.u32 %v5158_v27, %v2399_v21 }
 0x276   : > { %v2404_v44 = vsub.s32 4294967266, %v2399_v21  ;;  %v2461_v27 = vshrl.u32 %v3651_v23, %v2460_v32  ;;  %vm2478_vm4 = vcmp.lt.s32.totalorder %v5186_v26, 2  ;;  %vm2479_vm5 = vcmp.lt.s32.totalorder %v5186_v26, 3 }
 0x277   : > { %v2283_v60 = vxor.u32 2147483648, %v2277_v54  ;;  %v2287_v13 = vsel %vm2285_vm14, %v2286_v11, %v2277_v54  ;;  %v2402_v38 = vshrl.u32 %v2384_v51, %v2400_v42  ;;  %vm2480_vm8 = vcmp.lt.s32.totalorder %v5186_v26, 4 }
 0x278   : > { %v2405_v56 = vadd.s32 127, %v2404_v44  ;;  %v2485_v7 = vsel %vm2477_vm3, %v2464_v17, %v2467_v15  ;;  %v2482_v53 = vsel %vm2480_vm8, %v2470_v20, 2102212464  ;;  %v2486_v51 = vsel %vm2480_vm8, %v2473_v3, 920167782 }
 0x279   : > { %v2284_v12 = vsel %vm2282_vm13, %v2269_v33, %v2283_v60  ;;  %v2403_v31 = vor.u32 %v2402_v38, %v2401_v45  ;;  %v2489_v32 = vsel %vm2477_vm3, %v2467_v15, %v2470_v20  ;;  %v2481_v14 = vsel %vm2477_vm3, %v2461_v27, %v2464_v17 }
 0x27a   : > { %v2288_v34 = vsel %vm2281_vm15, %v2284_v12, %v2287_v13  ;;  %v2406_v0 = vshll.u32 %v2405_v56, 23  ;;  %v2487_v62 = vsel %vm2479_vm5, %v2470_v20, %v2486_v51  ;;  %v2490_v61 = vsel %vm2480_vm8, %v2476_v18, 1326507024 }
 0x27b   : > { %v2289_v8 = vsel %vm2278_vm0, nan, %v2288_v34  ;;  %v2410_v33 = vcvt.s32.f32 %v2403_v31  ;;  %v2483_v9 = vsel %vm2479_vm5, %v2467_v15, %v2482_v53  ;;  %v2488_v54 = vsel %vm2478_vm4, %v2485_v7, %v2487_v62 }
 0x27c   : > { %3383 = vst [vmem:[%s4352_s20 + $0x40] sm:$0xff] %v2289_v8  ;;  %v2407_v1 = vor.u32 4788187, %v2406_v0  ;;  %v2491_v11 = vsel %vm2479_vm5, %v2473_v3, %v2490_v61  ;;  %v2495_v35 = vshrl.u32 %v5168_v29, 16  ;;  %v2518_v5 = vand.u32 65535, %v2488_v54 }
 0x27d   : > { %v2492_v28 = vsel %vm2478_vm4, %v2489_v32, %v2491_v11  ;;  %v2519_v48 = vshrl.u32 %v2488_v54, 16  ;;  %v5216_v60 = vand.u32 3, %v2434_v41  ;;  %v5220_v17 = vsel %vm2478_vm4, %v2481_v14, %v2483_v9 }
 0x27e   : > { %v2408_v52 = vand.u32 2147483647, %v2407_v1  ;;  %v2496_v13 = vand.u32 65535, %v2492_v28  ;;  %v2497_v21 = vshrl.u32 %v2492_v28, 16  ;;  %v2522_v45 = vmul.u32 %v2518_v5, %v2495_v35 }
 0x27f   : > { %v2521_v42 = vmul.u32 %v2519_v48, %v5183_v40  ;;  %v5223_v44 = vshrl.u32 %v2612_v25, 5  ;;  %v2614_v57 = vand.u32 31, %v2612_v25  ;;  %v2520_v41 = vmul.u32 %v2518_v5, %v5183_v40 }
 0x280   : > { %v2411_v24 = vmul.f32 %v2410_v33, %v2408_v52  ;;  %v2499_v12 = vmul.u32 %v2497_v21, %v5183_v40  ;;  %v2500_v20 = vmul.u32 %v2496_v13, %v2495_v35  ;;  %v2498_v10 = vmul.u32 %v2496_v13, %v5183_v40 }
 0x281   : > { %v2523_v34 = vmul.u32 %v2519_v48, %v2495_v35  ;;  %v2524_v38 = vshll.u32 %v2521_v42, 16  ;;  %v2501_v56 = vmul.u32 %v2497_v21, %v2495_v35  ;;  %v2525_v8 = vshrl.u32 %v2521_v42, 16 }
 0x282   : > { %v2412_v15 = vxor.u32 2147483648, %v2411_v24  ;;  %v2502_v59 = vshll.u32 %v2499_v12, 16  ;;  %v2504_v3 = vshll.u32 %v2500_v20, 16  ;;  %v2526_v31 = vshll.u32 %v2522_v45, 16 }
 0x283   : > { %vm2528_vm6 = vc.u32 %v2520_v41, %v2524_v38  ;;  %v2530_v7 = vadd.s32 %v2524_v38, %v2520_v41  ;;  %v5235_v53 = vsub.s32 32, %v2614_v57  ;;  %v2503_v2 = vshrl.u32 %v2499_v12, 16 }
 0x284   : > { %v2413_v26 = vsel %vm2292_vm9, %v2412_v15, %v2411_v24  ;;  %vm2506_vm7 = vc.u32 %v2498_v10, %v2502_v59  ;;  %v2508_v0 = vadd.s32 %v2502_v59, %v2498_v10  ;;  %v2529_v40 = vsel %vm2528_vm6, 1, %v3657_v47 }
 0x285   : > { %v2416_v27 = vsel %vm5164_vm11, %v4913_v43, %v2413_v26  ;;  %v2507_v18 = vsel %vm2506_vm7, 1, %v3657_v47  ;;  %v2531_v1 = vadd.s32 %v2529_v40, %v2523_v34  ;;  %v2505_v14 = vshrl.u32 %v2500_v20, 16 }
 0x286   : > { %v2418_v25 = vmul.f32 %v2416_v27, %v2416_v27  ;;  %v2509_v33 = vadd.s32 %v2507_v18, %v2501_v56  ;;  %vm2510_vm9 = vc.u32 %v2508_v0, %v2504_v3  ;;  %vm2532_vm10 = vc.u32 %v2530_v7, %v2526_v31 }
 0x287   : > { %v2511_v62 = vsel %vm2510_vm9, 1, %v3657_v47  ;;  %v2533_v54 = vsel %vm2532_vm10, 1, %v3657_v47  ;;  %v2527_v11 = vshrl.u32 %v2522_v45, 16  ;;  %v2617_v35 = vshll.u32 %v3651_v23, %v2614_v57 }
 0x288   : > { %v2419_v51 = vmul.f32 -0.001358992, %v2418_v25  ;;  %v2426_v32 = vmul.f32 -0.00019511016, %v2418_v25  ;;  %v2513_v9 = vadd.s32 %v2511_v62, %v2509_v33  ;;  %v2535_v28 = vadd.s32 %v2533_v54, %v2531_v1 }
 0x289   : > { %v2618_v5 = vshrl.u32 %v3652_v36, %v5235_v53  ;;  %v2621_v21 = vshrl.u32 %v3653_v46, %v5235_v53  ;;  %v5244_v42 = vadd.s32 %v2530_v7, %v2526_v31  ;;  %v2620_v20 = vshll.u32 %v3652_v36, %v2614_v57 }
 0x28a   : > { %v2420_v61 = vadd.f32 0.041655596, %v2419_v51  ;;  %v2427_v52 = vadd.f32 0.008332121, %v2426_v32  ;;  %v2514_v13 = vadd.s32 %v2513_v9, %v2503_v2  ;;  %v2536_v15 = vadd.s32 %v2535_v28, %v2525_v8 }
 0x28b   : > { %v5246_v12 = vor.u32 %v2618_v5, %v2617_v35  ;;  %v2624_v34 = vshrl.u32 %v3654_v16, %v5235_v53  ;;  %v2623_v26 = vshll.u32 %v3653_v46, %v2614_v57  ;;  %v2626_v56 = vshll.u32 %v3654_v16, %v2614_v57 }
 0x28c   : > { %v2421_v48 = vmul.f32 %v2420_v61, %v2418_v25  ;;  %v2428_v24 = vmul.f32 %v2427_v52, %v2418_v25  ;;  %v5249_v41 = vadd.s32 %v2514_v13, %v2505_v14  ;;  %v2537_v38 = vadd.s32 %v2536_v15, %v2527_v11 }
 0x28d   : > { %v2627_v59 = vshrl.u32 %v3655_v58, %v5235_v53  ;;  %vm2436_vm11 = vcmp.lt.s32.totalorder %v5216_v60, 2  ;;  %v5260_v31 = vor.u32 %v2621_v21, %v2620_v20  ;;  %v2629_v18 = vshll.u32 %v3655_v58, %v2614_v57 }
 0x28e   : > { %v2422_v45 = vadd.f32 -0.4999988, %v2421_v48  ;;  %v2429_v10 = vadd.f32 -0.16666654, %v2428_v24  ;;  %vm2540_vm12 = vc.u32 %v5249_v41, %v5244_v42  ;;  %v2541_v0 = vadd.s32 1, %v2537_v38 }
 0x28f   : > { %v2628_v40 = vor.u32 %v2627_v59, %v2626_v56  ;;  %v2630_v7 = vshrl.u32 %v3656_v39, %v5235_v53  ;;  %v2538_v32 = vmul.u32 %v5168_v29, %v5220_v17  ;;  %vm2437_vm13 = vcmp.eq.s32.totalorder %v5216_v60, 0  ;;  %v696_v56 = vpop.f32.mrf.mxu3 }
 0x290   : > { %v2423_v8 = vmul.f32 %v2422_v45, %v2418_v25  ;;  %v2430_v3 = vmul.f32 %v2429_v10, %v2418_v25  ;;  %v5267_v25 = vor.u32 %v2624_v34, %v2623_v26  ;;  %v2542_v33 = vsel %vm2540_vm12, %v2541_v0, %v2537_v38  ;;  %v582_v38 = vpop.f32.mrf.mxu2 }
 0x291   : > { %v2631_v2 = vor.u32 %v2630_v7, %v2629_v18  ;;  %vm2632_vm14 = vcmp.lt.s32.totalorder %v5223_v44, 1  ;;  %v2543_v61 = vadd.s32 %v2542_v33, %v2538_v32  ;;  %vm2635_vm15 = vcmp.lt.s32.totalorder %v5223_v44, 4  ;;  %v795_v7 = vpop.f32.mrf.mxu0 }
 0x292   : > { %v2424_v1 = vadd.f32 1.0, %v2423_v8  ;;  %v2431_v51 = vadd.f32 1.0, %v2430_v3  ;;  %vm2440_vm0 = vcmp.eq.s32.totalorder %v5216_v60, 2  ;;  %vm2633_vm1 = vcmp.lt.s32.totalorder %v5223_v44, 2 }
 0x293   : > { %v2640_v29 = vsel %vm2632_vm14, %v5246_v12, %v5260_v31  ;;  %v2641_v17 = vsel %vm2635_vm15, %v2628_v40, 920167782  ;;  %v2544_v52 = vadd.s32 536870912, %v2543_v61  ;;  %vm2634_vm2 = vcmp.lt.s32.totalorder %v5223_v44, 3 }
 0x294   : > { %v2432_v14 = vmul.f32 %v2431_v51, %v2416_v27  ;;  %v2441_v62 = vxor.u32 2147483648, %v2424_v1  ;;  %v2644_v27 = vsel %vm2632_vm14, %v5260_v31, %v5267_v25  ;;  %v2642_v54 = vsel %vm2634_vm2, %v5267_v25, %v2641_v17 }
 0x295   : > { %v2645_v11 = vsel %vm2635_vm15, %v2631_v2, 1326507024  ;;  %v5292_v28 = vshll.u32 %v2608_v55, 8  ;;  %v5296_v5 = vshrl.u32 %v2544_v52, 30  ;;  %v2643_v48 = vsel %vm2633_vm1, %v2640_v29, %v2642_v54 }
 0x296   : > { %v2438_v57 = vxor.u32 2147483648, %v2432_v14  ;;  %v2442_v9 = vsel %vm2440_vm0, %v2441_v62, %v2432_v14  ;;  %v2646_v24 = vsel %vm2634_vm2, %v2628_v40, %v2645_v11  ;;  %vm2433_vm3 = vweird.f32 %v4913_v43 }
 0x297   : > { %v2647_v63 = vsel %vm2633_vm1, %v2644_v27, %v2646_v24  ;;  %v2546_v21 = vshll.u32 %v5296_v5, 30  ;;  %v2650_v15 = vshrl.u32 %v5292_v28, 16  ;;  %v2649_v45 = vand.u32 65535, %v5292_v28 }
 0x298   : > { %v2439_v35 = vsel %vm2437_vm13, %v2424_v1, %v2438_v57  ;;  %v2651_v20 = vand.u32 65535, %v2647_v63  ;;  %v2652_v10 = vshrl.u32 %v2647_v63, 16  ;;  %v2674_v34 = vshrl.u32 %v2643_v48, 16  ;;  %v880_v57 = vpop.f32.mrf.mxu1 }
 0x299   : > { %v2443_v13 = vsel %vm2436_vm11, %v2439_v35, %v2442_v9  ;;  %v2547_v26 = vsub.s32 %v2543_v61, %v2546_v21  ;;  %v2673_v8 = vand.u32 65535, %v2643_v48  ;;  %v2616_v3 = vshrl.u32 %v3651_v23, %v5235_v53  ;;  %v587_v48 = vpop.f32.mrf.mxu2 }
 0x29a   : > { %v2444_v55 = vsel %vm2433_vm3, nan, %v2443_v13  ;;  %v5311_v43 = vmul.u32 %v2651_v20, %v2650_v15  ;;  %v2654_v60 = vmul.u32 %v2652_v10, %v2649_v45  ;;  %v2653_v0 = vmul.u32 %v2651_v20, %v2649_v45 }
 0x29b   : > { %3384 = vst [vmem:[%s4352_s20 + $0x48] sm:$0xff] %v2444_v55  ;;  %vm2548_vm4 = vcmp.lt.s32.totalorder %v2547_v26, 0  ;;  %v2549_v59 = vsub.s32 0, %v2547_v26  ;;  %v2676_v18 = vmul.u32 %v2674_v34, %v2649_v45  ;;  %v2539_v1 = vadd.s32 %v5244_v42, %v5249_v41 }
 0x29c   : > { %v2657_v40 = vshll.u32 %v2654_v60, 16  ;;  %v2656_v32 = vmul.u32 %v2652_v10, %v2650_v15  ;;  %v2659_v33 = vshll.u32 %v5311_v43, 16  ;;  %v2636_v61 = vsel %vm2632_vm14, %v2616_v3, %v5246_v12 }
 0x29d   : > { %v2550_v51 = vsel %vm2548_vm4, %v2549_v59, %v2547_v26  ;;  %v2679_v62 = vshll.u32 %v2676_v18, 16  ;;  %v2675_v29 = vmul.u32 %v2673_v8, %v2649_v45  ;;  %v2677_v17 = vmul.u32 %v2673_v8, %v2650_v15 }
 0x29e   : > { %v2551_v2 = vclz %v2550_v51  ;;  %vm2661_vm5 = vc.u32 %v2653_v0, %v2657_v40  ;;  %v2663_v14 = vadd.s32 %v2657_v40, %v2653_v0  ;;  %v2637_v42 = vsel %vm2635_vm15, %v5267_v25, 2102212464 }
 0x29f   : > { %v2662_v53 = vsel %vm2661_vm5, 1, %v3657_v47  ;;  %v2658_v27 = vshrl.u32 %v2654_v60, 16  ;;  %v2678_v54 = vmul.u32 %v2674_v34, %v2650_v15  ;;  %vm2683_vm6 = vc.u32 %v2675_v29, %v2679_v62  ;;  %v702_v15 = vpop.f32.mrf.mxu3 }
 0x2a0   : > { %v3507_v52 = vadd.s32 4294967294, %v2551_v2  ;;  %v2664_v41 = vadd.s32 %v2662_v53, %v2656_v32  ;;  %vm2665_vm8 = vc.u32 %v2663_v14, %v2659_v33  ;;  %v2684_v12 = vsel %vm2683_vm6, 1, %v3657_v47 }
 0x2a1   : > { %v2666_v9 = vsel %vm2665_vm8, 1, %v3657_v47  ;;  %v2685_v35 = vadd.s32 %v2679_v62, %v2675_v29  ;;  %v2681_v13 = vshll.u32 %v2677_v17, 16  ;;  %v2686_v63 = vadd.s32 %v2684_v12, %v2678_v54 }
 0x2a2   : > { %vm3508_vm7 = vcmp.lt.s32.totalorder %v3507_v52, 0  ;;  %v2668_v11 = vadd.s32 %v2666_v9, %v2664_v41  ;;  %v583_v55 = vadd.f32 %v582_v38, %v4046_v19  ;;  %v2638_v20 = vsel %vm2634_vm2, %v5260_v31, %v2637_v42  ;;  %v799_v19 = vpop.f32.mrf.mxu0 }
 0x2a3   : > { %v2554_v24 = vsel %vm3508_vm7, 0, %v3507_v52  ;;  %v2660_v10 = vshrl.u32 %v5311_v43, 16  ;;  %vm2687_vm9 = vc.u32 %v2685_v35, %v2681_v13  ;;  %v588_v60 = vadd.f32 %v587_v48, %v4057_v30 }
 0x2a4   : > { %v2555_v21 = vsub.s32 32, %v2554_v24  ;;  %v2559_v25 = vsub.s32 4294967266, %v2554_v24  ;;  %v2669_v45 = vadd.s32 %v2668_v11, %v2658_v27  ;;  %v697_v34 = vadd.f32 %v696_v56, %v583_v55 }
 0x2a5   : > { %v2556_v59 = vshll.u32 %v2547_v26, %v2554_v24  ;;  %v2688_v0 = vsel %vm2687_vm9, 1, %v3657_v47  ;;  %v2680_v38 = vshrl.u32 %v2676_v18, 16  ;;  %v703_v32 = vadd.f32 %v702_v15, %v588_v60  ;;  %v884_v26 = vpop.f32.mrf.mxu1 }
 0x2a6   : > { %v2557_v8 = vshrl.u32 %v2539_v1, %v2555_v21  ;;  %v2560_v3 = vadd.s32 127, %v2559_v25  ;;  %v2690_v40 = vadd.s32 %v2688_v0, %v2686_v63  ;;  %v796_v51 = vadd.f32 %v795_v7, %v697_v34 }
 0x2a7   : > { %v2569_v2 = vsub.s32 4, %v5296_v5  ;;  %v2670_v14 = vadd.s32 %v2669_v45, %v2660_v10  ;;  %v2682_v43 = vshrl.u32 %v2677_v17, 16  ;;  %v800_v30 = vadd.f32 %v799_v19, %v703_v32 }
 0x2a8   : > { %v2558_v33 = vor.u32 %v2557_v8, %v2556_v59  ;;  %v2561_v31 = vshll.u32 %v2560_v3, 23  ;;  %v2691_v62 = vadd.s32 %v2690_v40, %v2680_v38  ;;  %v5335_v56 = vadd.f32 %v880_v57, %v796_v51 }
 0x2a9   : > { %vm2447_vm10 = vcmp.lt.s32.totalorder %v5143_v22, 0  ;;  %v2689_v53 = vadd.s32 %v2685_v35, %v2681_v13  ;;  %v2639_v18 = vsel %vm2633_vm1, %v2636_v61, %v2638_v20  ;;  %v5342_v17 = vadd.f32 %v884_v26, %v800_v30 }
 0x2aa   : > { %v2562_v1 = vor.u32 4788187, %v2561_v31  ;;  %v2692_v7 = vadd.s32 %v2691_v62, %v2682_v43  ;;  %v2755_v29 = vand.u32 2147483647, %v5335_v56  ;;  %v2758_v52 = vand.u32 2139095040, %v5335_v56 }
 0x2ab   : > { %v2565_v41 = vcvt.s32.f32 %v2558_v33  ;;  %vm2695_vm11 = vc.u32 %v2670_v14, %v2689_v53  ;;  %v2570_v57 = vsel %vm2447_vm10, %v2569_v2, %v5296_v5  ;;  %v2693_v54 = vmul.u32 %v5292_v28, %v2639_v18 }
 0x2ac   : > { %v2563_v42 = vand.u32 2147483647, %v2562_v1  ;;  %v2696_v27 = vadd.s32 1, %v2692_v7  ;;  %v2759_v9 = vshrl.u32 %v2758_v52, 23  ;;  %v2762_v44 = vand.u32 8388607, %v2755_v29 }
 0x2ad   : > { %vm2446_vm12 = vcmp.le.f32.partialorder %v2445_v37, 0.7853982  ;;  %v2913_v13 = vand.u32 2139095040, %v5342_v17  ;;  %v2910_v55 = vand.u32 2147483647, %v5342_v17  ;;  %vm2602_vm15 = vcmp.lt.s32.totalorder %v5150_v4, 0 }
 0x2ae   : > { %v2566_v61 = vmul.f32 %v2565_v41, %v2563_v42  ;;  %v2697_v11 = vsel %vm2695_vm11, %v2696_v27, %v2692_v7  ;;  %v3512_v12 = vadd.s32 4294967169, %v2759_v9  ;;  %v2572_v48 = vsel %vm2446_vm12, 0, %v2570_v57 }
 0x2af   : > { %v2698_v24 = vadd.s32 %v2697_v11, %v2693_v54  ;;  %v2763_v63 = vor.u32 8388608, %v2762_v44  ;;  %v2589_v20 = vadd.s32 3, %v2572_v48  ;;  %v2914_v10 = vshrl.u32 %v2913_v13, 23 }
 0x2b0   : > { %v2567_v35 = vxor.u32 2147483648, %v2566_v61  ;;  %v2765_v5 = vadd.s32 1, %v3512_v12  ;;  %vm5363_vm14 = vcmp.le.f32.partialorder %v2600_v6, 0.7853982  ;;  %v5371_v8 = vand.u32 8388607, %v2910_v55 }
 0x2b1   : > { %v2699_v25 = vadd.s32 536870912, %v2698_v24  ;;  %v5367_v59 = vshll.u32 %v2763_v63, 8  ;;  %v5374_v38 = vand.u32 3, %v2589_v20  ;;  %v2694_v40 = vadd.s32 %v2689_v53, %v2670_v14 }
 0x2b2   : > { %v2568_v21 = vsel %vm2447_vm10, %v2567_v35, %v2566_v61  ;;  %vm2766_vm13 = vcmp.gt.s32.totalorder %v2765_v5, 0  ;;  %v5378_v2 = vadd.s32 4294967169, %v2914_v10  ;;  %v2918_v26 = vor.u32 8388608, %v5371_v8 }
 0x2b3   : > { %v5357_v28 = vsel %vm2446_vm12, %v5143_v22, %v2568_v21  ;;  %v2700_v45 = vshrl.u32 %v2699_v25, 30  ;;  %v2767_v15 = vsel %vm2766_vm13, %v2765_v5, 0  ;;  %v5383_v62 = vand.u32 65535, %v5367_v59 }
 0x2b4   : > { %v2573_v37 = vmul.f32 %v5357_v28, %v5357_v28  ;;  %v2769_v60 = vand.u32 31, %v2767_v15  ;;  %v5380_v43 = vshrl.u32 %v2767_v15, 5  ;;  %v5386_v30 = vshrl.u32 %v5367_v59, 16 }
 0x2b5   : > { %v2701_v19 = vshll.u32 %v2700_v45, 30  ;;  %v2724_v51 = vsub.s32 4, %v2700_v45  ;;  %vm2595_vm1 = vcmp.eq.s32.totalorder %v5374_v38, 2  ;;  %vm2592_vm2 = vcmp.eq.s32.totalorder %v5374_v38, 0 }
 0x2b6   : > { %v2574_v3 = vmul.f32 -0.001358992, %v2573_v37  ;;  %v2581_v0 = vmul.f32 -0.00019511016, %v2573_v37  ;;  %v2770_v6 = vsub.s32 32, %v2769_v60  ;;  %v2772_v7 = vshll.u32 %v3651_v23, %v2769_v60 }
 0x2b7   : > { %v5376_v31 = vsub.s32 %v2698_v24, %v2701_v19  ;;  %v5393_v18 = vsel %vm2602_vm15, %v2724_v51, %v2700_v45  ;;  %v2775_v42 = vshll.u32 %v3652_v36, %v2769_v60  ;;  %v2778_v61 = vshll.u32 %v3653_v46, %v2769_v60 }
 0x2b8   : > { %v2575_v32 = vadd.f32 0.041655596, %v2574_v3  ;;  %v2582_v33 = vadd.f32 0.008332121, %v2581_v0  ;;  %v2773_v52 = vshrl.u32 %v3652_v36, %v2770_v6  ;;  %v2776_v9 = vshrl.u32 %v3653_v46, %v2770_v6 }
 0x2b9   : > { %vm2703_vm0 = vcmp.lt.s32.totalorder %v5376_v31, 0  ;;  %v2704_v53 = vsub.s32 0, %v5376_v31  ;;  %v2779_v54 = vshrl.u32 %v3654_v16, %v2770_v6  ;;  %v2782_v11 = vshrl.u32 %v3655_v58, %v2770_v6 }
 0x2ba   : > { %v2576_v1 = vmul.f32 %v2575_v32, %v2573_v37  ;;  %v2583_v14 = vmul.f32 %v2582_v33, %v2573_v37  ;;  %vm2591_vm3 = vcmp.lt.s32.totalorder %v5374_v38, 2  ;;  %v2727_v48 = vsel %vm5363_vm14, 0, %v5393_v18 }
 0x2bb   : > { %v2705_v27 = vsel %vm2703_vm0, %v2704_v53, %v5376_v31  ;;  %v2785_v24 = vshrl.u32 %v3656_v39, %v2770_v6  ;;  %vm2588_vm4 = vweird.f32 %v5143_v22  ;;  %v2771_v63 = vshrl.u32 %v3651_v23, %v2770_v6 }
 0x2bc   : > { %v2577_v41 = vadd.f32 -0.4999988, %v2576_v1  ;;  %v2584_v57 = vadd.f32 -0.16666654, %v2583_v14  ;;  %v2706_v44 = vclz %v2705_v27  ;;  %v2781_v5 = vshll.u32 %v3654_v16, %v2769_v60 }
 0x2bd   : > { %v2784_v21 = vshll.u32 %v3655_v58, %v2769_v60  ;;  %v2777_v45 = vor.u32 %v2776_v9, %v2775_v42  ;;  %v2780_v15 = vor.u32 %v2779_v54, %v2778_v61  ;;  %vm2787_vm8 = vcmp.lt.s32.totalorder %v5380_v43, 1 }
 0x2be   : > { %v2578_v12 = vmul.f32 %v2577_v41, %v2573_v37  ;;  %v2585_v35 = vmul.f32 %v2584_v57, %v2573_v37  ;;  %v3510_v13 = vadd.s32 4294967294, %v2706_v44  ;;  %v2774_v37 = vor.u32 %v2773_v52, %v2772_v7 }
 0x2bf   : > { %v2783_v10 = vor.u32 %v2782_v11, %v2781_v5  ;;  %v2786_v3 = vor.u32 %v2785_v24, %v2784_v21  ;;  %vm2788_vm6 = vcmp.lt.s32.totalorder %v5380_v43, 2  ;;  %vm2789_vm7 = vcmp.lt.s32.totalorder %v5380_v43, 3 }
 0x2c0   : > { %v2579_v25 = vadd.f32 1.0, %v2578_v12  ;;  %v2586_v20 = vadd.f32 1.0, %v2585_v35  ;;  %vm3511_vm5 = vcmp.lt.s32.totalorder %v3510_v13, 0  ;;  %vm2790_vm9 = vcmp.lt.s32.totalorder %v5380_v43, 4 }
 0x2c1   : > { %v2709_v51 = vsel %vm3511_vm5, 0, %v3510_v13  ;;  %v2795_v1 = vsel %vm2787_vm8, %v2774_v37, %v2777_v45  ;;  %v2796_v18 = vsel %vm2790_vm9, %v2783_v10, 920167782  ;;  %v2792_v52 = vsel %vm2790_vm9, %v2780_v15, 2102212464 }
 0x2c2   : > { %v2587_v0 = vmul.f32 %v2586_v20, %v5357_v28  ;;  %v2596_v19 = vxor.u32 2147483648, %v2579_v25  ;;  %v2710_v32 = vsub.s32 32, %v2709_v51  ;;  %v2714_v6 = vsub.s32 4294967266, %v2709_v51 }
 0x2c3   : > { %v2711_v33 = vshll.u32 %v5376_v31, %v2709_v51  ;;  %v2797_v42 = vsel %vm2789_vm7, %v2780_v15, %v2796_v18  ;;  %v2799_v31 = vsel %vm2787_vm8, %v2777_v45, %v2780_v15  ;;  %v2800_v44 = vsel %vm2790_vm9, %v2786_v3, 1326507024 }
 0x2c4   : > { %v2593_v60 = vxor.u32 2147483648, %v2587_v0  ;;  %v2597_v28 = vsel %vm2595_vm1, %v2596_v19, %v2587_v0  ;;  %v2712_v14 = vshrl.u32 %v2694_v40, %v2710_v32  ;;  %v2715_v53 = vadd.s32 127, %v2714_v6 }
 0x2c5   : > { %v2798_v40 = vsel %vm2788_vm6, %v2795_v1, %v2797_v42  ;;  %v2791_v12 = vsel %vm2787_vm8, %v2771_v63, %v2774_v37  ;;  %v2793_v38 = vsel %vm2789_vm7, %v2777_v45, %v2792_v52  ;;  %v2801_v35 = vsel %vm2789_vm7, %v2783_v10, %v2800_v44 }
 0x2c6   : > { %v2594_v7 = vsel %vm2592_vm2, %v2579_v25, %v2593_v60  ;;  %v2713_v57 = vor.u32 %v2712_v14, %v2711_v33  ;;  %v2716_v27 = vshll.u32 %v2715_v53, 23  ;;  %v2828_v61 = vand.u32 65535, %v2798_v40 }
 0x2c7   : > { %v2598_v41 = vsel %vm2591_vm3, %v2594_v7, %v2597_v28  ;;  %v2829_v54 = vshrl.u32 %v2798_v40, 16  ;;  %v2802_v24 = vsel %vm2788_vm6, %v2799_v31, %v2801_v35  ;;  %v2920_v5 = vadd.s32 1, %v5378_v2 }
 0x2c8   : > { %v2599_v9 = vsel %vm2588_vm4, nan, %v2598_v41  ;;  %v2717_v11 = vor.u32 4788187, %v2716_v27  ;;  %v2832_v13 = vmul.u32 %v2828_v61, %v5386_v30  ;;  %v2720_v25 = vcvt.s32.f32 %v2713_v57 }
 0x2c9   : > { %3385 = vst [vmem:[%s4352_s20 + $0x50] sm:$0xff] %v2599_v9  ;;  %v2831_v22 = vmul.u32 %v2829_v54, %v5383_v62  ;;  %v2806_v20 = vand.u32 65535, %v2802_v24  ;;  %v2807_v15 = vshrl.u32 %v2802_v24, 16  ;;  %v5448_v63 = vadd.s32 3, %v2727_v48 }
 0x2ca   : > { %v2718_v21 = vand.u32 2147483647, %v2717_v11  ;;  %v5452_v37 = vsel %vm2788_vm6, %v2791_v12, %v2793_v38  ;;  %v2830_v45 = vmul.u32 %v2828_v61, %v5383_v62  ;;  %v2833_v2 = vmul.u32 %v2829_v54, %v5386_v30 }
 0x2cb   : > { %v2834_v10 = vshll.u32 %v2831_v22, 16  ;;  %v2809_v0 = vmul.u32 %v2807_v15, %v5383_v62  ;;  %v2810_v19 = vmul.u32 %v2806_v20, %v5386_v30  ;;  %v2835_v51 = vshrl.u32 %v2831_v22, 16 }
 0x2cc   : > { %v2721_v3 = vmul.f32 %v2720_v25, %v2718_v21  ;;  %v2836_v32 = vshll.u32 %v2832_v13, 16  ;;  %v2808_v60 = vmul.u32 %v2806_v20, %v5383_v62  ;;  %vm2921_vm11 = vcmp.gt.s32.totalorder %v2920_v5, 0 }
 0x2cd   : > { %vm2838_vm10 = vc.u32 %v2830_v45, %v2834_v10  ;;  %v2840_v6 = vadd.s32 %v2834_v10, %v2830_v45  ;;  %v2812_v43 = vshll.u32 %v2809_v0, 16  ;;  %v2811_v33 = vmul.u32 %v2807_v15, %v5386_v30 }
 0x2ce   : > { %v2722_v48 = vxor.u32 2147483648, %v2721_v3  ;;  %v2814_v1 = vshll.u32 %v2810_v19, 16  ;;  %v2839_v28 = vsel %vm2838_vm10, 1, %v3657_v47  ;;  %v2922_v42 = vsel %vm2921_vm11, %v2920_v5, 0 }
 0x2cf   : > { %vm2842_vm12 = vc.u32 %v2840_v6, %v2836_v32  ;;  %vm2816_vm13 = vc.u32 %v2808_v60, %v2812_v43  ;;  %v2818_v53 = vadd.s32 %v2812_v43, %v2808_v60  ;;  %v2841_v18 = vadd.s32 %v2839_v28, %v2833_v2 }
 0x2d0   : > { %v2723_v14 = vsel %vm2602_vm15, %v2722_v48, %v2721_v3  ;;  %v2817_v62 = vsel %vm2816_vm13, 1, %v3657_v47  ;;  %v2843_v52 = vsel %vm2842_vm12, 1, %v3657_v47  ;;  %v2813_v57 = vshrl.u32 %v2809_v0, 16 }
 0x2d1   : > { %v2726_v7 = vsel %vm5363_vm14, %v5150_v4, %v2723_v14  ;;  %v2819_v31 = vadd.s32 %v2817_v62, %v2811_v33  ;;  %vm2820_vm0 = vc.u32 %v2818_v53, %v2814_v1  ;;  %v2845_v41 = vadd.s32 %v2843_v52, %v2841_v18 }
 0x2d2   : > { %v2728_v30 = vmul.f32 %v2726_v7, %v2726_v7  ;;  %v2821_v27 = vsel %vm2820_vm0, 1, %v3657_v47  ;;  %v2837_v40 = vshrl.u32 %v2832_v13, 16  ;;  %v2924_v9 = vand.u32 31, %v2922_v42 }
 0x2d3   : > { %v2823_v54 = vadd.s32 %v2821_v27, %v2819_v31  ;;  %v2846_v11 = vadd.s32 %v2845_v41, %v2835_v51  ;;  %v2815_v34 = vshrl.u32 %v2810_v19, 16  ;;  %v5469_v12 = vadd.s32 %v2840_v6, %v2836_v32 }
 0x2d4   : > { %v2729_v44 = vmul.f32 -0.001358992, %v2728_v30  ;;  %v2736_v61 = vmul.f32 -0.00019511016, %v2728_v30  ;;  %v2848_v38 = vmul.u32 %v5367_v59, %v5452_v37  ;;  %v5473_v35 = vsub.s32 32, %v2924_v9 }
 0x2d5   : > { %v2824_v5 = vadd.s32 %v2823_v54, %v2813_v57  ;;  %v2847_v21 = vadd.s32 %v2846_v11, %v2837_v40  ;;  %v5475_v25 = vshrl.u32 %v2922_v42, 5  ;;  %v2927_v13 = vshll.u32 %v3651_v23, %v2924_v9 }
 0x2d6   : > { %v2730_v24 = vadd.f32 0.041655596, %v2729_v44  ;;  %v2737_v22 = vadd.f32 0.008332121, %v2736_v61  ;;  %v2928_v20 = vshrl.u32 %v3652_v36, %v5473_v35  ;;  %v2931_v15 = vshrl.u32 %v3653_v46, %v5473_v35 }
 0x2d7   : > { %v5482_v3 = vadd.s32 %v2824_v5, %v2815_v34  ;;  %v2851_v59 = vadd.s32 1, %v2847_v21  ;;  %v2930_v0 = vshll.u32 %v3652_v36, %v2924_v9  ;;  %v2933_v19 = vshll.u32 %v3653_v46, %v2924_v9 }
 0x2d8   : > { %v2731_v45 = vmul.f32 %v2730_v24, %v2728_v30  ;;  %v2738_v10 = vmul.f32 %v2737_v22, %v2728_v30  ;;  %v5484_v37 = vor.u32 %v2928_v20, %v2927_v13  ;;  %v2934_v2 = vshrl.u32 %v3654_v16, %v5473_v35 }
 0x2d9   : > { %vm2850_vm14 = vc.u32 %v5482_v3, %v5469_v12  ;;  %v2936_v6 = vshll.u32 %v3654_v16, %v2924_v9  ;;  %v2937_v60 = vshrl.u32 %v3655_v58, %v5473_v35  ;;  %v2939_v43 = vshll.u32 %v3655_v58, %v2924_v9 }
 0x2da   : > { %v2732_v51 = vadd.f32 -0.4999988, %v2731_v45  ;;  %v2739_v32 = vadd.f32 -0.16666654, %v2738_v10  ;;  %v2852_v48 = vsel %vm2850_vm14, %v2851_v59, %v2847_v21  ;;  %v2940_v33 = vshrl.u32 %v3656_v39, %v5473_v35 }
 0x2db   : > { %v2853_v14 = vadd.s32 %v2852_v48, %v2848_v38  ;;  %v5498_v53 = vor.u32 %v2931_v15, %v2930_v0  ;;  %vm2743_vm15 = vweird.f32 %v5150_v4  ;;  %v2745_v18 = vand.u32 3, %v5448_v63 }
 0x2dc   : > { %v2733_v1 = vmul.f32 %v2732_v51, %v2728_v30  ;;  %v2740_v28 = vmul.f32 %v2739_v32, %v2728_v30  ;;  %v5502_v62 = vor.u32 %v2934_v2, %v2933_v19  ;;  %v2938_v52 = vor.u32 %v2937_v60, %v2936_v6  ;;  %v592_v2 = vpop.f32.mrf.mxu2 }
 0x2dd   : > { %v2941_v42 = vor.u32 %v2940_v33, %v2939_v43  ;;  %v2854_v57 = vadd.s32 536870912, %v2853_v14  ;;  %vm2945_vm1 = vcmp.lt.s32.totalorder %v5475_v25, 4  ;;  %vm2942_vm2 = vcmp.lt.s32.totalorder %v5475_v25, 1  ;;  %v708_v33 = vpop.f32.mrf.mxu3 }
 0x2de   : > { %v2734_v31 = vadd.f32 1.0, %v2733_v1  ;;  %v2741_v41 = vadd.f32 1.0, %v2740_v28  ;;  %vm2944_vm3 = vcmp.lt.s32.totalorder %v5475_v25, 3  ;;  %v2951_v30 = vsel %vm2945_vm1, %v2938_v52, 920167782 }
 0x2df   : > { %v5511_v27 = vshll.u32 %v2918_v26, 8  ;;  %v5513_v9 = vshrl.u32 %v2854_v57, 30  ;;  %v2950_v44 = vsel %vm2942_vm2, %v5484_v37, %v5498_v53  ;;  %vm2746_vm4 = vcmp.lt.s32.totalorder %v2745_v18, 2 }
 0x2e0   : > { %v2742_v63 = vmul.f32 %v2741_v41, %v2726_v7  ;;  %v2751_v40 = vxor.u32 2147483648, %v2734_v31  ;;  %v2952_v61 = vsel %vm2944_vm3, %v5502_v62, %v2951_v30  ;;  %v2954_v8 = vsel %vm2942_vm2, %v5498_v53, %v5502_v62 }
 0x2e1   : > { %v2955_v26 = vsel %vm2945_vm1, %v2941_v42, 1326507024  ;;  %vm2750_vm5 = vcmp.eq.s32.totalorder %v2745_v18, 2  ;;  %v2856_v54 = vshll.u32 %v5513_v9, 30  ;;  %vm2943_vm8 = vcmp.lt.s32.totalorder %v5475_v25, 2 }
 0x2e2   : > { %v2748_v7 = vxor.u32 2147483648, %v2742_v63  ;;  %vm2747_vm6 = vcmp.eq.s32.totalorder %v2745_v18, 0  ;;  %v2752_v11 = vsel %vm2750_vm5, %v2751_v40, %v2742_v63  ;;  %v2953_v34 = vsel %vm2943_vm8, %v2950_v44, %v2952_v61 }
 0x2e3   : > { %v2956_v38 = vsel %vm2944_vm3, %v2938_v52, %v2955_v26  ;;  %v2857_v22 = vsub.s32 %v2853_v14, %v2856_v54  ;;  %v2959_v21 = vand.u32 65535, %v5511_v27  ;;  %v2960_v20 = vshrl.u32 %v5511_v27, 16  ;;  %v803_v52 = vpop.f32.mrf.mxu0 }
 0x2e4   : > { %v2749_v24 = vsel %vm2747_vm6, %v2734_v31, %v2748_v7  ;;  %v2957_v5 = vsel %vm2943_vm8, %v2954_v8, %v2956_v38  ;;  %v2983_v32 = vand.u32 65535, %v2953_v34  ;;  %v2984_v6 = vshrl.u32 %v2953_v34, 16 }
 0x2e5   : > { %v2753_v13 = vsel %vm2746_vm4, %v2749_v24, %v2752_v11  ;;  %v2961_v15 = vand.u32 65535, %v2957_v5  ;;  %v2962_v45 = vshrl.u32 %v2957_v5, 16  ;;  %vm2858_vm7 = vcmp.lt.s32.totalorder %v2857_v22, 0  ;;  %v888_v11 = vpop.f32.mrf.mxu1 }
 0x2e6   : > { %v2754_v10 = vsel %vm2743_vm15, nan, %v2753_v13  ;;  %v2859_v59 = vsub.s32 0, %v2857_v22  ;;  %v2926_v1 = vshrl.u32 %v3651_v23, %v5473_v35  ;;  %v2849_v42 = vadd.s32 %v5469_v12, %v5482_v3 }
 0x2e7   : > { %3386 = vst [vmem:[%s4352_s20 + $0x58] sm:$0xff] %v2754_v10  ;;  %v2964_v0 = vmul.u32 %v2962_v45, %v2959_v21  ;;  %v2965_v19 = vmul.u32 %v2961_v15, %v2960_v20  ;;  %v2963_v60 = vmul.u32 %v2961_v15, %v2959_v21  ;;  %v2966_v28 = vmul.u32 %v2962_v45, %v2960_v20  ;;  %v597_v15 = vpop.f32.mrf.mxu2 }
 0x2e8   : > { %v2860_v51 = vsel %vm2858_vm7, %v2859_v59, %v2857_v22  ;;  %v2986_v41 = vmul.u32 %v2984_v6, %v2959_v21  ;;  %v2987_v57 = vmul.u32 %v2983_v32, %v2960_v20  ;;  %v2985_v44 = vmul.u32 %v2983_v32, %v2959_v21 }
 0x2e9   : > { %v2861_v48 = vclz %v2860_v51  ;;  %v2967_v43 = vshll.u32 %v2964_v0, 16  ;;  %v2969_v4 = vshll.u32 %v2965_v19, 16  ;;  %v2968_v30 = vshrl.u32 %v2964_v0, 16  ;;  %v714_v51 = vpop.f32.mrf.mxu3 }
 0x2ea   : > { %v2989_v61 = vshll.u32 %v2986_v41, 16  ;;  %v2988_v54 = vmul.u32 %v2984_v6, %v2960_v20  ;;  %v2991_v12 = vshll.u32 %v2987_v57, 16  ;;  %v2946_v21 = vsel %vm2942_vm2, %v2926_v1, %v5484_v37 }
 0x2eb   : > { %v3513_v14 = vadd.s32 4294967294, %v2861_v48  ;;  %vm2971_vm9 = vc.u32 %v2963_v60, %v2967_v43  ;;  %v2973_v18 = vadd.s32 %v2967_v43, %v2963_v60  ;;  %v2947_v45 = vsel %vm2945_vm1, %v5502_v62, 2102212464 }
 0x2ec   : > { %v2972_v31 = vsel %vm2971_vm9, 1, %v3657_v47  ;;  %vm2993_vm12 = vc.u32 %v2985_v44, %v2989_v61  ;;  %v2995_v3 = vadd.s32 %v2989_v61, %v2985_v44  ;;  %v2970_v59 = vshrl.u32 %v2965_v19, 16 }
 0x2ed   : > { %vm3514_vm10 = vcmp.lt.s32.totalorder %v3513_v14, 0  ;;  %v2974_v63 = vadd.s32 %v2972_v31, %v2966_v28  ;;  %vm2975_vm11 = vc.u32 %v2973_v18, %v2969_v4  ;;  %v2994_v13 = vsel %vm2993_vm12, 1, %v3657_v47  ;;  %v807_v28 = vpop.f32.mrf.mxu0 }
 0x2ee   : > { %v2864_v40 = vsel %vm3514_vm10, 0, %v3513_v14  ;;  %v2976_v35 = vsel %vm2975_vm11, 1, %v3657_v47  ;;  %v2996_v20 = vadd.s32 %v2994_v13, %v2988_v54  ;;  %vm2997_vm13 = vc.u32 %v2995_v3, %v2991_v12 }
 0x2ef   : > { %v2865_v8 = vsub.s32 32, %v2864_v40  ;;  %v2869_v26 = vsub.s32 4294967266, %v2864_v40  ;;  %v2978_v7 = vadd.s32 %v2976_v35, %v2974_v63  ;;  %v2866_v34 = vshll.u32 %v2857_v22, %v2864_v40 }
 0x2f0   : > { %v2998_v0 = vsel %vm2997_vm13, 1, %v3657_v47  ;;  %v2990_v32 = vshrl.u32 %v2986_v41, 16  ;;  %v593_v48 = vadd.f32 %v592_v2, %v4068_v49  ;;  %v598_v60 = vadd.f32 %v597_v15, %v4081_v50 }
 0x2f1   : > { %v2867_v38 = vshrl.u32 %v2849_v42, %v2865_v8  ;;  %v2870_v24 = vadd.s32 127, %v2869_v26  ;;  %v2979_v5 = vadd.s32 %v2978_v7, %v2968_v30  ;;  %v3000_v6 = vadd.s32 %v2998_v0, %v2996_v20 }
 0x2f2   : > { %v2879_v37 = vsub.s32 4, %v5513_v9  ;;  %v2948_v62 = vsel %vm2944_vm3, %v5498_v53, %v2947_v45  ;;  %v2992_v19 = vshrl.u32 %v2987_v57, 16  ;;  %v709_v4 = vadd.f32 %v708_v33, %v593_v48  ;;  %v892_v57 = vpop.f32.mrf.mxu1 }
 0x2f3   : > { %v2868_v22 = vor.u32 %v2867_v38, %v2866_v34  ;;  %v2871_v10 = vshll.u32 %v2870_v24, 23  ;;  %v5562_v1 = vadd.s32 %v2979_v5, %v2970_v59  ;;  %v3001_v14 = vadd.s32 %v3000_v6, %v2990_v32 }
 0x2f4   : > { %v715_v18 = vadd.f32 %v714_v51, %v598_v60  ;;  %v5564_v41 = vadd.s32 %v2995_v3, %v2991_v12  ;;  %v2949_v49 = vsel %vm2943_vm8, %v2946_v21, %v2948_v62  ;;  %v804_v2 = vadd.f32 %v803_v52, %v709_v4 }
 0x2f5   : > { %v2872_v43 = vor.u32 4788187, %v2871_v10  ;;  %v2875_v31 = vcvt.s32.f32 %v2868_v22  ;;  %v3002_v50 = vadd.s32 %v3001_v14, %v2992_v19  ;;  %vm2757_vm0 = vcmp.lt.s32.totalorder %v5335_v56, 0 }
 0x2f6   : > { %v808_v30 = vadd.f32 %v807_v28, %v715_v18  ;;  %vm3005_vm14 = vc.u32 %v5562_v1, %v5564_v41  ;;  %v2880_v33 = vsel %vm2757_vm0, %v2879_v37, %v5513_v9  ;;  %v5572_v40 = vadd.f32 %v888_v11, %v804_v2 }
 0x2f7   : > { %v2873_v42 = vand.u32 2147483647, %v2872_v43  ;;  %v3006_v63 = vadd.s32 1, %v3002_v50  ;;  %vm2756_vm15 = vcmp.le.f32.partialorder %v2755_v29, 0.7853982  ;;  %v3003_v35 = vmul.u32 %v5511_v27, %v2949_v49 }
 0x2f8   : > { %v3065_v44 = vand.u32 2147483647, %v5572_v40  ;;  %v3068_v61 = vand.u32 2139095040, %v5572_v40  ;;  %v5579_v8 = vadd.f32 %v892_v57, %v808_v30  ;;  %v2882_v7 = vsel %vm2756_vm15, 0, %v2880_v33 }
 0x2f9   : > { %v2876_v53 = vmul.f32 %v2875_v31, %v2873_v42  ;;  %v3007_v52 = vsel %vm3005_vm14, %v3006_v63, %v3002_v50  ;;  %v2899_v3 = vadd.s32 3, %v2882_v7  ;;  %vm2912_vm1 = vcmp.lt.s32.totalorder %v5342_v17, 0 }
 0x2fa   : > { %v3008_v54 = vadd.s32 %v3007_v52, %v3003_v35  ;;  %v3069_v11 = vshrl.u32 %v3068_v61, 23  ;;  %v3072_v34 = vand.u32 8388607, %v3065_v44  ;;  %v3223_v38 = vand.u32 2139095040, %v5579_v8 }
 0x2fb   : > { %v2877_v25 = vxor.u32 2147483648, %v2876_v53  ;;  %v3220_v45 = vand.u32 2147483647, %v5579_v8  ;;  %v2900_v51 = vand.u32 3, %v2899_v3  ;;  %vm5593_vm3 = vcmp.le.f32.partialorder %v2910_v55, 0.7853982 }
 0x2fc   : > { %v3009_v12 = vadd.s32 536870912, %v3008_v54  ;;  %v3518_v27 = vadd.s32 4294967169, %v3069_v11  ;;  %v3073_v15 = vor.u32 8388608, %v3072_v34  ;;  %v3224_v20 = vshrl.u32 %v3223_v38, 23 }
 0x2fd   : > { %v2878_v26 = vsel %vm2757_vm0, %v2877_v25, %v2876_v53  ;;  %v5601_v19 = vand.u32 8388607, %v3220_v45  ;;  %vm2902_vm5 = vcmp.eq.s32.totalorder %v2900_v51, 0  ;;  %vm2905_vm8 = vcmp.eq.s32.totalorder %v2900_v51, 2 }
 0x2fe   : > { %v2881_v9 = vsel %vm2756_vm15, %v5335_v56, %v2878_v26  ;;  %v3010_v13 = vshrl.u32 %v3009_v12, 30  ;;  %v3075_v21 = vadd.s32 1, %v3518_v27  ;;  %v3521_v32 = vadd.s32 4294967169, %v3224_v20 }
 0x2ff   : > { %v2883_v29 = vmul.f32 %v2881_v9, %v2881_v9  ;;  %v5597_v28 = vshll.u32 %v3073_v15, 8  ;;  %vm2901_vm6 = vcmp.lt.s32.totalorder %v2900_v51, 2  ;;  %v3004_v2 = vadd.s32 %v5564_v41, %v5562_v1 }
 0x300   : > { %v3011_v59 = vshll.u32 %v3010_v13, 30  ;;  %v3034_v0 = vsub.s32 4, %v3010_v13  ;;  %vm3076_vm2 = vcmp.gt.s32.totalorder %v3075_v21, 0  ;;  %v3230_v31 = vadd.s32 1, %v3521_v32 }
 0x301   : > { %v2884_v24 = vmul.f32 -0.001358992, %v2883_v29  ;;  %v2891_v5 = vmul.f32 -0.00019511016, %v2883_v29  ;;  %v3077_v62 = vsel %vm3076_vm2, %v3075_v21, 0  ;;  %vm2898_vm7 = vweird.f32 %v5335_v56 }
 0x302   : > { %v5587_v60 = vsub.s32 %v3008_v54, %v3011_v59  ;;  %v3035_v43 = vsel %vm2912_vm1, %v3034_v0, %v3010_v13  ;;  %v3079_v42 = vand.u32 31, %v3077_v62  ;;  %v5612_v33 = vand.u32 65535, %v5597_v28 }
 0x303   : > { %v2885_v22 = vadd.f32 0.041655596, %v2884_v24  ;;  %v2892_v10 = vadd.f32 0.008332121, %v2891_v5  ;;  %v3037_v55 = vsel %vm5593_vm3, 0, %v3035_v43  ;;  %v3228_v63 = vor.u32 8388608, %v5601_v19 }
 0x304   : > { %vm3013_vm4 = vcmp.lt.s32.totalorder %v5587_v60, 0  ;;  %v3014_v18 = vsub.s32 0, %v5587_v60  ;;  %v3080_v57 = vsub.s32 32, %v3079_v42  ;;  %v3054_v52 = vadd.s32 3, %v3037_v55 }
 0x305   : > { %v2886_v6 = vmul.f32 %v2885_v22, %v2883_v29  ;;  %v2893_v48 = vmul.f32 %v2892_v10, %v2883_v29  ;;  %v5615_v61 = vshrl.u32 %v3077_v62, 5  ;;  %v3082_v7 = vshll.u32 %v3651_v23, %v3079_v42 }
 0x306   : > { %v3015_v30 = vsel %vm3013_vm4, %v3014_v18, %v5587_v60  ;;  %v3085_v1 = vshll.u32 %v3652_v36, %v3079_v42  ;;  %vm3231_vm9 = vcmp.gt.s32.totalorder %v3230_v31, 0  ;;  %v3083_v11 = vshrl.u32 %v3652_v36, %v3080_v57 }
 0x307   : > { %v2887_v14 = vadd.f32 -0.4999988, %v2886_v6  ;;  %v2894_v4 = vadd.f32 -0.16666654, %v2893_v48  ;;  %v3016_v53 = vclz %v3015_v30  ;;  %v3088_v34 = vshll.u32 %v3653_v46, %v3079_v42 }
 0x308   : > { %v3089_v12 = vshrl.u32 %v3654_v16, %v3080_v57  ;;  %v3091_v3 = vshll.u32 %v3654_v16, %v3079_v42  ;;  %v3084_v5 = vor.u32 %v3083_v11, %v3082_v7  ;;  %v3092_v10 = vshrl.u32 %v3655_v58, %v3080_v57 }
 0x309   : > { %v2888_v49 = vmul.f32 %v2887_v14, %v2883_v29  ;;  %v2895_v50 = vmul.f32 %v2894_v4, %v2883_v29  ;;  %v3516_v26 = vadd.s32 4294967294, %v3016_v53  ;;  %v3086_v29 = vshrl.u32 %v3653_v46, %v3080_v57 }
 0x30a   : > { %v3090_v22 = vor.u32 %v3089_v12, %v3088_v34  ;;  %v3094_v59 = vshll.u32 %v3655_v58, %v3079_v42  ;;  %v3095_v48 = vshrl.u32 %v3656_v39, %v3080_v57  ;;  %v3093_v62 = vor.u32 %v3092_v10, %v3091_v3 }
 0x30b   : > { %v2889_v25 = vadd.f32 1.0, %v2888_v49  ;;  %v2896_v35 = vadd.f32 1.0, %v2895_v50  ;;  %vm3517_vm10 = vcmp.lt.s32.totalorder %v3516_v26, 0  ;;  %v3087_v21 = vor.u32 %v3086_v29, %v3085_v1 }
 0x30c   : > { %v3019_v24 = vsel %vm3517_vm10, 0, %v3516_v26  ;;  %v3232_v14 = vsel %vm3231_vm9, %v3230_v31, 0  ;;  %v3096_v55 = vor.u32 %v3095_v48, %v3094_v59  ;;  %vm3097_vm11 = vcmp.lt.s32.totalorder %v5615_v61, 1 }
 0x30d   : > { %v2897_v41 = vmul.f32 %v2896_v35, %v2881_v9  ;;  %v2906_v54 = vxor.u32 2147483648, %v2889_v25  ;;  %v3020_v13 = vsub.s32 32, %v3019_v24  ;;  %v3021_v9 = vshll.u32 %v5587_v60, %v3019_v24 }
 0x30e   : > { %v3024_v15 = vsub.s32 4294967266, %v3019_v24  ;;  %v3081_v60 = vshrl.u32 %v3651_v23, %v3080_v57  ;;  %vm3098_vm12 = vcmp.lt.s32.totalorder %v5615_v61, 2  ;;  %vm3099_vm13 = vcmp.lt.s32.totalorder %v5615_v61, 3 }
 0x30f   : > { %v2903_v27 = vxor.u32 2147483648, %v2897_v41  ;;  %v2907_v38 = vsel %vm2905_vm8, %v2906_v54, %v2897_v41  ;;  %v3022_v32 = vshrl.u32 %v3004_v2, %v3020_v13  ;;  %vm3100_vm0 = vcmp.lt.s32.totalorder %v5615_v61, 4 }
 0x310   : > { %v3025_v6 = vadd.s32 127, %v3024_v15  ;;  %v3105_v51 = vsel %vm3097_vm11, %v3084_v5, %v3087_v21  ;;  %v3102_v42 = vsel %vm3100_vm0, %v3090_v22, 2102212464  ;;  %v3106_v49 = vsel %vm3100_vm0, %v3093_v62, 920167782 }
 0x311   : > { %v2904_v20 = vsel %vm2902_vm5, %v2889_v25, %v2903_v27  ;;  %v3023_v4 = vor.u32 %v3022_v32, %v3021_v9  ;;  %v3109_v50 = vsel %vm3097_vm11, %v3087_v21, %v3090_v22  ;;  %v3101_v30 = vsel %vm3097_vm11, %v3081_v60, %v3084_v5 }
 0x312   : > { %v2908_v0 = vsel %vm2901_vm6, %v2904_v20, %v2907_v38  ;;  %v3026_v18 = vshll.u32 %v3025_v6, 23  ;;  %v3107_v31 = vsel %vm3099_vm13, %v3090_v22, %v3106_v49  ;;  %v3110_v53 = vsel %vm3100_vm0, %v3096_v55, 1326507024 }
 0x313   : > { %v2909_v43 = vsel %vm2898_vm7, nan, %v2908_v0  ;;  %v3030_v2 = vcvt.s32.f32 %v3023_v4  ;;  %v3103_v25 = vsel %vm3099_vm13, %v3087_v21, %v3102_v42  ;;  %v3108_v35 = vsel %vm3098_vm12, %v3105_v51, %v3107_v31 }
 0x314   : > { %3387 = vst [vmem:[%s4352_s20 + $0x60] sm:$0xff] %v2909_v43  ;;  %v3027_v56 = vor.u32 4788187, %v3026_v18  ;;  %v3111_v26 = vsel %vm3099_vm13, %v3093_v62, %v3110_v53  ;;  %v3115_v1 = vshrl.u32 %v5597_v28, 16  ;;  %v3138_v41 = vand.u32 65535, %v3108_v35 }
 0x315   : > { %v3112_v7 = vsel %vm3098_vm12, %v3109_v50, %v3111_v26  ;;  %v3139_v54 = vshrl.u32 %v3108_v35, 16  ;;  %v5645_v34 = vand.u32 3, %v3054_v52  ;;  %v5649_v3 = vsel %vm3098_vm12, %v3101_v30, %v3103_v25 }
 0x316   : > { %v3028_v57 = vand.u32 2147483647, %v3027_v56  ;;  %v3116_v29 = vand.u32 65535, %v3112_v7  ;;  %v3117_v12 = vshrl.u32 %v3112_v7, 16  ;;  %v3142_v38 = vmul.u32 %v3138_v41, %v3115_v1 }
 0x317   : > { %v3141_v27 = vmul.u32 %v3139_v54, %v5612_v33  ;;  %v5652_v24 = vshrl.u32 %v3232_v14, 5  ;;  %v3234_v15 = vand.u32 31, %v3232_v14  ;;  %v3140_v52 = vmul.u32 %v3138_v41, %v5612_v33 }
 0x318   : > { %v3031_v11 = vmul.f32 %v3030_v2, %v3028_v57  ;;  %v3119_v13 = vmul.u32 %v3117_v12, %v5612_v33  ;;  %v3120_v9 = vmul.u32 %v3116_v29, %v3115_v1  ;;  %v3118_v21 = vmul.u32 %v3116_v29, %v5612_v33 }
 0x319   : > { %v3143_v20 = vmul.u32 %v3139_v54, %v3115_v1  ;;  %v3144_v22 = vshll.u32 %v3141_v27, 16  ;;  %v3121_v10 = vmul.u32 %v3117_v12, %v3115_v1  ;;  %v3145_v0 = vshrl.u32 %v3141_v27, 16 }
 0x31a   : > { %v3032_v5 = vxor.u32 2147483648, %v3031_v11  ;;  %v3122_v59 = vshll.u32 %v3119_v13, 16  ;;  %v3124_v6 = vshll.u32 %v3120_v9, 16  ;;  %v3146_v48 = vshll.u32 %v3142_v38, 16 }
 0x31b   : > { %vm3148_vm14 = vc.u32 %v3140_v52, %v3144_v22  ;;  %v3150_v14 = vadd.s32 %v3144_v22, %v3140_v52  ;;  %v5664_v18 = vsub.s32 32, %v3234_v15  ;;  %v3123_v37 = vshrl.u32 %v3119_v13, 16 }
 0x31c   : > { %v3033_v61 = vsel %vm2912_vm1, %v3032_v5, %v3031_v11  ;;  %vm3126_vm15 = vc.u32 %v3118_v21, %v3122_v59  ;;  %v3128_v60 = vadd.s32 %v3122_v59, %v3118_v21  ;;  %v3149_v33 = vsel %vm3148_vm14, 1, %v3657_v47 }
 0x31d   : > { %v3036_v32 = vsel %vm5593_vm3, %v5342_v17, %v3033_v61  ;;  %v3127_v62 = vsel %vm3126_vm15, 1, %v3657_v47  ;;  %v3151_v4 = vadd.s32 %v3149_v33, %v3143_v20  ;;  %v3125_v42 = vshrl.u32 %v3120_v9, 16 }
 0x31e   : > { %v3038_v43 = vmul.f32 %v3036_v32, %v3036_v32  ;;  %v3129_v56 = vadd.s32 %v3127_v62, %v3121_v10  ;;  %vm3130_vm1 = vc.u32 %v3128_v60, %v3124_v6  ;;  %vm3152_vm2 = vc.u32 %v3150_v14, %v3146_v48 }
 0x31f   : > { %v3131_v49 = vsel %vm3130_vm1, 1, %v3657_v47  ;;  %v3153_v31 = vsel %vm3152_vm2, 1, %v3657_v47  ;;  %v3147_v53 = vshrl.u32 %v3142_v38, 16  ;;  %v3237_v25 = vshll.u32 %v3651_v23, %v3234_v15 }
 0x320   : > { %v3039_v55 = vmul.f32 -0.001358992, %v3038_v43  ;;  %v3046_v51 = vmul.f32 -0.00019511016, %v3038_v43  ;;  %v3133_v30 = vadd.s32 %v3131_v49, %v3129_v56  ;;  %v3155_v57 = vadd.s32 %v3153_v31, %v3151_v4 }
 0x321   : > { %v3238_v35 = vshrl.u32 %v3652_v36, %v5664_v18  ;;  %v3241_v41 = vshrl.u32 %v3653_v46, %v5664_v18  ;;  %v5673_v54 = vadd.s32 %v3150_v14, %v3146_v48  ;;  %v3240_v12 = vshll.u32 %v3652_v36, %v3234_v15 }
 0x322   : > { %v3040_v50 = vadd.f32 0.041655596, %v3039_v55  ;;  %v3047_v2 = vadd.f32 0.008332121, %v3046_v51  ;;  %v3134_v1 = vadd.s32 %v3133_v30, %v3123_v37  ;;  %v3156_v11 = vadd.s32 %v3155_v57, %v3145_v0 }
 0x323   : > { %v5675_v29 = vor.u32 %v3238_v35, %v3237_v25  ;;  %v3244_v13 = vshrl.u32 %v3654_v16, %v5664_v18  ;;  %v3243_v21 = vshll.u32 %v3653_v46, %v3234_v15  ;;  %v3246_v52 = vshll.u32 %v3654_v16, %v3234_v15 }
 0x324   : > { %v3041_v26 = vmul.f32 %v3040_v50, %v3038_v43  ;;  %v3048_v7 = vmul.f32 %v3047_v2, %v3038_v43  ;;  %v5678_v5 = vadd.s32 %v3134_v1, %v3125_v42  ;;  %v3157_v9 = vadd.s32 %v3156_v11, %v3147_v53 }
 0x325   : > { %v3247_v20 = vshrl.u32 %v3655_v58, %v5664_v18  ;;  %vm3056_vm3 = vcmp.lt.s32.totalorder %v5645_v34, 2  ;;  %v5689_v36 = vor.u32 %v3241_v41, %v3240_v12  ;;  %v3249_v0 = vshll.u32 %v3655_v58, %v3234_v15 }
 0x326   : > { %v3042_v27 = vadd.f32 -0.4999988, %v3041_v26  ;;  %v3049_v38 = vadd.f32 -0.16666654, %v3048_v7  ;;  %vm3160_vm4 = vc.u32 %v5678_v5, %v5673_v54  ;;  %v3161_v10 = vadd.s32 1, %v3157_v9 }
 0x327   : > { %v3248_v59 = vor.u32 %v3247_v20, %v3246_v52  ;;  %v3250_v46 = vshrl.u32 %v3656_v39, %v5664_v18  ;;  %v3158_v48 = vmul.u32 %v5597_v28, %v5649_v3  ;;  %vm3057_vm5 = vcmp.eq.s32.totalorder %v5645_v34, 0 }
 0x328   : > { %v3043_v22 = vmul.f32 %v3042_v27, %v3038_v43  ;;  %v3050_v61 = vmul.f32 %v3049_v38, %v3038_v43  ;;  %v5696_v43 = vor.u32 %v3244_v13, %v3243_v21  ;;  %v3162_v60 = vsel %vm3160_vm4, %v3161_v10, %v3157_v9 }
 0x329   : > { %v3251_v33 = vor.u32 %v3250_v46, %v3249_v0  ;;  %vm3252_vm8 = vcmp.lt.s32.totalorder %v5652_v24, 1  ;;  %v3163_v4 = vadd.s32 %v3162_v60, %v3158_v48  ;;  %vm3255_vm6 = vcmp.lt.s32.totalorder %v5652_v24, 4 }
 0x32a   : > { %v3044_v16 = vadd.f32 1.0, %v3043_v22  ;;  %v3051_v6 = vadd.f32 1.0, %v3050_v61  ;;  %vm3060_vm7 = vcmp.eq.s32.totalorder %v5645_v34, 2  ;;  %vm3253_vm9 = vcmp.lt.s32.totalorder %v5652_v24, 2 }
 0x32b   : > { %v3260_v58 = vsel %vm3252_vm8, %v5675_v29, %v5689_v36  ;;  %v3261_v39 = vsel %vm3255_vm6, %v3248_v59, 920167782  ;;  %v3164_v3 = vadd.s32 536870912, %v3163_v4  ;;  %vm3254_vm10 = vcmp.lt.s32.totalorder %v5652_v24, 3 }
 0x32c   : > { %v3052_v62 = vmul.f32 %v3051_v6, %v3036_v32  ;;  %v3061_v14 = vxor.u32 2147483648, %v3044_v16  ;;  %v3264_v15 = vsel %vm3252_vm8, %v5689_v36, %v5696_v43  ;;  %v3262_v55 = vsel %vm3254_vm10, %v5696_v43, %v3261_v39 }
 0x32d   : > { %v3265_v51 = vsel %vm3255_vm6, %v3251_v33, 1326507024  ;;  %v5721_v56 = vshll.u32 %v3228_v63, 8  ;;  %v5725_v42 = vshrl.u32 %v3164_v3, 30  ;;  %v3263_v49 = vsel %vm3253_vm9, %v3260_v58, %v3262_v55 }
 0x32e   : > { %v3058_v28 = vxor.u32 2147483648, %v3052_v62  ;;  %v3062_v32 = vsel %vm3060_vm7, %v3061_v14, %v3052_v62  ;;  %v3266_v50 = vsel %vm3254_vm10, %v3248_v59, %v3265_v51  ;;  %vm3053_vm11 = vweird.f32 %v5342_v17 }
 0x32f   : > { %v3267_v19 = vsel %vm3253_vm9, %v3264_v15, %v3266_v50  ;;  %v3166_v30 = vshll.u32 %v5725_v42, 30  ;;  %v3270_v31 = vshrl.u32 %v5721_v56, 16  ;;  %v3269_v57 = vand.u32 65535, %v5721_v56 }
 0x330   : > { %v3059_v37 = vsel %vm3057_vm5, %v3044_v16, %v3058_v28  ;;  %v3271_v53 = vand.u32 65535, %v3267_v19  ;;  %v3272_v25 = vshrl.u32 %v3267_v19, 16  ;;  %v3294_v35 = vshrl.u32 %v3263_v49, 16 }
 0x331   : > { %v3063_v2 = vsel %vm3056_vm3, %v3059_v37, %v3062_v32  ;;  %v3167_v26 = vsub.s32 %v3163_v4, %v3166_v30  ;;  %v3293_v1 = vand.u32 65535, %v3263_v49  ;;  %v3159_v4 = vadd.s32 %v5673_v54, %v5678_v5 }
 0x332   : > { %v3064_v63 = vsel %vm3053_vm11, nan, %v3063_v2  ;;  %v3275_v7 = vmul.u32 %v3271_v53, %v3270_v31  ;;  %v3274_v17 = vmul.u32 %v3272_v25, %v3269_v57  ;;  %v3273_v41 = vmul.u32 %v3271_v53, %v3269_v57 }
 0x333   : > { %3388 = vst [vmem:[%s4352_s20 + $0x68] sm:$0xff] %v3064_v63  ;;  %vm3168_vm12 = vcmp.lt.s32.totalorder %v3167_v26, 0  ;;  %v3169_v34 = vsub.s32 0, %v3167_v26  ;;  %v3296_v12 = vmul.u32 %v3294_v35, %v3269_v57  ;;  %v3276_v38 = vmul.u32 %v3272_v25, %v3270_v31 }
 0x334   : > { %v3277_v11 = vshll.u32 %v3274_v17, 16  ;;  %v3279_v13 = vshll.u32 %v3275_v7, 16  ;;  %v3295_v22 = vmul.u32 %v3293_v1, %v3269_v57  ;;  %v3297_v61 = vmul.u32 %v3293_v1, %v3270_v31 }
 0x335   : > { %v3170_v27 = vsel %vm3168_vm12, %v3169_v34, %v3167_v26  ;;  %v3299_v52 = vshll.u32 %v3296_v12, 16  ;;  %v3278_v0 = vshrl.u32 %v3274_v17, 16  ;;  %v3298_v16 = vmul.u32 %v3294_v35, %v3270_v31 }
 0x336   : > { %v3171_v9 = vclz %v3170_v27  ;;  %vm3281_vm13 = vc.u32 %v3273_v41, %v3277_v11  ;;  %v3283_v21 = vadd.s32 %v3277_v11, %v3273_v41  ;;  %v3301_v62 = vshll.u32 %v3297_v61, 16 }
 0x337   : > { %v3282_v20 = vsel %vm3281_vm13, 1, %v3657_v47  ;;  %vm3303_vm14 = vc.u32 %v3295_v22, %v3299_v52  ;;  %v3305_v60 = vadd.s32 %v3299_v52, %v3295_v22  ;;  %v3236_v3 = vshrl.u32 %v3651_v23, %v5664_v18 }
 0x338   : > { %v3519_v10 = vadd.s32 4294967294, %v3171_v9  ;;  %v3284_v59 = vadd.s32 %v3282_v20, %v3276_v38  ;;  %vm3285_vm0 = vc.u32 %v3283_v21, %v3279_v13  ;;  %v3304_v48 = vsel %vm3303_vm14, 1, %v3657_v47 }
 0x339   : > { %v3286_v46 = vsel %vm3285_vm0, 1, %v3657_v47  ;;  %v3306_v14 = vadd.s32 %v3304_v48, %v3298_v16  ;;  %v3257_v15 = vsel %vm3255_vm6, %v5696_v43, 2102212464  ;;  %v3280_v32 = vshrl.u32 %v3275_v7, 16 }
 0x33a   : > { %vm3520_vm15 = vcmp.lt.s32.totalorder %v3519_v10, 0  ;;  %v3288_v6 = vadd.s32 %v3286_v46, %v3284_v59  ;;  %vm3307_vm1 = vc.u32 %v3305_v60, %v3301_v62  ;;  %v3256_v54 = vsel %vm3252_vm8, %v3236_v3, %v5675_v29 }
 0x33b   : > { %v3174_v33 = vsel %vm3520_vm15, 0, %v3519_v10  ;;  %v3308_v49 = vsel %vm3307_vm1, 1, %v3657_v47  ;;  %v3300_v5 = vshrl.u32 %v3296_v12, 16  ;;  %v3258_v23 = vsel %vm3254_vm10, %v5689_v36, %v3257_v15 }
 0x33c   : > { %v3175_v58 = vsub.s32 32, %v3174_v33  ;;  %v3179_v39 = vsub.s32 4294967266, %v3174_v33  ;;  %v3289_v28 = vadd.s32 %v3288_v6, %v3278_v0  ;;  %v3176_v55 = vshll.u32 %v3167_v26, %v3174_v33 }
 0x33d   : > { %v3310_v50 = vadd.s32 %v3308_v49, %v3306_v14  ;;  %v3302_v43 = vshrl.u32 %v3297_v61, 16  ;;  %v3309_v31 = vadd.s32 %v3305_v60, %v3301_v62  ;;  %v3259_v47 = vsel %vm3253_vm9, %v3256_v54, %v3258_v23 }
 0x33e   : > { %v3177_v51 = vshrl.u32 %v3159_v4, %v3175_v58  ;;  %v3180_v37 = vadd.s32 127, %v3179_v39  ;;  %v3290_v18 = vadd.s32 %v3289_v28, %v3280_v32  ;;  %v3313_v26 = vmul.u32 %v5721_v56, %v3259_v47 }
 0x33f   : > { %v3311_v63 = vadd.s32 %v3310_v50, %v3300_v5  ;;  %vm3067_vm3 = vcmp.lt.s32.totalorder %v5572_v40, 0  ;;  %vm5763_vm4 = vcmp.le.f32.partialorder %v3065_v44, 0.7853982  ;;  %v3189_v1 = vsub.s32 4, %v5725_v42 }
 0x340   : > { %v3178_v2 = vor.u32 %v3177_v51, %v3176_v55  ;;  %v3181_v19 = vshll.u32 %v3180_v37, 23  ;;  %vm3315_vm2 = vc.u32 %v3290_v18, %v3309_v31  ;;  %v3314_v28 = vadd.s32 %v3309_v31, %v3290_v18 }
 0x341   : > { %v3312_v53 = vadd.s32 %v3311_v63, %v3302_v43  ;;  %v3190_v27 = vsel %vm3067_vm3, %v3189_v1, %v5725_v42  ;;  %vm3208_vm10 = vweird.f32 %v5572_v40  ;;  %vm3222_vm11 = vcmp.lt.s32.totalorder %v5579_v8, 0 }
 0x342   : > { %v3182_v30 = vor.u32 4788187, %v3181_v19  ;;  %v3185_v25 = vcvt.s32.f32 %v3178_v2  ;;  %v3192_v20 = vsel %vm5763_vm4, 0, %v3190_v27  ;;  %vm3221_vm12 = vcmp.le.f32.partialorder %v3220_v45, 0.7853982 }
 0x343   : > { %v3316_v29 = vadd.s32 1, %v3312_v53  ;;  %v3209_v46 = vadd.s32 3, %v3192_v20  ;;  %vm3363_vm15 = vweird.f32 %v5579_v8 }
 0x344   : > { %v3183_v57 = vand.u32 2147483647, %v3182_v30 }
 0x345   : > { %v3317_v7 = vsel %vm3315_vm2, %v3316_v29, %v3312_v53  ;;  %v3210_v14 = vand.u32 3, %v3209_v46 }
 0x346   : > { %v3186_v35 = vmul.f32 %v3185_v25, %v3183_v57  ;;  %v3318_v34 = vadd.s32 %v3317_v7, %v3313_v26 }
 0x347   : > { %vm3212_vm6 = vcmp.eq.s32.totalorder %v3210_v14, 0  ;;  %vm3215_vm7 = vcmp.eq.s32.totalorder %v3210_v14, 2  ;;  %vm3211_vm9 = vcmp.lt.s32.totalorder %v3210_v14, 2 }
 0x348   : > { %v3187_v17 = vxor.u32 2147483648, %v3186_v35  ;;  %v3319_v41 = vadd.s32 536870912, %v3318_v34 }
 0x34a   : > { %v3188_v24 = vsel %vm3067_vm3, %v3187_v17, %v3186_v35  ;;  %v3320_v12 = vshrl.u32 %v3319_v41, 30 }
 0x34b   : > { %v3191_v11 = vsel %vm5763_vm4, %v5572_v40, %v3188_v24 }
 0x34c   : > { %v3193_v56 = vmul.f32 %v3191_v11, %v3191_v11  ;;  %v3321_v9 = vshll.u32 %v3320_v12, 30  ;;  %v3344_v47 = vsub.s32 4, %v3320_v12 }
 0x34e   : > { %v3194_v38 = vmul.f32 -0.001358992, %v3193_v56  ;;  %v3201_v13 = vmul.f32 -0.00019511016, %v3193_v56  ;;  %v3322_v52 = vsub.s32 %v3318_v34, %v3321_v9  ;;  %v3345_v29 = vsel %vm3222_vm11, %v3344_v47, %v3320_v12 }
 0x34f   : > { %v3347_v7 = vsel %vm3221_vm12, 0, %v3345_v29 }
 0x350   : > { %v3195_v21 = vadd.f32 0.041655596, %v3194_v38  ;;  %v3202_v44 = vadd.f32 0.008332121, %v3201_v13  ;;  %vm3323_vm5 = vcmp.lt.s32.totalorder %v3322_v52, 0  ;;  %v3324_v10 = vsub.s32 0, %v3322_v52 }
 0x351   : > { %v3364_v1 = vadd.s32 3, %v3347_v7 }
 0x352   : > { %v3196_v22 = vmul.f32 %v3195_v21, %v3193_v56  ;;  %v3203_v61 = vmul.f32 %v3202_v44, %v3193_v56  ;;  %v3325_v16 = vsel %vm3323_vm5, %v3324_v10, %v3322_v52 }
 0x353   : > { %v3326_v6 = vclz %v3325_v16  ;;  %v3365_v27 = vand.u32 3, %v3364_v1 }
 0x354   : > { %v3197_v59 = vadd.f32 -0.4999988, %v3196_v22  ;;  %v3204_v0 = vadd.f32 -0.16666654, %v3203_v61 }
 0x355   : > { %v3522_v60 = vadd.s32 4294967294, %v3326_v6  ;;  %vm3367_vm13 = vcmp.eq.s32.totalorder %v3365_v27, 0  ;;  %vm3370_vm0 = vcmp.eq.s32.totalorder %v3365_v27, 2  ;;  %vm3366_vm14 = vcmp.lt.s32.totalorder %v3365_v27, 2 }
 0x356   : > { %v3198_v48 = vmul.f32 %v3197_v59, %v3193_v56  ;;  %v3205_v42 = vmul.f32 %v3204_v0, %v3193_v56 }
 0x357   : > { %vm3523_vm8 = vcmp.lt.s32.totalorder %v3522_v60, 0 }
 0x358   : > { %v3199_v33 = vadd.f32 1.0, %v3198_v48  ;;  %v3206_v62 = vadd.f32 1.0, %v3205_v42  ;;  %v3329_v39 = vsel %vm3523_vm8, 0, %v3522_v60 }
 0x359   : > { %v3330_v3 = vsub.s32 32, %v3329_v39  ;;  %v3334_v15 = vsub.s32 4294967266, %v3329_v39  ;;  %v3331_v55 = vshll.u32 %v3322_v52, %v3329_v39 }
 0x35a   : > { %v3207_v4 = vmul.f32 %v3206_v62, %v3191_v11  ;;  %v3216_v58 = vxor.u32 2147483648, %v3199_v33 }
 0x35b   : > { %v3332_v51 = vshrl.u32 %v3314_v28, %v3330_v3  ;;  %v3335_v37 = vadd.s32 127, %v3334_v15 }
 0x35c   : > { %v3213_v32 = vxor.u32 2147483648, %v3207_v4  ;;  %v3217_v54 = vsel %vm3215_vm7, %v3216_v58, %v3207_v4 }
 0x35d   : > { %v3333_v50 = vor.u32 %v3332_v51, %v3331_v55  ;;  %v3336_v2 = vshll.u32 %v3335_v37, 23 }
 0x35e   : > { %v3214_v49 = vsel %vm3212_vm6, %v3199_v33, %v3213_v32 }
 0x35f   : > { %v3218_v5 = vsel %vm3211_vm9, %v3214_v49, %v3217_v54  ;;  %v3337_v23 = vor.u32 4788187, %v3336_v2  ;;  %v3340_v43 = vcvt.s32.f32 %v3333_v50 }
 0x360   : > { %v3219_v19 = vsel %vm3208_vm10, nan, %v3218_v5 }
 0x361   : > { %3389 = vst [vmem:[%s4352_s20 + $0x70] sm:$0xff] %v3219_v19  ;;  %v3338_v18 = vand.u32 2147483647, %v3337_v23 }
 0x363   : > { %v3341_v63 = vmul.f32 %v3340_v43, %v3338_v18 }
 0x365   : > { %v3342_v30 = vxor.u32 2147483648, %v3341_v63 }
 0x367   : > { %v3343_v31 = vsel %vm3222_vm11, %v3342_v30, %v3341_v63 }
 0x368   : > { %v3346_v40 = vsel %vm3221_vm12, %v5579_v8, %v3343_v31 }
 0x369   : > { %v3348_v53 = vmul.f32 %v3346_v40, %v3346_v40 }
 0x36b   : > { %v3349_v57 = vmul.f32 -0.001358992, %v3348_v53  ;;  %v3356_v25 = vmul.f32 -0.00019511016, %v3348_v53 }
 0x36d   : > { %v3350_v35 = vadd.f32 0.041655596, %v3349_v57  ;;  %v3357_v26 = vadd.f32 0.008332121, %v3356_v25 }
 0x36f   : > { %v3351_v17 = vmul.f32 %v3350_v35, %v3348_v53  ;;  %v3358_v34 = vmul.f32 %v3357_v26, %v3348_v53 }
 0x371   : > { %v3352_v36 = vadd.f32 -0.4999988, %v3351_v17  ;;  %v3359_v24 = vadd.f32 -0.16666654, %v3358_v34 }
 0x373   : > { %v3353_v41 = vmul.f32 %v3352_v36, %v3348_v53  ;;  %v3360_v45 = vmul.f32 %v3359_v24, %v3348_v53 }
 0x375   : > { %v3354_v11 = vadd.f32 1.0, %v3353_v41  ;;  %v3361_v56 = vadd.f32 1.0, %v3360_v45 }
 0x377   : > { %v3362_v12 = vmul.f32 %v3361_v56, %v3346_v40  ;;  %v3371_v38 = vxor.u32 2147483648, %v3354_v11 }
 0x379   : > { %v3368_v13 = vxor.u32 2147483648, %v3362_v12  ;;  %v3372_v21 = vsel %vm3370_vm0, %v3371_v38, %v3362_v12 }
 0x37b   : > { %v3369_v9 = vsel %vm3367_vm13, %v3354_v11, %v3368_v13 }
 0x37c   : > { %v3373_v44 = vsel %vm3366_vm14, %v3369_v9, %v3372_v21 }
 0x37d   : > { %v3374_v52 = vsel %vm3363_vm15, nan, %v3373_v44 }
 0x37e   : > { %3390 = vst [vmem:[%s4352_s20 + $0x78] sm:$0xff] %v3374_v52 }
 0x37f   : > { %3614 = shalt.err (!%p3611_p3)
}
 0x380   : > { %s3658_s10 = smov 128   ;;  %s3659_s11 = smov 8  }
 0x381   : > { %3538 = dma.vmem_to_hbm [thread:$0]  (%p3718_p5), %s3405_s28, 2048, %s3407_s29, %s3392_s16, %s3658_s10, %s3658_s10, %s3659_s11  }
 0x382 PF: > { %p3544_p4 = scmp.ge.s32.totalorder %s3649_s15, 2  ;;  %s3421_s17 = sand.u32 1, %s3637_s12  }
 0x383   : > { %s3422_s19 = scalar_lea.sflag [#allocation3], %s3421_s17 }
 0x384   : > { %p3541_p7 = pnand %p3544_p4, %p3722_p6 }
 0x386   : > { %p3542_p8 = pneg %p3541_p7 }
 0x388   : > { %3632 = dma.done.wait (%p3542_p8), %s3422_s19, 2048  }
 0x389   : > { %3634 = vsyncadd (%p3542_p8), %s3422_s19, 4294965248  ;;  %p13_p9 = scmp.ge.s32.totalorder %s3705_s18, 10   ;;  %s5842_s12 = smov %s3641_s13 }
 0x38a   : > { %s5843_s13 = smov %s3645_s14  ;;  %s5844_s14 = smov %s3716_s21 }
 0x38b   : > { %s5845_s15 = smov %s3705_s18  ;;  %15 = sbr.rel (!%p13_p9) target bundleno = 3 (0x3), region = 67 }
 0x390   :  { %3428 = vsyncpa [#allocation3], 1 }
 0x391   :  { %3430 = vsyncpa [#allocation3 + $0x1], 1 }

</bundles_post_ra>
